<compile_context>
chip_gen: v6e
topology: v6e:2x2x1
jax: 0.10.0
libtpu: 0.0.40
codegen_flags: <defaults>
</compile_context>

<pallas_src>
import numpy as np

import jax
import jax.numpy as jnp
from jax import lax
from jax.experimental import pallas as pl
from jax.experimental.pallas import tpu as pltpu

# Static LeNet geometry (32x32 single-channel input).
_C1, _C2 = 6, 16           # conv output channels
_K = 5                     # conv kernel size
_H0 = 32                   # input spatial
_H1 = _H0 - _K + 1         # 28 : conv1 output spatial
_P1 = _H1 // 2             # 14 : pool1 output spatial
_H2 = _P1 - _K + 1         # 10 : conv2 output spatial
_P2 = _H2 // 2             # 5  : pool2 output spatial
_FC1, _FC2, _FC3 = 120, 84, 10


# ----------------------------------------------------------------------------
# Fused Pallas kernel: whole network, one grid step, everything in VMEM/vregs.
# ----------------------------------------------------------------------------
def _lenet_kernel(x_ref, g1_ref, b1_ref, sh1_ref, sw1_ref,
                  g2_ref, b2_ref, sh2_ref, sw2_ref,
                  w1g_ref, fb1_ref, w2t_ref, fb2_ref, w3t_ref, fb3_ref,
                  out_ref, p1_scr, p2_scr):
    f32 = jnp.float32
    batch = x_ref.shape[0]

    def mm(a, b):
        return jnp.dot(a, b, preferred_element_type=f32)

    for b in range(batch):  # batch is tiny; unrolled per batch element
        # ---- conv1 + bias + ReLU: accumulate (28,32) @ (32, 6*28) over kh taps
        acc1 = b1_ref[...]                                    # (1, 168), broadcasts
        for i in range(_K):
            xi = x_ref[b, pl.ds(i, _H1), :]                   # (28, 32)
            acc1 = acc1 + mm(xi, g1_ref[i])                   # (28, 168)
        acc1 = jnp.maximum(acc1, 0.0)

        # ---- 2x2 max-pool: row-pair then per-channel column-pair selection
        u1 = jnp.maximum(mm(sh1_ref[0], acc1), mm(sh1_ref[1], acc1))   # (14, 168)
        p1 = jnp.maximum(mm(u1, sw1_ref[0]), mm(u1, sw1_ref[1]))       # (14, 84)
        p1_scr[...] = p1

        # ---- conv2 + bias + ReLU: accumulate (10,84) @ (84, 16*10) over kh taps
        acc2 = b2_ref[...]                                    # (1, 160), broadcasts
        for i in range(_K):
            ri = p1_scr[pl.ds(i, _H2), :]                     # (10, 84)
            acc2 = acc2 + mm(ri, g2_ref[i])                   # (10, 160)
        acc2 = jnp.maximum(acc2, 0.0)

        # ---- 2x2 max-pool
        u2 = jnp.maximum(mm(sh2_ref[0], acc2), mm(sh2_ref[1], acc2))   # (5, 160)
        p2 = jnp.maximum(mm(u2, sw2_ref[0]), mm(u2, sw2_ref[1]))       # (5, 80)
        p2_scr[...] = p2

        # ---- fc1 + ReLU (the NCHW flatten is folded into w1g's layout)
        y = fb1_ref[...]                                      # (1, 120)
        for h in range(_P2):
            y = y + mm(p2_scr[pl.ds(h, 1), :], w1g_ref[h])    # (1,80)@(80,120)
        y = jnp.maximum(y, 0.0)

        # ---- fc2 + ReLU, fc3
        y = jnp.maximum(mm(y, w2t_ref[...]) + fb2_ref[...], 0.0)       # (1, 84)
        y = mm(y, w3t_ref[...]) + fb3_ref[...]                         # (1, 10)

        out_ref[pl.ds(b, 1), :] = y.astype(out_ref.dtype)


def _zero_index_map(ndim):
    return lambda i: (0,) * ndim


@jax.jit
def net_forward(prepped, x):
    """x: (B, 1, 32, 32) float32 NCHW -> logits (B, 10)."""
    B = x.shape[0]
    x3 = x.reshape(B, _H0, _H0).astype(jnp.float32)   # squeeze Cin == 1

    operands = (
        x3,
        prepped["g1"], prepped["b1row"], prepped["sh1"], prepped["sw1"],
        prepped["g2"], prepped["b2row"], prepped["sh2"], prepped["sw2"],
        prepped["w1g"], prepped["fc1_b"],
        prepped["fc2_wt"], prepped["fc2_b"],
        prepped["fc3_wt"], prepped["fc3_b"],
    )
    in_specs = [pl.BlockSpec(op.shape, _zero_index_map(op.ndim)) for op in operands]

    return pl.pallas_call(
        _lenet_kernel,
        grid=(1,),
        out_shape=jax.ShapeDtypeStruct((B, _FC3), jnp.float32),
        in_specs=in_specs,
        out_specs=pl.BlockSpec((B, _FC3), _zero_index_map(2)),
        scratch_shapes=[
            pltpu.VMEM((_P1, _C1 * _P1), jnp.float32),   # pooled conv1 activation
            pltpu.VMEM((_P2, _C2 * _P2), jnp.float32),   # pooled conv2 activation
        ],
        compiler_params=pltpu.CompilerParams(
            dimension_semantics=("arbitrary",)),
    )(*operands)


# ----------------------------------------------------------------------------
# One-time host-side repack of the canonical (PyTorch-layout) parameters into
# the structured operands the fused kernel consumes (runs once at init).
# ----------------------------------------------------------------------------
def prep_pallas_params(params):
    w1 = np.asarray(params["conv1_w"], np.float32)   # (6, 1, 5, 5)
    b1 = np.asarray(params["conv1_b"], np.float32)   # (6,)
    w2 = np.asarray(params["conv2_w"], np.float32)   # (16, 6, 5, 5)
    b2 = np.asarray(params["conv2_b"], np.float32)   # (16,)
    fw1 = np.asarray(params["fc1_w"], np.float32)    # (120, 400)
    fb1 = np.asarray(params["fc1_b"], np.float32)
    fw2 = np.asarray(params["fc2_w"], np.float32)    # (84, 120)
    fb2 = np.asarray(params["fc2_b"], np.float32)
    fw3 = np.asarray(params["fc3_w"], np.float32)    # (10, 84)
    fb3 = np.asarray(params["fc3_b"], np.float32)

    # conv1 as width-banded matmuls: g1[i, ow+j, co*28+ow] = w1[co, 0, i, j]
    g1 = np.zeros((_K, _H0, _C1 * _H1), np.float32)
    for i in range(_K):
        for co in range(_C1):
            for ow in range(_H1):
                for j in range(_K):
                    g1[i, ow + j, co * _H1 + ow] = w1[co, 0, i, j]
    b1row = np.zeros((1, _C1 * _H1), np.float32)
    for co in range(_C1):
        b1row[0, co * _H1:(co + 1) * _H1] = b1[co]

    # pool1 selection matrices: rows (14,28), per-channel columns (168,84)
    sh1 = np.zeros((2, _P1, _H1), np.float32)
    sw1 = np.zeros((2, _C1 * _H1, _C1 * _P1), np.float32)
    for d in range(2):
        for p in range(_P1):
            sh1[d, p, 2 * p + d] = 1.0
        for co in range(_C1):
            for q in range(_P1):
                sw1[d, co * _H1 + 2 * q + d, co * _P1 + q] = 1.0

    # conv2 banded weights over the (ci*14 + w) pooled-activation axis:
    # g2[i, ci*14 + ow + j, co*10 + ow] = w2[co, ci, i, j]
    g2 = np.zeros((_K, _C1 * _P1, _C2 * _H2), np.float32)
    for i in range(_K):
        for co in range(_C2):
            for ci in range(_C1):
                for ow in range(_H2):
                    for j in range(_K):
                        g2[i, ci * _P1 + ow + j, co * _H2 + ow] = w2[co, ci, i, j]
    b2row = np.zeros((1, _C2 * _H2), np.float32)
    for co in range(_C2):
        b2row[0, co * _H2:(co + 1) * _H2] = b2[co]

    # pool2 selection matrices
    sh2 = np.zeros((2, _P2, _H2), np.float32)
    sw2 = np.zeros((2, _C2 * _H2, _C2 * _P2), np.float32)
    for d in range(2):
        for p in range(_P2):
            sh2[d, p, 2 * p + d] = 1.0
        for co in range(_C2):
            for q in range(_P2):
                sw2[d, co * _H2 + 2 * q + d, co * _P2 + q] = 1.0

    # fc1 with the NCHW flatten folded in:
    # feature f = co*25 + h*5 + w lives at pooled2[h, co*5 + w]
    w1g = np.zeros((_P2, _C2 * _P2, _FC1), np.float32)
    for h in range(_P2):
        for co in range(_C2):
            for w in range(_P2):
                w1g[h, co * _P2 + w, :] = fw1[:, co * _P2 * _P2 + h * _P2 + w]

    as_j = jnp.asarray
    return {
        "g1": as_j(g1), "b1row": as_j(b1row), "sh1": as_j(sh1), "sw1": as_j(sw1),
        "g2": as_j(g2), "b2row": as_j(b2row), "sh2": as_j(sh2), "sw2": as_j(sw2),
        "w1g": as_j(w1g), "fc1_b": as_j(fb1.reshape(1, -1)),
        "fc2_wt": as_j(np.ascontiguousarray(fw2.T)), "fc2_b": as_j(fb2.reshape(1, -1)),
        "fc3_wt": as_j(np.ascontiguousarray(fw3.T)), "fc3_b": as_j(fb3.reshape(1, -1)),
    }


# ----------------------------------------------------------------------------
# Deterministic parameter init (PyTorch default-style shapes / ranges).
# ----------------------------------------------------------------------------
def init_params(key):
    def uniform(k, shape, fan_in):
        bound = 1.0 / np.sqrt(float(fan_in))
        return jax.random.uniform(k, shape, jnp.float32, -bound, bound)

    ks = jax.random.split(key, 10)
    return {
        "conv1_w": uniform(ks[0], (6, 1, 5, 5), 25),
        "conv1_b": uniform(ks[1], (6,), 25),
        "conv2_w": uniform(ks[2], (16, 6, 5, 5), 150),
        "conv2_b": uniform(ks[3], (16,), 150),
        "fc1_w": uniform(ks[4], (120, 400), 400),
        "fc1_b": uniform(ks[5], (120,), 400),
        "fc2_w": uniform(ks[6], (84, 120), 120),
        "fc2_b": uniform(ks[7], (84,), 120),
        "fc3_w": uniform(ks[8], (10, 84), 84),
        "fc3_b": uniform(ks[9], (10,), 84),
    }


# ----------------------------------------------------------------------------
# Pure-JAX reference (mirrors the original PyTorch Net.forward) for validation.
# ----------------------------------------------------------------------------
def reference_forward(params, x):
    hp = lax.Precision.HIGHEST

    def conv(v, w, b):
        y = lax.conv_general_dilated(
            v, w, window_strides=(1, 1), padding="VALID",
            dimension_numbers=("NCHW", "OIHW", "NCHW"), precision=hp)
        return y + b.reshape(1, -1, 1, 1)

    def pool(v):
        return lax.reduce_window(v, -jnp.inf, lax.max,
                                 (1, 1, 2, 2), (1, 1, 2, 2), "VALID")

    y = pool(jax.nn.relu(conv(x, params["conv1_w"], params["conv1_b"])))
    y = pool(jax.nn.relu(conv(y, params["conv2_w"], params["conv2_b"])))
    y = y.reshape(y.shape[0], -1)
    y = jax.nn.relu(jnp.dot(y, params["fc1_w"].T, precision=hp) + params["fc1_b"])
    y = jax.nn.relu(jnp.dot(y, params["fc2_w"].T, precision=hp) + params["fc2_b"])
    return jnp.dot(y, params["fc3_w"].T, precision=hp) + params["fc3_b"]


if __name__ == "__main__":
    key = jax.random.PRNGKey(0)
    k_params, k_x = jax.random.split(key)
    params = init_params(k_params)            # canonical PyTorch-layout params
    prepped = prep_pallas_params(params)      # one-time repack for the fused kernel
    x = jax.random.normal(k_x, (2, 1, 32, 32), dtype=jnp.float32)

    out = net_forward(prepped, x)
    out = jax.block_until_ready(out)
    assert out.shape == (2, 10), out.shape

    ref = jax.block_until_ready(reference_forward(params, x))
    err = float(jnp.max(jnp.abs(out - ref)))
    assert err < 1e-2, f"Pallas kernel mismatch vs reference (max abs err {err})"
    print("KERNEL_OK")
</pallas_src>

<mosaic_0001>
module attributes {stable_mosaic.version = 11 : i64} {
  func.func @_lenet_kernel(%arg0: i32, %arg1: memref<2x32x32xf32, #tpu.memory_space<vmem>>, %arg2: memref<5x32x168xf32, #tpu.memory_space<vmem>>, %arg3: memref<1x168xf32, #tpu.memory_space<vmem>>, %arg4: memref<2x14x28xf32, #tpu.memory_space<vmem>>, %arg5: memref<2x168x84xf32, #tpu.memory_space<vmem>>, %arg6: memref<5x84x160xf32, #tpu.memory_space<vmem>>, %arg7: memref<1x160xf32, #tpu.memory_space<vmem>>, %arg8: memref<2x5x10xf32, #tpu.memory_space<vmem>>, %arg9: memref<2x160x80xf32, #tpu.memory_space<vmem>>, %arg10: memref<5x80x120xf32, #tpu.memory_space<vmem>>, %arg11: memref<1x120xf32, #tpu.memory_space<vmem>>, %arg12: memref<120x84xf32, #tpu.memory_space<vmem>>, %arg13: memref<1x84xf32, #tpu.memory_space<vmem>>, %arg14: memref<84x10xf32, #tpu.memory_space<vmem>>, %arg15: memref<1x10xf32, #tpu.memory_space<vmem>>, %arg16: memref<2x10xf32, #tpu.memory_space<vmem>>, %arg17: memref<14x84xf32, #tpu.memory_space<vmem>>, %arg18: memref<5x80xf32, #tpu.memory_space<vmem>>) attributes {dimension_semantics = [#tpu.dimension_semantics<arbitrary>], iteration_bounds = array<i64: 1>, scalar_prefetch = 0 : i64, scratch_operands = 2 : i64, tpu.core_type = #tpu.core_type<tc>, window_params = [{pipeline_mode = #tpu.pipeline_mode<synchronous>, transform_indices = @transform_0, window_bounds = array<i64: 2, 32, 32>}, {pipeline_mode = #tpu.pipeline_mode<synchronous>, transform_indices = @transform_1, window_bounds = array<i64: 5, 32, 168>}, {pipeline_mode = #tpu.pipeline_mode<synchronous>, transform_indices = @transform_2, window_bounds = array<i64: 1, 168>}, {pipeline_mode = #tpu.pipeline_mode<synchronous>, transform_indices = @transform_3, window_bounds = array<i64: 2, 14, 28>}, {pipeline_mode = #tpu.pipeline_mode<synchronous>, transform_indices = @transform_4, window_bounds = array<i64: 2, 168, 84>}, {pipeline_mode = #tpu.pipeline_mode<synchronous>, transform_indices = @transform_5, window_bounds = array<i64: 5, 84, 160>}, {pipeline_mode = #tpu.pipeline_mode<synchronous>, transform_indices = @transform_6, window_bounds = array<i64: 1, 160>}, {pipeline_mode = #tpu.pipeline_mode<synchronous>, transform_indices = @transform_7, window_bounds = array<i64: 2, 5, 10>}, {pipeline_mode = #tpu.pipeline_mode<synchronous>, transform_indices = @transform_8, window_bounds = array<i64: 2, 160, 80>}, {pipeline_mode = #tpu.pipeline_mode<synchronous>, transform_indices = @transform_9, window_bounds = array<i64: 5, 80, 120>}, {pipeline_mode = #tpu.pipeline_mode<synchronous>, transform_indices = @transform_10, window_bounds = array<i64: 1, 120>}, {pipeline_mode = #tpu.pipeline_mode<synchronous>, transform_indices = @transform_11, window_bounds = array<i64: 120, 84>}, {pipeline_mode = #tpu.pipeline_mode<synchronous>, transform_indices = @transform_12, window_bounds = array<i64: 1, 84>}, {pipeline_mode = #tpu.pipeline_mode<synchronous>, transform_indices = @transform_13, window_bounds = array<i64: 84, 10>}, {pipeline_mode = #tpu.pipeline_mode<synchronous>, transform_indices = @transform_14, window_bounds = array<i64: 1, 10>}, {pipeline_mode = #tpu.pipeline_mode<synchronous>, transform_indices = @transform_15, window_bounds = array<i64: 2, 10>}]} {
    %c0 = arith.constant 0 : index
    %c0_0 = arith.constant 0 : index
    %0 = vector.load %arg3[%c0, %c0_0] : memref<1x168xf32, #tpu.memory_space<vmem>>, vector<1x168xf32>
    %c0_1 = arith.constant 0 : index
    %c0_2 = arith.constant 0 : index
    %c0_3 = arith.constant 0 : index
    %1 = vector.load %arg1[%c0_1, %c0_2, %c0_3] : memref<2x32x32xf32, #tpu.memory_space<vmem>>, vector<1x28x32xf32>
    %2 = vector.shape_cast %1 : vector<1x28x32xf32> to vector<28x32xf32>
    %c0_4 = arith.constant 0 : index
    %c0_5 = arith.constant 0 : index
    %c0_6 = arith.constant 0 : index
    %3 = vector.load %arg2[%c0_4, %c0_5, %c0_6] : memref<5x32x168xf32, #tpu.memory_space<vmem>>, vector<1x32x168xf32>
    %4 = vector.shape_cast %3 : vector<1x32x168xf32> to vector<32x168xf32>
    %cst = arith.constant dense<0.000000e+00> : vector<28x168xf32>
    %5 = tpu.matmul %2, %4, %cst {dimension_numbers = #tpu.dot_dimension_numbers<[1], [0], [0], [1], [0, 0, 1, 1], [], []>} : vector<28x32xf32>, vector<32x168xf32>, vector<28x168xf32> -> vector<28x168xf32>
    %6 = vector.broadcast %0 : vector<1x168xf32> to vector<28x168xf32>
    %7 = arith.addf %6, %5 : vector<28x168xf32>
    %c0_7 = arith.constant 0 : index
    %c1 = arith.constant 1 : index
    %c0_8 = arith.constant 0 : index
    %8 = vector.load %arg1[%c0_7, %c1, %c0_8] : memref<2x32x32xf32, #tpu.memory_space<vmem>>, vector<1x28x32xf32>
    %9 = vector.shape_cast %8 : vector<1x28x32xf32> to vector<28x32xf32>
    %c1_9 = arith.constant 1 : index
    %c0_10 = arith.constant 0 : index
    %c0_11 = arith.constant 0 : index
    %10 = vector.load %arg2[%c1_9, %c0_10, %c0_11] : memref<5x32x168xf32, #tpu.memory_space<vmem>>, vector<1x32x168xf32>
    %11 = vector.shape_cast %10 : vector<1x32x168xf32> to vector<32x168xf32>
    %cst_12 = arith.constant dense<0.000000e+00> : vector<28x168xf32>
    %12 = tpu.matmul %9, %11, %cst_12 {dimension_numbers = #tpu.dot_dimension_numbers<[1], [0], [0], [1], [0, 0, 1, 1], [], []>} : vector<28x32xf32>, vector<32x168xf32>, vector<28x168xf32> -> vector<28x168xf32>
    %13 = arith.addf %7, %12 : vector<28x168xf32>
    %c0_13 = arith.constant 0 : index
    %c2 = arith.constant 2 : index
    %c0_14 = arith.constant 0 : index
    %14 = vector.load %arg1[%c0_13, %c2, %c0_14] : memref<2x32x32xf32, #tpu.memory_space<vmem>>, vector<1x28x32xf32>
    %15 = vector.shape_cast %14 : vector<1x28x32xf32> to vector<28x32xf32>
    %c2_15 = arith.constant 2 : index
    %c0_16 = arith.constant 0 : index
    %c0_17 = arith.constant 0 : index
    %16 = vector.load %arg2[%c2_15, %c0_16, %c0_17] : memref<5x32x168xf32, #tpu.memory_space<vmem>>, vector<1x32x168xf32>
    %17 = vector.shape_cast %16 : vector<1x32x168xf32> to vector<32x168xf32>
    %cst_18 = arith.constant dense<0.000000e+00> : vector<28x168xf32>
    %18 = tpu.matmul %15, %17, %cst_18 {dimension_numbers = #tpu.dot_dimension_numbers<[1], [0], [0], [1], [0, 0, 1, 1], [], []>} : vector<28x32xf32>, vector<32x168xf32>, vector<28x168xf32> -> vector<28x168xf32>
    %19 = arith.addf %13, %18 : vector<28x168xf32>
    %c0_19 = arith.constant 0 : index
    %c3 = arith.constant 3 : index
    %c0_20 = arith.constant 0 : index
    %20 = vector.load %arg1[%c0_19, %c3, %c0_20] : memref<2x32x32xf32, #tpu.memory_space<vmem>>, vector<1x28x32xf32>
    %21 = vector.shape_cast %20 : vector<1x28x32xf32> to vector<28x32xf32>
    %c3_21 = arith.constant 3 : index
    %c0_22 = arith.constant 0 : index
    %c0_23 = arith.constant 0 : index
    %22 = vector.load %arg2[%c3_21, %c0_22, %c0_23] : memref<5x32x168xf32, #tpu.memory_space<vmem>>, vector<1x32x168xf32>
    %23 = vector.shape_cast %22 : vector<1x32x168xf32> to vector<32x168xf32>
    %cst_24 = arith.constant dense<0.000000e+00> : vector<28x168xf32>
    %24 = tpu.matmul %21, %23, %cst_24 {dimension_numbers = #tpu.dot_dimension_numbers<[1], [0], [0], [1], [0, 0, 1, 1], [], []>} : vector<28x32xf32>, vector<32x168xf32>, vector<28x168xf32> -> vector<28x168xf32>
    %25 = arith.addf %19, %24 : vector<28x168xf32>
    %c0_25 = arith.constant 0 : index
    %c4 = arith.constant 4 : index
    %c0_26 = arith.constant 0 : index
    %26 = vector.load %arg1[%c0_25, %c4, %c0_26] : memref<2x32x32xf32, #tpu.memory_space<vmem>>, vector<1x28x32xf32>
    %27 = vector.shape_cast %26 : vector<1x28x32xf32> to vector<28x32xf32>
    %c4_27 = arith.constant 4 : index
    %c0_28 = arith.constant 0 : index
    %c0_29 = arith.constant 0 : index
    %28 = vector.load %arg2[%c4_27, %c0_28, %c0_29] : memref<5x32x168xf32, #tpu.memory_space<vmem>>, vector<1x32x168xf32>
    %29 = vector.shape_cast %28 : vector<1x32x168xf32> to vector<32x168xf32>
    %cst_30 = arith.constant dense<0.000000e+00> : vector<28x168xf32>
    %30 = tpu.matmul %27, %29, %cst_30 {dimension_numbers = #tpu.dot_dimension_numbers<[1], [0], [0], [1], [0, 0, 1, 1], [], []>} : vector<28x32xf32>, vector<32x168xf32>, vector<28x168xf32> -> vector<28x168xf32>
    %31 = arith.addf %25, %30 : vector<28x168xf32>
    %cst_31 = arith.constant 0.000000e+00 : f32
    %32 = vector.broadcast %cst_31 : f32 to vector<28x168xf32>
    %33 = arith.maximumf %31, %32 : vector<28x168xf32>
    %c0_32 = arith.constant 0 : index
    %c0_33 = arith.constant 0 : index
    %c0_34 = arith.constant 0 : index
    %34 = vector.load %arg4[%c0_32, %c0_33, %c0_34] : memref<2x14x28xf32, #tpu.memory_space<vmem>>, vector<1x14x28xf32>
    %35 = vector.shape_cast %34 : vector<1x14x28xf32> to vector<14x28xf32>
    %cst_35 = arith.constant dense<0.000000e+00> : vector<14x168xf32>
    %36 = tpu.matmul %35, %33, %cst_35 {dimension_numbers = #tpu.dot_dimension_numbers<[1], [0], [0], [1], [0, 0, 1, 1], [], []>} : vector<14x28xf32>, vector<28x168xf32>, vector<14x168xf32> -> vector<14x168xf32>
    %c1_36 = arith.constant 1 : index
    %c0_37 = arith.constant 0 : index
    %c0_38 = arith.constant 0 : index
    %37 = vector.load %arg4[%c1_36, %c0_37, %c0_38] : memref<2x14x28xf32, #tpu.memory_space<vmem>>, vector<1x14x28xf32>
    %38 = vector.shape_cast %37 : vector<1x14x28xf32> to vector<14x28xf32>
    %cst_39 = arith.constant dense<0.000000e+00> : vector<14x168xf32>
    %39 = tpu.matmul %38, %33, %cst_39 {dimension_numbers = #tpu.dot_dimension_numbers<[1], [0], [0], [1], [0, 0, 1, 1], [], []>} : vector<14x28xf32>, vector<28x168xf32>, vector<14x168xf32> -> vector<14x168xf32>
    %40 = arith.maximumf %36, %39 : vector<14x168xf32>
    %c0_40 = arith.constant 0 : index
    %c0_41 = arith.constant 0 : index
    %c0_42 = arith.constant 0 : index
    %41 = vector.load %arg5[%c0_40, %c0_41, %c0_42] : memref<2x168x84xf32, #tpu.memory_space<vmem>>, vector<1x168x84xf32>
    %42 = vector.shape_cast %41 : vector<1x168x84xf32> to vector<168x84xf32>
    %cst_43 = arith.constant dense<0.000000e+00> : vector<14x84xf32>
    %43 = tpu.matmul %40, %42, %cst_43 {dimension_numbers = #tpu.dot_dimension_numbers<[1], [0], [0], [1], [0, 0, 1, 1], [], []>} : vector<14x168xf32>, vector<168x84xf32>, vector<14x84xf32> -> vector<14x84xf32>
    %c1_44 = arith.constant 1 : index
    %c0_45 = arith.constant 0 : index
    %c0_46 = arith.constant 0 : index
    %44 = vector.load %arg5[%c1_44, %c0_45, %c0_46] : memref<2x168x84xf32, #tpu.memory_space<vmem>>, vector<1x168x84xf32>
    %45 = vector.shape_cast %44 : vector<1x168x84xf32> to vector<168x84xf32>
    %cst_47 = arith.constant dense<0.000000e+00> : vector<14x84xf32>
    %46 = tpu.matmul %40, %45, %cst_47 {dimension_numbers = #tpu.dot_dimension_numbers<[1], [0], [0], [1], [0, 0, 1, 1], [], []>} : vector<14x168xf32>, vector<168x84xf32>, vector<14x84xf32> -> vector<14x84xf32>
    %47 = arith.maximumf %43, %46 : vector<14x84xf32>
    %c0_48 = arith.constant 0 : index
    %c0_49 = arith.constant 0 : index
    %48 = vector.load %arg17[%c0_48, %c0_49] : memref<14x84xf32, #tpu.memory_space<vmem>>, vector<14x84xf32>
    tpu.vector_store %arg17[%c0_48, %c0_49], %47 {strides = array<i32>} : memref<14x84xf32, #tpu.memory_space<vmem>>, vector<14x84xf32>,
    %c0_50 = arith.constant 0 : index
    %c0_51 = arith.constant 0 : index
    %49 = vector.load %arg7[%c0_50, %c0_51] : memref<1x160xf32, #tpu.memory_space<vmem>>, vector<1x160xf32>
    %c0_52 = arith.constant 0 : index
    %c0_53 = arith.constant 0 : index
    %50 = vector.load %arg17[%c0_52, %c0_53] : memref<14x84xf32, #tpu.memory_space<vmem>>, vector<10x84xf32>
    %c0_54 = arith.constant 0 : index
    %c0_55 = arith.constant 0 : index
    %c0_56 = arith.constant 0 : index
    %51 = vector.load %arg6[%c0_54, %c0_55, %c0_56] : memref<5x84x160xf32, #tpu.memory_space<vmem>>, vector<1x84x160xf32>
    %52 = vector.shape_cast %51 : vector<1x84x160xf32> to vector<84x160xf32>
    %cst_57 = arith.constant dense<0.000000e+00> : vector<10x160xf32>
    %53 = tpu.matmul %50, %52, %cst_57 {dimension_numbers = #tpu.dot_dimension_numbers<[1], [0], [0], [1], [0, 0, 1, 1], [], []>} : vector<10x84xf32>, vector<84x160xf32>, vector<10x160xf32> -> vector<10x160xf32>
    %54 = vector.broadcast %49 : vector<1x160xf32> to vector<10x160xf32>
    %55 = arith.addf %54, %53 : vector<10x160xf32>
    %c1_58 = arith.constant 1 : index
    %c0_59 = arith.constant 0 : index
    %56 = vector.load %arg17[%c1_58, %c0_59] : memref<14x84xf32, #tpu.memory_space<vmem>>, vector<10x84xf32>
    %c1_60 = arith.constant 1 : index
    %c0_61 = arith.constant 0 : index
    %c0_62 = arith.constant 0 : index
    %57 = vector.load %arg6[%c1_60, %c0_61, %c0_62] : memref<5x84x160xf32, #tpu.memory_space<vmem>>, vector<1x84x160xf32>
    %58 = vector.shape_cast %57 : vector<1x84x160xf32> to vector<84x160xf32>
    %cst_63 = arith.constant dense<0.000000e+00> : vector<10x160xf32>
    %59 = tpu.matmul %56, %58, %cst_63 {dimension_numbers = #tpu.dot_dimension_numbers<[1], [0], [0], [1], [0, 0, 1, 1], [], []>} : vector<10x84xf32>, vector<84x160xf32>, vector<10x160xf32> -> vector<10x160xf32>
    %60 = arith.addf %55, %59 : vector<10x160xf32>
    %c2_64 = arith.constant 2 : index
    %c0_65 = arith.constant 0 : index
    %61 = vector.load %arg17[%c2_64, %c0_65] : memref<14x84xf32, #tpu.memory_space<vmem>>, vector<10x84xf32>
    %c2_66 = arith.constant 2 : index
    %c0_67 = arith.constant 0 : index
    %c0_68 = arith.constant 0 : index
    %62 = vector.load %arg6[%c2_66, %c0_67, %c0_68] : memref<5x84x160xf32, #tpu.memory_space<vmem>>, vector<1x84x160xf32>
    %63 = vector.shape_cast %62 : vector<1x84x160xf32> to vector<84x160xf32>
    %cst_69 = arith.constant dense<0.000000e+00> : vector<10x160xf32>
    %64 = tpu.matmul %61, %63, %cst_69 {dimension_numbers = #tpu.dot_dimension_numbers<[1], [0], [0], [1], [0, 0, 1, 1], [], []>} : vector<10x84xf32>, vector<84x160xf32>, vector<10x160xf32> -> vector<10x160xf32>
    %65 = arith.addf %60, %64 : vector<10x160xf32>
    %c3_70 = arith.constant 3 : index
    %c0_71 = arith.constant 0 : index
    %66 = vector.load %arg17[%c3_70, %c0_71] : memref<14x84xf32, #tpu.memory_space<vmem>>, vector<10x84xf32>
    %c3_72 = arith.constant 3 : index
    %c0_73 = arith.constant 0 : index
    %c0_74 = arith.constant 0 : index
    %67 = vector.load %arg6[%c3_72, %c0_73, %c0_74] : memref<5x84x160xf32, #tpu.memory_space<vmem>>, vector<1x84x160xf32>
    %68 = vector.shape_cast %67 : vector<1x84x160xf32> to vector<84x160xf32>
    %cst_75 = arith.constant dense<0.000000e+00> : vector<10x160xf32>
    %69 = tpu.matmul %66, %68, %cst_75 {dimension_numbers = #tpu.dot_dimension_numbers<[1], [0], [0], [1], [0, 0, 1, 1], [], []>} : vector<10x84xf32>, vector<84x160xf32>, vector<10x160xf32> -> vector<10x160xf32>
    %70 = arith.addf %65, %69 : vector<10x160xf32>
    %c4_76 = arith.constant 4 : index
    %c0_77 = arith.constant 0 : index
    %71 = vector.load %arg17[%c4_76, %c0_77] : memref<14x84xf32, #tpu.memory_space<vmem>>, vector<10x84xf32>
    %c4_78 = arith.constant 4 : index
    %c0_79 = arith.constant 0 : index
    %c0_80 = arith.constant 0 : index
    %72 = vector.load %arg6[%c4_78, %c0_79, %c0_80] : memref<5x84x160xf32, #tpu.memory_space<vmem>>, vector<1x84x160xf32>
    %73 = vector.shape_cast %72 : vector<1x84x160xf32> to vector<84x160xf32>
    %cst_81 = arith.constant dense<0.000000e+00> : vector<10x160xf32>
    %74 = tpu.matmul %71, %73, %cst_81 {dimension_numbers = #tpu.dot_dimension_numbers<[1], [0], [0], [1], [0, 0, 1, 1], [], []>} : vector<10x84xf32>, vector<84x160xf32>, vector<10x160xf32> -> vector<10x160xf32>
    %75 = arith.addf %70, %74 : vector<10x160xf32>
    %cst_82 = arith.constant 0.000000e+00 : f32
    %76 = vector.broadcast %cst_82 : f32 to vector<10x160xf32>
    %77 = arith.maximumf %75, %76 : vector<10x160xf32>
    %c0_83 = arith.constant 0 : index
    %c0_84 = arith.constant 0 : index
    %c0_85 = arith.constant 0 : index
    %78 = vector.load %arg8[%c0_83, %c0_84, %c0_85] : memref<2x5x10xf32, #tpu.memory_space<vmem>>, vector<1x5x10xf32>
    %79 = vector.shape_cast %78 : vector<1x5x10xf32> to vector<5x10xf32>
    %cst_86 = arith.constant dense<0.000000e+00> : vector<5x160xf32>
    %80 = tpu.matmul %79, %77, %cst_86 {dimension_numbers = #tpu.dot_dimension_numbers<[1], [0], [0], [1], [0, 0, 1, 1], [], []>} : vector<5x10xf32>, vector<10x160xf32>, vector<5x160xf32> -> vector<5x160xf32>
    %c1_87 = arith.constant 1 : index
    %c0_88 = arith.constant 0 : index
    %c0_89 = arith.constant 0 : index
    %81 = vector.load %arg8[%c1_87, %c0_88, %c0_89] : memref<2x5x10xf32, #tpu.memory_space<vmem>>, vector<1x5x10xf32>
    %82 = vector.shape_cast %81 : vector<1x5x10xf32> to vector<5x10xf32>
    %cst_90 = arith.constant dense<0.000000e+00> : vector<5x160xf32>
    %83 = tpu.matmul %82, %77, %cst_90 {dimension_numbers = #tpu.dot_dimension_numbers<[1], [0], [0], [1], [0, 0, 1, 1], [], []>} : vector<5x10xf32>, vector<10x160xf32>, vector<5x160xf32> -> vector<5x160xf32>
    %84 = arith.maximumf %80, %83 : vector<5x160xf32>
    %c0_91 = arith.constant 0 : index
    %c0_92 = arith.constant 0 : index
    %c0_93 = arith.constant 0 : index
    %85 = vector.load %arg9[%c0_91, %c0_92, %c0_93] : memref<2x160x80xf32, #tpu.memory_space<vmem>>, vector<1x160x80xf32>
    %86 = vector.shape_cast %85 : vector<1x160x80xf32> to vector<160x80xf32>
    %cst_94 = arith.constant dense<0.000000e+00> : vector<5x80xf32>
    %87 = tpu.matmul %84, %86, %cst_94 {dimension_numbers = #tpu.dot_dimension_numbers<[1], [0], [0], [1], [0, 0, 1, 1], [], []>} : vector<5x160xf32>, vector<160x80xf32>, vector<5x80xf32> -> vector<5x80xf32>
    %c1_95 = arith.constant 1 : index
    %c0_96 = arith.constant 0 : index
    %c0_97 = arith.constant 0 : index
    %88 = vector.load %arg9[%c1_95, %c0_96, %c0_97] : memref<2x160x80xf32, #tpu.memory_space<vmem>>, vector<1x160x80xf32>
    %89 = vector.shape_cast %88 : vector<1x160x80xf32> to vector<160x80xf32>
    %cst_98 = arith.constant dense<0.000000e+00> : vector<5x80xf32>
    %90 = tpu.matmul %84, %89, %cst_98 {dimension_numbers = #tpu.dot_dimension_numbers<[1], [0], [0], [1], [0, 0, 1, 1], [], []>} : vector<5x160xf32>, vector<160x80xf32>, vector<5x80xf32> -> vector<5x80xf32>
    %91 = arith.maximumf %87, %90 : vector<5x80xf32>
    %c0_99 = arith.constant 0 : index
    %c0_100 = arith.constant 0 : index
    %92 = vector.load %arg18[%c0_99, %c0_100] : memref<5x80xf32, #tpu.memory_space<vmem>>, vector<5x80xf32>
    tpu.vector_store %arg18[%c0_99, %c0_100], %91 {strides = array<i32>} : memref<5x80xf32, #tpu.memory_space<vmem>>, vector<5x80xf32>,
    %c0_101 = arith.constant 0 : index
    %c0_102 = arith.constant 0 : index
    %93 = vector.load %arg11[%c0_101, %c0_102] : memref<1x120xf32, #tpu.memory_space<vmem>>, vector<1x120xf32>
    %c0_103 = arith.constant 0 : index
    %c0_104 = arith.constant 0 : index
    %94 = vector.load %arg18[%c0_103, %c0_104] : memref<5x80xf32, #tpu.memory_space<vmem>>, vector<1x80xf32>
    %c0_105 = arith.constant 0 : index
    %c0_106 = arith.constant 0 : index
    %c0_107 = arith.constant 0 : index
    %95 = vector.load %arg10[%c0_105, %c0_106, %c0_107] : memref<5x80x120xf32, #tpu.memory_space<vmem>>, vector<1x80x120xf32>
    %96 = vector.shape_cast %95 : vector<1x80x120xf32> to vector<80x120xf32>
    %cst_108 = arith.constant dense<0.000000e+00> : vector<1x120xf32>
    %97 = tpu.matmul %94, %96, %cst_108 {dimension_numbers = #tpu.dot_dimension_numbers<[1], [0], [0], [1], [0, 0, 1, 1], [], []>} : vector<1x80xf32>, vector<80x120xf32>, vector<1x120xf32> -> vector<1x120xf32>
    %98 = arith.addf %93, %97 : vector<1x120xf32>
    %c1_109 = arith.constant 1 : index
    %c0_110 = arith.constant 0 : index
    %99 = vector.load %arg18[%c1_109, %c0_110] : memref<5x80xf32, #tpu.memory_space<vmem>>, vector<1x80xf32>
    %c1_111 = arith.constant 1 : index
    %c0_112 = arith.constant 0 : index
    %c0_113 = arith.constant 0 : index
    %100 = vector.load %arg10[%c1_111, %c0_112, %c0_113] : memref<5x80x120xf32, #tpu.memory_space<vmem>>, vector<1x80x120xf32>
    %101 = vector.shape_cast %100 : vector<1x80x120xf32> to vector<80x120xf32>
    %cst_114 = arith.constant dense<0.000000e+00> : vector<1x120xf32>
    %102 = tpu.matmul %99, %101, %cst_114 {dimension_numbers = #tpu.dot_dimension_numbers<[1], [0], [0], [1], [0, 0, 1, 1], [], []>} : vector<1x80xf32>, vector<80x120xf32>, vector<1x120xf32> -> vector<1x120xf32>
    %103 = arith.addf %98, %102 : vector<1x120xf32>
    %c2_115 = arith.constant 2 : index
    %c0_116 = arith.constant 0 : index
    %104 = vector.load %arg18[%c2_115, %c0_116] : memref<5x80xf32, #tpu.memory_space<vmem>>, vector<1x80xf32>
    %c2_117 = arith.constant 2 : index
    %c0_118 = arith.constant 0 : index
    %c0_119 = arith.constant 0 : index
    %105 = vector.load %arg10[%c2_117, %c0_118, %c0_119] : memref<5x80x120xf32, #tpu.memory_space<vmem>>, vector<1x80x120xf32>
    %106 = vector.shape_cast %105 : vector<1x80x120xf32> to vector<80x120xf32>
    %cst_120 = arith.constant dense<0.000000e+00> : vector<1x120xf32>
    %107 = tpu.matmul %104, %106, %cst_120 {dimension_numbers = #tpu.dot_dimension_numbers<[1], [0], [0], [1], [0, 0, 1, 1], [], []>} : vector<1x80xf32>, vector<80x120xf32>, vector<1x120xf32> -> vector<1x120xf32>
    %108 = arith.addf %103, %107 : vector<1x120xf32>
    %c3_121 = arith.constant 3 : index
    %c0_122 = arith.constant 0 : index
    %109 = vector.load %arg18[%c3_121, %c0_122] : memref<5x80xf32, #tpu.memory_space<vmem>>, vector<1x80xf32>
    %c3_123 = arith.constant 3 : index
    %c0_124 = arith.constant 0 : index
    %c0_125 = arith.constant 0 : index
    %110 = vector.load %arg10[%c3_123, %c0_124, %c0_125] : memref<5x80x120xf32, #tpu.memory_space<vmem>>, vector<1x80x120xf32>
    %111 = vector.shape_cast %110 : vector<1x80x120xf32> to vector<80x120xf32>
    %cst_126 = arith.constant dense<0.000000e+00> : vector<1x120xf32>
    %112 = tpu.matmul %109, %111, %cst_126 {dimension_numbers = #tpu.dot_dimension_numbers<[1], [0], [0], [1], [0, 0, 1, 1], [], []>} : vector<1x80xf32>, vector<80x120xf32>, vector<1x120xf32> -> vector<1x120xf32>
    %113 = arith.addf %108, %112 : vector<1x120xf32>
    %c4_127 = arith.constant 4 : index
    %c0_128 = arith.constant 0 : index
    %114 = vector.load %arg18[%c4_127, %c0_128] : memref<5x80xf32, #tpu.memory_space<vmem>>, vector<1x80xf32>
    %c4_129 = arith.constant 4 : index
    %c0_130 = arith.constant 0 : index
    %c0_131 = arith.constant 0 : index
    %115 = vector.load %arg10[%c4_129, %c0_130, %c0_131] : memref<5x80x120xf32, #tpu.memory_space<vmem>>, vector<1x80x120xf32>
    %116 = vector.shape_cast %115 : vector<1x80x120xf32> to vector<80x120xf32>
    %cst_132 = arith.constant dense<0.000000e+00> : vector<1x120xf32>
    %117 = tpu.matmul %114, %116, %cst_132 {dimension_numbers = #tpu.dot_dimension_numbers<[1], [0], [0], [1], [0, 0, 1, 1], [], []>} : vector<1x80xf32>, vector<80x120xf32>, vector<1x120xf32> -> vector<1x120xf32>
    %118 = arith.addf %113, %117 : vector<1x120xf32>
    %cst_133 = arith.constant 0.000000e+00 : f32
    %119 = vector.broadcast %cst_133 : f32 to vector<1x120xf32>
    %120 = arith.maximumf %118, %119 : vector<1x120xf32>
    %c0_134 = arith.constant 0 : index
    %c0_135 = arith.constant 0 : index
    %121 = vector.load %arg12[%c0_134, %c0_135] : memref<120x84xf32, #tpu.memory_space<vmem>>, vector<120x84xf32>
    %cst_136 = arith.constant dense<0.000000e+00> : vector<1x84xf32>
    %122 = tpu.matmul %120, %121, %cst_136 {dimension_numbers = #tpu.dot_dimension_numbers<[1], [0], [0], [1], [0, 0, 1, 1], [], []>} : vector<1x120xf32>, vector<120x84xf32>, vector<1x84xf32> -> vector<1x84xf32>
    %c0_137 = arith.constant 0 : index
    %c0_138 = arith.constant 0 : index
    %123 = vector.load %arg13[%c0_137, %c0_138] : memref<1x84xf32, #tpu.memory_space<vmem>>, vector<1x84xf32>
    %124 = arith.addf %122, %123 : vector<1x84xf32>
    %cst_139 = arith.constant 0.000000e+00 : f32
    %125 = vector.broadcast %cst_139 : f32 to vector<1x84xf32>
    %126 = arith.maximumf %124, %125 : vector<1x84xf32>
    %c0_140 = arith.constant 0 : index
    %c0_141 = arith.constant 0 : index
    %127 = vector.load %arg14[%c0_140, %c0_141] : memref<84x10xf32, #tpu.memory_space<vmem>>, vector<84x10xf32>
    %cst_142 = arith.constant dense<0.000000e+00> : vector<1x10xf32>
    %128 = tpu.matmul %126, %127, %cst_142 {dimension_numbers = #tpu.dot_dimension_numbers<[1], [0], [0], [1], [0, 0, 1, 1], [], []>} : vector<1x84xf32>, vector<84x10xf32>, vector<1x10xf32> -> vector<1x10xf32>
    %c0_143 = arith.constant 0 : index
    %c0_144 = arith.constant 0 : index
    %129 = vector.load %arg15[%c0_143, %c0_144] : memref<1x10xf32, #tpu.memory_space<vmem>>, vector<1x10xf32>
    %130 = arith.addf %128, %129 : vector<1x10xf32>
    %c0_145 = arith.constant 0 : index
    %c0_146 = arith.constant 0 : index
    %131 = vector.load %arg16[%c0_145, %c0_146] : memref<2x10xf32, #tpu.memory_space<vmem>>, vector<1x10xf32>
    tpu.vector_store %arg16[%c0_145, %c0_146], %130 {strides = array<i32>} : memref<2x10xf32, #tpu.memory_space<vmem>>, vector<1x10xf32>,
    %c0_147 = arith.constant 0 : index
    %c0_148 = arith.constant 0 : index
    %132 = vector.load %arg3[%c0_147, %c0_148] : memref<1x168xf32, #tpu.memory_space<vmem>>, vector<1x168xf32>
    %c1_149 = arith.constant 1 : index
    %c0_150 = arith.constant 0 : index
    %c0_151 = arith.constant 0 : index
    %133 = vector.load %arg1[%c1_149, %c0_150, %c0_151] : memref<2x32x32xf32, #tpu.memory_space<vmem>>, vector<1x28x32xf32>
    %134 = vector.shape_cast %133 : vector<1x28x32xf32> to vector<28x32xf32>
    %c0_152 = arith.constant 0 : index
    %c0_153 = arith.constant 0 : index
    %c0_154 = arith.constant 0 : index
    %135 = vector.load %arg2[%c0_152, %c0_153, %c0_154] : memref<5x32x168xf32, #tpu.memory_space<vmem>>, vector<1x32x168xf32>
    %136 = vector.shape_cast %135 : vector<1x32x168xf32> to vector<32x168xf32>
    %cst_155 = arith.constant dense<0.000000e+00> : vector<28x168xf32>
    %137 = tpu.matmul %134, %136, %cst_155 {dimension_numbers = #tpu.dot_dimension_numbers<[1], [0], [0], [1], [0, 0, 1, 1], [], []>} : vector<28x32xf32>, vector<32x168xf32>, vector<28x168xf32> -> vector<28x168xf32>
    %138 = vector.broadcast %132 : vector<1x168xf32> to vector<28x168xf32>
    %139 = arith.addf %138, %137 : vector<28x168xf32>
    %c1_156 = arith.constant 1 : index
    %c1_157 = arith.constant 1 : index
    %c0_158 = arith.constant 0 : index
    %140 = vector.load %arg1[%c1_156, %c1_157, %c0_158] : memref<2x32x32xf32, #tpu.memory_space<vmem>>, vector<1x28x32xf32>
    %141 = vector.shape_cast %140 : vector<1x28x32xf32> to vector<28x32xf32>
    %c1_159 = arith.constant 1 : index
    %c0_160 = arith.constant 0 : index
    %c0_161 = arith.constant 0 : index
    %142 = vector.load %arg2[%c1_159, %c0_160, %c0_161] : memref<5x32x168xf32, #tpu.memory_space<vmem>>, vector<1x32x168xf32>
    %143 = vector.shape_cast %142 : vector<1x32x168xf32> to vector<32x168xf32>
    %cst_162 = arith.constant dense<0.000000e+00> : vector<28x168xf32>
    %144 = tpu.matmul %141, %143, %cst_162 {dimension_numbers = #tpu.dot_dimension_numbers<[1], [0], [0], [1], [0, 0, 1, 1], [], []>} : vector<28x32xf32>, vector<32x168xf32>, vector<28x168xf32> -> vector<28x168xf32>
    %145 = arith.addf %139, %144 : vector<28x168xf32>
    %c1_163 = arith.constant 1 : index
    %c2_164 = arith.constant 2 : index
    %c0_165 = arith.constant 0 : index
    %146 = vector.load %arg1[%c1_163, %c2_164, %c0_165] : memref<2x32x32xf32, #tpu.memory_space<vmem>>, vector<1x28x32xf32>
    %147 = vector.shape_cast %146 : vector<1x28x32xf32> to vector<28x32xf32>
    %c2_166 = arith.constant 2 : index
    %c0_167 = arith.constant 0 : index
    %c0_168 = arith.constant 0 : index
    %148 = vector.load %arg2[%c2_166, %c0_167, %c0_168] : memref<5x32x168xf32, #tpu.memory_space<vmem>>, vector<1x32x168xf32>
    %149 = vector.shape_cast %148 : vector<1x32x168xf32> to vector<32x168xf32>
    %cst_169 = arith.constant dense<0.000000e+00> : vector<28x168xf32>
    %150 = tpu.matmul %147, %149, %cst_169 {dimension_numbers = #tpu.dot_dimension_numbers<[1], [0], [0], [1], [0, 0, 1, 1], [], []>} : vector<28x32xf32>, vector<32x168xf32>, vector<28x168xf32> -> vector<28x168xf32>
    %151 = arith.addf %145, %150 : vector<28x168xf32>
    %c1_170 = arith.constant 1 : index
    %c3_171 = arith.constant 3 : index
    %c0_172 = arith.constant 0 : index
    %152 = vector.load %arg1[%c1_170, %c3_171, %c0_172] : memref<2x32x32xf32, #tpu.memory_space<vmem>>, vector<1x28x32xf32>
    %153 = vector.shape_cast %152 : vector<1x28x32xf32> to vector<28x32xf32>
    %c3_173 = arith.constant 3 : index
    %c0_174 = arith.constant 0 : index
    %c0_175 = arith.constant 0 : index
    %154 = vector.load %arg2[%c3_173, %c0_174, %c0_175] : memref<5x32x168xf32, #tpu.memory_space<vmem>>, vector<1x32x168xf32>
    %155 = vector.shape_cast %154 : vector<1x32x168xf32> to vector<32x168xf32>
    %cst_176 = arith.constant dense<0.000000e+00> : vector<28x168xf32>
    %156 = tpu.matmul %153, %155, %cst_176 {dimension_numbers = #tpu.dot_dimension_numbers<[1], [0], [0], [1], [0, 0, 1, 1], [], []>} : vector<28x32xf32>, vector<32x168xf32>, vector<28x168xf32> -> vector<28x168xf32>
    %157 = arith.addf %151, %156 : vector<28x168xf32>
    %c1_177 = arith.constant 1 : index
    %c4_178 = arith.constant 4 : index
    %c0_179 = arith.constant 0 : index
    %158 = vector.load %arg1[%c1_177, %c4_178, %c0_179] : memref<2x32x32xf32, #tpu.memory_space<vmem>>, vector<1x28x32xf32>
    %159 = vector.shape_cast %158 : vector<1x28x32xf32> to vector<28x32xf32>
    %c4_180 = arith.constant 4 : index
    %c0_181 = arith.constant 0 : index
    %c0_182 = arith.constant 0 : index
    %160 = vector.load %arg2[%c4_180, %c0_181, %c0_182] : memref<5x32x168xf32, #tpu.memory_space<vmem>>, vector<1x32x168xf32>
    %161 = vector.shape_cast %160 : vector<1x32x168xf32> to vector<32x168xf32>
    %cst_183 = arith.constant dense<0.000000e+00> : vector<28x168xf32>
    %162 = tpu.matmul %159, %161, %cst_183 {dimension_numbers = #tpu.dot_dimension_numbers<[1], [0], [0], [1], [0, 0, 1, 1], [], []>} : vector<28x32xf32>, vector<32x168xf32>, vector<28x168xf32> -> vector<28x168xf32>
    %163 = arith.addf %157, %162 : vector<28x168xf32>
    %cst_184 = arith.constant 0.000000e+00 : f32
    %164 = vector.broadcast %cst_184 : f32 to vector<28x168xf32>
    %165 = arith.maximumf %163, %164 : vector<28x168xf32>
    %c0_185 = arith.constant 0 : index
    %c0_186 = arith.constant 0 : index
    %c0_187 = arith.constant 0 : index
    %166 = vector.load %arg4[%c0_185, %c0_186, %c0_187] : memref<2x14x28xf32, #tpu.memory_space<vmem>>, vector<1x14x28xf32>
    %167 = vector.shape_cast %166 : vector<1x14x28xf32> to vector<14x28xf32>
    %cst_188 = arith.constant dense<0.000000e+00> : vector<14x168xf32>
    %168 = tpu.matmul %167, %165, %cst_188 {dimension_numbers = #tpu.dot_dimension_numbers<[1], [0], [0], [1], [0, 0, 1, 1], [], []>} : vector<14x28xf32>, vector<28x168xf32>, vector<14x168xf32> -> vector<14x168xf32>
    %c1_189 = arith.constant 1 : index
    %c0_190 = arith.constant 0 : index
    %c0_191 = arith.constant 0 : index
    %169 = vector.load %arg4[%c1_189, %c0_190, %c0_191] : memref<2x14x28xf32, #tpu.memory_space<vmem>>, vector<1x14x28xf32>
    %170 = vector.shape_cast %169 : vector<1x14x28xf32> to vector<14x28xf32>
    %cst_192 = arith.constant dense<0.000000e+00> : vector<14x168xf32>
    %171 = tpu.matmul %170, %165, %cst_192 {dimension_numbers = #tpu.dot_dimension_numbers<[1], [0], [0], [1], [0, 0, 1, 1], [], []>} : vector<14x28xf32>, vector<28x168xf32>, vector<14x168xf32> -> vector<14x168xf32>
    %172 = arith.maximumf %168, %171 : vector<14x168xf32>
    %c0_193 = arith.constant 0 : index
    %c0_194 = arith.constant 0 : index
    %c0_195 = arith.constant 0 : index
    %173 = vector.load %arg5[%c0_193, %c0_194, %c0_195] : memref<2x168x84xf32, #tpu.memory_space<vmem>>, vector<1x168x84xf32>
    %174 = vector.shape_cast %173 : vector<1x168x84xf32> to vector<168x84xf32>
    %cst_196 = arith.constant dense<0.000000e+00> : vector<14x84xf32>
    %175 = tpu.matmul %172, %174, %cst_196 {dimension_numbers = #tpu.dot_dimension_numbers<[1], [0], [0], [1], [0, 0, 1, 1], [], []>} : vector<14x168xf32>, vector<168x84xf32>, vector<14x84xf32> -> vector<14x84xf32>
    %c1_197 = arith.constant 1 : index
    %c0_198 = arith.constant 0 : index
    %c0_199 = arith.constant 0 : index
    %176 = vector.load %arg5[%c1_197, %c0_198, %c0_199] : memref<2x168x84xf32, #tpu.memory_space<vmem>>, vector<1x168x84xf32>
    %177 = vector.shape_cast %176 : vector<1x168x84xf32> to vector<168x84xf32>
    %cst_200 = arith.constant dense<0.000000e+00> : vector<14x84xf32>
    %178 = tpu.matmul %172, %177, %cst_200 {dimension_numbers = #tpu.dot_dimension_numbers<[1], [0], [0], [1], [0, 0, 1, 1], [], []>} : vector<14x168xf32>, vector<168x84xf32>, vector<14x84xf32> -> vector<14x84xf32>
    %179 = arith.maximumf %175, %178 : vector<14x84xf32>
    %c0_201 = arith.constant 0 : index
    %c0_202 = arith.constant 0 : index
    %180 = vector.load %arg17[%c0_201, %c0_202] : memref<14x84xf32, #tpu.memory_space<vmem>>, vector<14x84xf32>
    tpu.vector_store %arg17[%c0_201, %c0_202], %179 {strides = array<i32>} : memref<14x84xf32, #tpu.memory_space<vmem>>, vector<14x84xf32>,
    %c0_203 = arith.constant 0 : index
    %c0_204 = arith.constant 0 : index
    %181 = vector.load %arg7[%c0_203, %c0_204] : memref<1x160xf32, #tpu.memory_space<vmem>>, vector<1x160xf32>
    %c0_205 = arith.constant 0 : index
    %c0_206 = arith.constant 0 : index
    %182 = vector.load %arg17[%c0_205, %c0_206] : memref<14x84xf32, #tpu.memory_space<vmem>>, vector<10x84xf32>
    %c0_207 = arith.constant 0 : index
    %c0_208 = arith.constant 0 : index
    %c0_209 = arith.constant 0 : index
    %183 = vector.load %arg6[%c0_207, %c0_208, %c0_209] : memref<5x84x160xf32, #tpu.memory_space<vmem>>, vector<1x84x160xf32>
    %184 = vector.shape_cast %183 : vector<1x84x160xf32> to vector<84x160xf32>
    %cst_210 = arith.constant dense<0.000000e+00> : vector<10x160xf32>
    %185 = tpu.matmul %182, %184, %cst_210 {dimension_numbers = #tpu.dot_dimension_numbers<[1], [0], [0], [1], [0, 0, 1, 1], [], []>} : vector<10x84xf32>, vector<84x160xf32>, vector<10x160xf32> -> vector<10x160xf32>
    %186 = vector.broadcast %181 : vector<1x160xf32> to vector<10x160xf32>
    %187 = arith.addf %186, %185 : vector<10x160xf32>
    %c1_211 = arith.constant 1 : index
    %c0_212 = arith.constant 0 : index
    %188 = vector.load %arg17[%c1_211, %c0_212] : memref<14x84xf32, #tpu.memory_space<vmem>>, vector<10x84xf32>
    %c1_213 = arith.constant 1 : index
    %c0_214 = arith.constant 0 : index
    %c0_215 = arith.constant 0 : index
    %189 = vector.load %arg6[%c1_213, %c0_214, %c0_215] : memref<5x84x160xf32, #tpu.memory_space<vmem>>, vector<1x84x160xf32>
    %190 = vector.shape_cast %189 : vector<1x84x160xf32> to vector<84x160xf32>
    %cst_216 = arith.constant dense<0.000000e+00> : vector<10x160xf32>
    %191 = tpu.matmul %188, %190, %cst_216 {dimension_numbers = #tpu.dot_dimension_numbers<[1], [0], [0], [1], [0, 0, 1, 1], [], []>} : vector<10x84xf32>, vector<84x160xf32>, vector<10x160xf32> -> vector<10x160xf32>
    %192 = arith.addf %187, %191 : vector<10x160xf32>
    %c2_217 = arith.constant 2 : index
    %c0_218 = arith.constant 0 : index
    %193 = vector.load %arg17[%c2_217, %c0_218] : memref<14x84xf32, #tpu.memory_space<vmem>>, vector<10x84xf32>
    %c2_219 = arith.constant 2 : index
    %c0_220 = arith.constant 0 : index
    %c0_221 = arith.constant 0 : index
    %194 = vector.load %arg6[%c2_219, %c0_220, %c0_221] : memref<5x84x160xf32, #tpu.memory_space<vmem>>, vector<1x84x160xf32>
    %195 = vector.shape_cast %194 : vector<1x84x160xf32> to vector<84x160xf32>
    %cst_222 = arith.constant dense<0.000000e+00> : vector<10x160xf32>
    %196 = tpu.matmul %193, %195, %cst_222 {dimension_numbers = #tpu.dot_dimension_numbers<[1], [0], [0], [1], [0, 0, 1, 1], [], []>} : vector<10x84xf32>, vector<84x160xf32>, vector<10x160xf32> -> vector<10x160xf32>
    %197 = arith.addf %192, %196 : vector<10x160xf32>
    %c3_223 = arith.constant 3 : index
    %c0_224 = arith.constant 0 : index
    %198 = vector.load %arg17[%c3_223, %c0_224] : memref<14x84xf32, #tpu.memory_space<vmem>>, vector<10x84xf32>
    %c3_225 = arith.constant 3 : index
    %c0_226 = arith.constant 0 : index
    %c0_227 = arith.constant 0 : index
    %199 = vector.load %arg6[%c3_225, %c0_226, %c0_227] : memref<5x84x160xf32, #tpu.memory_space<vmem>>, vector<1x84x160xf32>
    %200 = vector.shape_cast %199 : vector<1x84x160xf32> to vector<84x160xf32>
    %cst_228 = arith.constant dense<0.000000e+00> : vector<10x160xf32>
    %201 = tpu.matmul %198, %200, %cst_228 {dimension_numbers = #tpu.dot_dimension_numbers<[1], [0], [0], [1], [0, 0, 1, 1], [], []>} : vector<10x84xf32>, vector<84x160xf32>, vector<10x160xf32> -> vector<10x160xf32>
    %202 = arith.addf %197, %201 : vector<10x160xf32>
    %c4_229 = arith.constant 4 : index
    %c0_230 = arith.constant 0 : index
    %203 = vector.load %arg17[%c4_229, %c0_230] : memref<14x84xf32, #tpu.memory_space<vmem>>, vector<10x84xf32>
    %c4_231 = arith.constant 4 : index
    %c0_232 = arith.constant 0 : index
    %c0_233 = arith.constant 0 : index
    %204 = vector.load %arg6[%c4_231, %c0_232, %c0_233] : memref<5x84x160xf32, #tpu.memory_space<vmem>>, vector<1x84x160xf32>
    %205 = vector.shape_cast %204 : vector<1x84x160xf32> to vector<84x160xf32>
    %cst_234 = arith.constant dense<0.000000e+00> : vector<10x160xf32>
    %206 = tpu.matmul %203, %205, %cst_234 {dimension_numbers = #tpu.dot_dimension_numbers<[1], [0], [0], [1], [0, 0, 1, 1], [], []>} : vector<10x84xf32>, vector<84x160xf32>, vector<10x160xf32> -> vector<10x160xf32>
    %207 = arith.addf %202, %206 : vector<10x160xf32>
    %cst_235 = arith.constant 0.000000e+00 : f32
    %208 = vector.broadcast %cst_235 : f32 to vector<10x160xf32>
    %209 = arith.maximumf %207, %208 : vector<10x160xf32>
    %c0_236 = arith.constant 0 : index
    %c0_237 = arith.constant 0 : index
    %c0_238 = arith.constant 0 : index
    %210 = vector.load %arg8[%c0_236, %c0_237, %c0_238] : memref<2x5x10xf32, #tpu.memory_space<vmem>>, vector<1x5x10xf32>
    %211 = vector.shape_cast %210 : vector<1x5x10xf32> to vector<5x10xf32>
    %cst_239 = arith.constant dense<0.000000e+00> : vector<5x160xf32>
    %212 = tpu.matmul %211, %209, %cst_239 {dimension_numbers = #tpu.dot_dimension_numbers<[1], [0], [0], [1], [0, 0, 1, 1], [], []>} : vector<5x10xf32>, vector<10x160xf32>, vector<5x160xf32> -> vector<5x160xf32>
    %c1_240 = arith.constant 1 : index
    %c0_241 = arith.constant 0 : index
    %c0_242 = arith.constant 0 : index
    %213 = vector.load %arg8[%c1_240, %c0_241, %c0_242] : memref<2x5x10xf32, #tpu.memory_space<vmem>>, vector<1x5x10xf32>
    %214 = vector.shape_cast %213 : vector<1x5x10xf32> to vector<5x10xf32>
    %cst_243 = arith.constant dense<0.000000e+00> : vector<5x160xf32>
    %215 = tpu.matmul %214, %209, %cst_243 {dimension_numbers = #tpu.dot_dimension_numbers<[1], [0], [0], [1], [0, 0, 1, 1], [], []>} : vector<5x10xf32>, vector<10x160xf32>, vector<5x160xf32> -> vector<5x160xf32>
    %216 = arith.maximumf %212, %215 : vector<5x160xf32>
    %c0_244 = arith.constant 0 : index
    %c0_245 = arith.constant 0 : index
    %c0_246 = arith.constant 0 : index
    %217 = vector.load %arg9[%c0_244, %c0_245, %c0_246] : memref<2x160x80xf32, #tpu.memory_space<vmem>>, vector<1x160x80xf32>
    %218 = vector.shape_cast %217 : vector<1x160x80xf32> to vector<160x80xf32>
    %cst_247 = arith.constant dense<0.000000e+00> : vector<5x80xf32>
    %219 = tpu.matmul %216, %218, %cst_247 {dimension_numbers = #tpu.dot_dimension_numbers<[1], [0], [0], [1], [0, 0, 1, 1], [], []>} : vector<5x160xf32>, vector<160x80xf32>, vector<5x80xf32> -> vector<5x80xf32>
    %c1_248 = arith.constant 1 : index
    %c0_249 = arith.constant 0 : index
    %c0_250 = arith.constant 0 : index
    %220 = vector.load %arg9[%c1_248, %c0_249, %c0_250] : memref<2x160x80xf32, #tpu.memory_space<vmem>>, vector<1x160x80xf32>
    %221 = vector.shape_cast %220 : vector<1x160x80xf32> to vector<160x80xf32>
    %cst_251 = arith.constant dense<0.000000e+00> : vector<5x80xf32>
    %222 = tpu.matmul %216, %221, %cst_251 {dimension_numbers = #tpu.dot_dimension_numbers<[1], [0], [0], [1], [0, 0, 1, 1], [], []>} : vector<5x160xf32>, vector<160x80xf32>, vector<5x80xf32> -> vector<5x80xf32>
    %223 = arith.maximumf %219, %222 : vector<5x80xf32>
    %c0_252 = arith.constant 0 : index
    %c0_253 = arith.constant 0 : index
    %224 = vector.load %arg18[%c0_252, %c0_253] : memref<5x80xf32, #tpu.memory_space<vmem>>, vector<5x80xf32>
    tpu.vector_store %arg18[%c0_252, %c0_253], %223 {strides = array<i32>} : memref<5x80xf32, #tpu.memory_space<vmem>>, vector<5x80xf32>,
    %c0_254 = arith.constant 0 : index
    %c0_255 = arith.constant 0 : index
    %225 = vector.load %arg11[%c0_254, %c0_255] : memref<1x120xf32, #tpu.memory_space<vmem>>, vector<1x120xf32>
    %c0_256 = arith.constant 0 : index
    %c0_257 = arith.constant 0 : index
    %226 = vector.load %arg18[%c0_256, %c0_257] : memref<5x80xf32, #tpu.memory_space<vmem>>, vector<1x80xf32>
    %c0_258 = arith.constant 0 : index
    %c0_259 = arith.constant 0 : index
    %c0_260 = arith.constant 0 : index
    %227 = vector.load %arg10[%c0_258, %c0_259, %c0_260] : memref<5x80x120xf32, #tpu.memory_space<vmem>>, vector<1x80x120xf32>
    %228 = vector.shape_cast %227 : vector<1x80x120xf32> to vector<80x120xf32>
    %cst_261 = arith.constant dense<0.000000e+00> : vector<1x120xf32>
    %229 = tpu.matmul %226, %228, %cst_261 {dimension_numbers = #tpu.dot_dimension_numbers<[1], [0], [0], [1], [0, 0, 1, 1], [], []>} : vector<1x80xf32>, vector<80x120xf32>, vector<1x120xf32> -> vector<1x120xf32>
    %230 = arith.addf %225, %229 : vector<1x120xf32>
    %c1_262 = arith.constant 1 : index
    %c0_263 = arith.constant 0 : index
    %231 = vector.load %arg18[%c1_262, %c0_263] : memref<5x80xf32, #tpu.memory_space<vmem>>, vector<1x80xf32>
    %c1_264 = arith.constant 1 : index
    %c0_265 = arith.constant 0 : index
    %c0_266 = arith.constant 0 : index
    %232 = vector.load %arg10[%c1_264, %c0_265, %c0_266] : memref<5x80x120xf32, #tpu.memory_space<vmem>>, vector<1x80x120xf32>
    %233 = vector.shape_cast %232 : vector<1x80x120xf32> to vector<80x120xf32>
    %cst_267 = arith.constant dense<0.000000e+00> : vector<1x120xf32>
    %234 = tpu.matmul %231, %233, %cst_267 {dimension_numbers = #tpu.dot_dimension_numbers<[1], [0], [0], [1], [0, 0, 1, 1], [], []>} : vector<1x80xf32>, vector<80x120xf32>, vector<1x120xf32> -> vector<1x120xf32>
    %235 = arith.addf %230, %234 : vector<1x120xf32>
    %c2_268 = arith.constant 2 : index
    %c0_269 = arith.constant 0 : index
    %236 = vector.load %arg18[%c2_268, %c0_269] : memref<5x80xf32, #tpu.memory_space<vmem>>, vector<1x80xf32>
    %c2_270 = arith.constant 2 : index
    %c0_271 = arith.constant 0 : index
    %c0_272 = arith.constant 0 : index
    %237 = vector.load %arg10[%c2_270, %c0_271, %c0_272] : memref<5x80x120xf32, #tpu.memory_space<vmem>>, vector<1x80x120xf32>
    %238 = vector.shape_cast %237 : vector<1x80x120xf32> to vector<80x120xf32>
    %cst_273 = arith.constant dense<0.000000e+00> : vector<1x120xf32>
    %239 = tpu.matmul %236, %238, %cst_273 {dimension_numbers = #tpu.dot_dimension_numbers<[1], [0], [0], [1], [0, 0, 1, 1], [], []>} : vector<1x80xf32>, vector<80x120xf32>, vector<1x120xf32> -> vector<1x120xf32>
    %240 = arith.addf %235, %239 : vector<1x120xf32>
    %c3_274 = arith.constant 3 : index
    %c0_275 = arith.constant 0 : index
    %241 = vector.load %arg18[%c3_274, %c0_275] : memref<5x80xf32, #tpu.memory_space<vmem>>, vector<1x80xf32>
    %c3_276 = arith.constant 3 : index
    %c0_277 = arith.constant 0 : index
    %c0_278 = arith.constant 0 : index
    %242 = vector.load %arg10[%c3_276, %c0_277, %c0_278] : memref<5x80x120xf32, #tpu.memory_space<vmem>>, vector<1x80x120xf32>
    %243 = vector.shape_cast %242 : vector<1x80x120xf32> to vector<80x120xf32>
    %cst_279 = arith.constant dense<0.000000e+00> : vector<1x120xf32>
    %244 = tpu.matmul %241, %243, %cst_279 {dimension_numbers = #tpu.dot_dimension_numbers<[1], [0], [0], [1], [0, 0, 1, 1], [], []>} : vector<1x80xf32>, vector<80x120xf32>, vector<1x120xf32> -> vector<1x120xf32>
    %245 = arith.addf %240, %244 : vector<1x120xf32>
    %c4_280 = arith.constant 4 : index
    %c0_281 = arith.constant 0 : index
    %246 = vector.load %arg18[%c4_280, %c0_281] : memref<5x80xf32, #tpu.memory_space<vmem>>, vector<1x80xf32>
    %c4_282 = arith.constant 4 : index
    %c0_283 = arith.constant 0 : index
    %c0_284 = arith.constant 0 : index
    %247 = vector.load %arg10[%c4_282, %c0_283, %c0_284] : memref<5x80x120xf32, #tpu.memory_space<vmem>>, vector<1x80x120xf32>
    %248 = vector.shape_cast %247 : vector<1x80x120xf32> to vector<80x120xf32>
    %cst_285 = arith.constant dense<0.000000e+00> : vector<1x120xf32>
    %249 = tpu.matmul %246, %248, %cst_285 {dimension_numbers = #tpu.dot_dimension_numbers<[1], [0], [0], [1], [0, 0, 1, 1], [], []>} : vector<1x80xf32>, vector<80x120xf32>, vector<1x120xf32> -> vector<1x120xf32>
    %250 = arith.addf %245, %249 : vector<1x120xf32>
    %cst_286 = arith.constant 0.000000e+00 : f32
    %251 = vector.broadcast %cst_286 : f32 to vector<1x120xf32>
    %252 = arith.maximumf %250, %251 : vector<1x120xf32>
    %c0_287 = arith.constant 0 : index
    %c0_288 = arith.constant 0 : index
    %253 = vector.load %arg12[%c0_287, %c0_288] : memref<120x84xf32, #tpu.memory_space<vmem>>, vector<120x84xf32>
    %cst_289 = arith.constant dense<0.000000e+00> : vector<1x84xf32>
    %254 = tpu.matmul %252, %253, %cst_289 {dimension_numbers = #tpu.dot_dimension_numbers<[1], [0], [0], [1], [0, 0, 1, 1], [], []>} : vector<1x120xf32>, vector<120x84xf32>, vector<1x84xf32> -> vector<1x84xf32>
    %c0_290 = arith.constant 0 : index
    %c0_291 = arith.constant 0 : index
    %255 = vector.load %arg13[%c0_290, %c0_291] : memref<1x84xf32, #tpu.memory_space<vmem>>, vector<1x84xf32>
    %256 = arith.addf %254, %255 : vector<1x84xf32>
    %cst_292 = arith.constant 0.000000e+00 : f32
    %257 = vector.broadcast %cst_292 : f32 to vector<1x84xf32>
    %258 = arith.maximumf %256, %257 : vector<1x84xf32>
    %c0_293 = arith.constant 0 : index
    %c0_294 = arith.constant 0 : index
    %259 = vector.load %arg14[%c0_293, %c0_294] : memref<84x10xf32, #tpu.memory_space<vmem>>, vector<84x10xf32>
    %cst_295 = arith.constant dense<0.000000e+00> : vector<1x10xf32>
    %260 = tpu.matmul %258, %259, %cst_295 {dimension_numbers = #tpu.dot_dimension_numbers<[1], [0], [0], [1], [0, 0, 1, 1], [], []>} : vector<1x84xf32>, vector<84x10xf32>, vector<1x10xf32> -> vector<1x10xf32>
    %c0_296 = arith.constant 0 : index
    %c0_297 = arith.constant 0 : index
    %261 = vector.load %arg15[%c0_296, %c0_297] : memref<1x10xf32, #tpu.memory_space<vmem>>, vector<1x10xf32>
    %262 = arith.addf %260, %261 : vector<1x10xf32>
    %c1_298 = arith.constant 1 : index
    %c0_299 = arith.constant 0 : index
    %263 = vector.load %arg16[%c1_298, %c0_299] : memref<2x10xf32, #tpu.memory_space<vmem>>, vector<1x10xf32>
    tpu.vector_store %arg16[%c1_298, %c0_299], %262 {strides = array<i32>} : memref<2x10xf32, #tpu.memory_space<vmem>>, vector<1x10xf32>,
    return
  }
  func.func @transform_0(%arg0: i32) -> (i32, i32, i32) {
    %c0_i32 = arith.constant 0 : i32
    %c0_i32_0 = arith.constant 0 : i32
    %c0_i32_1 = arith.constant 0 : i32
    %c0_i32_2 = arith.constant 0 : i32
    return %c0_i32, %c0_i32_0, %c0_i32_1 : i32, i32, i32
  }
  func.func @transform_1(%arg0: i32) -> (i32, i32, i32) {
    %c0_i32 = arith.constant 0 : i32
    %c0_i32_0 = arith.constant 0 : i32
    %c0_i32_1 = arith.constant 0 : i32
    %c0_i32_2 = arith.constant 0 : i32
    return %c0_i32, %c0_i32_0, %c0_i32_1 : i32, i32, i32
  }
  func.func @transform_2(%arg0: i32) -> (i32, i32) {
    %c0_i32 = arith.constant 0 : i32
    %c0_i32_0 = arith.constant 0 : i32
    %c0_i32_1 = arith.constant 0 : i32
    return %c0_i32, %c0_i32_0 : i32, i32
  }
  func.func @transform_3(%arg0: i32) -> (i32, i32, i32) {
    %c0_i32 = arith.constant 0 : i32
    %c0_i32_0 = arith.constant 0 : i32
    %c0_i32_1 = arith.constant 0 : i32
    %c0_i32_2 = arith.constant 0 : i32
    return %c0_i32, %c0_i32_0, %c0_i32_1 : i32, i32, i32
  }
  func.func @transform_4(%arg0: i32) -> (i32, i32, i32) {
    %c0_i32 = arith.constant 0 : i32
    %c0_i32_0 = arith.constant 0 : i32
    %c0_i32_1 = arith.constant 0 : i32
    %c0_i32_2 = arith.constant 0 : i32
    return %c0_i32, %c0_i32_0, %c0_i32_1 : i32, i32, i32
  }
  func.func @transform_5(%arg0: i32) -> (i32, i32, i32) {
    %c0_i32 = arith.constant 0 : i32
    %c0_i32_0 = arith.constant 0 : i32
    %c0_i32_1 = arith.constant 0 : i32
    %c0_i32_2 = arith.constant 0 : i32
    return %c0_i32, %c0_i32_0, %c0_i32_1 : i32, i32, i32
  }
  func.func @transform_6(%arg0: i32) -> (i32, i32) {
    %c0_i32 = arith.constant 0 : i32
    %c0_i32_0 = arith.constant 0 : i32
    %c0_i32_1 = arith.constant 0 : i32
    return %c0_i32, %c0_i32_0 : i32, i32
  }
  func.func @transform_7(%arg0: i32) -> (i32, i32, i32) {
    %c0_i32 = arith.constant 0 : i32
    %c0_i32_0 = arith.constant 0 : i32
    %c0_i32_1 = arith.constant 0 : i32
    %c0_i32_2 = arith.constant 0 : i32
    return %c0_i32, %c0_i32_0, %c0_i32_1 : i32, i32, i32
  }
  func.func @transform_8(%arg0: i32) -> (i32, i32, i32) {
    %c0_i32 = arith.constant 0 : i32
    %c0_i32_0 = arith.constant 0 : i32
    %c0_i32_1 = arith.constant 0 : i32
    %c0_i32_2 = arith.constant 0 : i32
    return %c0_i32, %c0_i32_0, %c0_i32_1 : i32, i32, i32
  }
  func.func @transform_9(%arg0: i32) -> (i32, i32, i32) {
    %c0_i32 = arith.constant 0 : i32
    %c0_i32_0 = arith.constant 0 : i32
    %c0_i32_1 = arith.constant 0 : i32
    %c0_i32_2 = arith.constant 0 : i32
    return %c0_i32, %c0_i32_0, %c0_i32_1 : i32, i32, i32
  }
  func.func @transform_10(%arg0: i32) -> (i32, i32) {
    %c0_i32 = arith.constant 0 : i32
    %c0_i32_0 = arith.constant 0 : i32
    %c0_i32_1 = arith.constant 0 : i32
    return %c0_i32, %c0_i32_0 : i32, i32
  }
  func.func @transform_11(%arg0: i32) -> (i32, i32) {
    %c0_i32 = arith.constant 0 : i32
    %c0_i32_0 = arith.constant 0 : i32
    %c0_i32_1 = arith.constant 0 : i32
    return %c0_i32, %c0_i32_0 : i32, i32
  }
  func.func @transform_12(%arg0: i32) -> (i32, i32) {
    %c0_i32 = arith.constant 0 : i32
    %c0_i32_0 = arith.constant 0 : i32
    %c0_i32_1 = arith.constant 0 : i32
    return %c0_i32, %c0_i32_0 : i32, i32
  }
  func.func @transform_13(%arg0: i32) -> (i32, i32) {
    %c0_i32 = arith.constant 0 : i32
    %c0_i32_0 = arith.constant 0 : i32
    %c0_i32_1 = arith.constant 0 : i32
    return %c0_i32, %c0_i32_0 : i32, i32
  }
  func.func @transform_14(%arg0: i32) -> (i32, i32) {
    %c0_i32 = arith.constant 0 : i32
    %c0_i32_0 = arith.constant 0 : i32
    %c0_i32_1 = arith.constant 0 : i32
    return %c0_i32, %c0_i32_0 : i32, i32
  }
  func.func @transform_15(%arg0: i32) -> (i32, i32) {
    %c0_i32 = arith.constant 0 : i32
    %c0_i32_0 = arith.constant 0 : i32
    %c0_i32_1 = arith.constant 0 : i32
    return %c0_i32, %c0_i32_0 : i32, i32
  }
}

</mosaic_0001>

<bundles_post_ra>
// kernel: net_forward.1
= control target key start
LH: loop header
LB: loop body
LE: loop exit
PB: predicated region body
PF: predicated region fallthrough
CT: control target
= control target key end

     0   :  { %v6309_v6 = vmov 0.0   ;;  %vm64_vm0 = vcmask 261120   ;;  %s9016_s0 = inlined_call_operand.vmem [shape: f32[2,32,32], index: 0, kind: input, shape index: {}]   ;;  %s9017_s1 = inlined_call_operand.vmem [shape: f32[5,32,168], index: 1, kind: input, shape index: {}]   ;;  %s9018_s2 = inlined_call_operand.vmem [shape: f32[1,168], index: 2, kind: input, shape index: {}]   ;;  %s9019_s3 = inlined_call_operand.vmem [shape: f32[2,14,28], index: 3, kind: input, shape index: {}]   ;;  %s9020_s4 = inlined_call_operand.vmem [shape: f32[2,168,84], index: 4, kind: input, shape index: {}]   ;;  %s9021_s5 = inlined_call_operand.vmem [shape: f32[5,84,160], index: 5, kind: input, shape index: {}]   ;;  %s9022_s6 = inlined_call_operand.vmem [shape: f32[1,160], index: 6, kind: input, shape index: {}]   ;;  %s9023_s7 = inlined_call_operand.vmem [shape: f32[2,5,10], index: 7, kind: input, shape index: {}]   ;;  %s9024_s8 = inlined_call_operand.vmem [shape: f32[2,160,80], index: 8, kind: input, shape index: {}]   ;;  %s9025_s9 = inlined_call_operand.vmem [shape: f32[5,80,120], index: 9, kind: input, shape index: {}]   ;;  %s9026_s10 = inlined_call_operand.vmem [shape: f32[1,120], index: 10, kind: input, shape index: {}]   ;;  %s9027_s11 = inlined_call_operand.vmem [shape: f32[120,84], index: 11, kind: input, shape index: {}]   ;;  %s9028_s12 = inlined_call_operand.vmem [shape: f32[1,84], index: 12, kind: input, shape index: {}]   ;;  %s9029_s13 = inlined_call_operand.vmem [shape: f32[84,10], index: 13, kind: input, shape index: {}]   ;;  %s9030_s14 = inlined_call_operand.vmem [shape: f32[1,10], index: 14, kind: input, shape index: {}]   ;;  %s9031_s15 = inlined_call_operand.hbm [shape: f32[2,10], index: 15, kind: output, shape index: {}]  }
   0x1   :  { %v63_v0 = vld [vmem:[%s9017_s1 + $0x38] sm:$0xff]  ;;  %v62_v1 = vld [vmem:[%s9017_s1 + $0x30] sm:$0xff]  ;;  %v61_v2 = vld [vmem:[%s9017_s1 + $0x28] sm:$0xff]  ;;  %141 = vmatprep.mubr.f32.mxu0 %v6309_v6  ;;  %274 = vmatprep.mubr.f32.mxu1 %v6309_v6 }
   0x2   :  { %101 = vmatprep.subr.mxu0 %v63_v0  ;;  %v5219_v3 = vld [vmem:[%s9017_s1 + $0x78] sm:$0xff]  ;;  %v60_v4 = vld [vmem:[%s9017_s1 + $0x20] sm:$0xff]  ;;  %v5218_v5 = vld [vmem:[%s9017_s1 + $0x70] sm:$0xff] }
   0x3   :  { %102 = vmatpush1.msra.mxu0 %v62_v1  ;;  %234 = vmatprep.subr.mxu1 %v5219_v3  ;;  %v59_v7 = vld [vmem:[%s9017_s1 + $0x18] sm:$0xff]  ;;  %v5217_v8 = vld [vmem:[%s9017_s1 + $0x68] sm:$0xff]  ;;  %v58_v9 = vld [vmem:[%s9017_s1 + $0x10] sm:$0xff] }
   0x4   :  { %103 = vmatprep.subr.mxu0 %v61_v2  ;;  %235 = vmatpush1.msra.mxu1 %v5218_v5  ;;  %v5216_v10 = vld [vmem:[%s9017_s1 + $0x60] sm:$0xff]  ;;  %v5215_v11 = vld [vmem:[%s9017_s1 + $0x58] sm:$0xff]  ;;  %v57_v12 = vld [vmem:[%s9017_s1 + $0x8] sm:$0xff] }
   0x5   :  { %104 = vmatpush1.msra.mxu0 %v60_v4  ;;  %236 = vmatprep.subr.mxu1 %v5217_v8  ;;  %v5214_v13 = vld [vmem:[%s9017_s1 + $0x50] sm:$0xff]  ;;  %v56_v14 = vld [vmem:[%s9017_s1] sm:$0xff]  ;;  %v5213_v15 = vld [vmem:[%s9017_s1 + $0x48] sm:$0xff] }
   0x6   :  { %105 = vmatprep.subr.mxu0 %v59_v7  ;;  %237 = vmatpush1.msra.mxu1 %v5216_v10  ;;  %v52_v16 = vld [vmem:[%s9016_s0] sm:$0xff]  ;;  %v5231_v19 = vld [vmem:[%s9017_s1 + $0xb8] sm:$0xff]  ;;  %v5230_v20 = vld [vmem:[%s9017_s1 + $0xb0] sm:$0xff] }
   0x7   :  { %106 = vmatpush1.msra.mxu0 %v58_v9  ;;  %238 = vmatprep.subr.mxu1 %v5215_v11  ;;  %v5212_v17 = vld [vmem:[%s9017_s1 + $0x40] sm:$0xff]  ;;  %v53_v21 = vld [vmem:[%s9016_s0 + $0x8] sm:$0xff]  ;;  %v5243_v23 = vld [vmem:[%s9017_s1 + $0xf8] sm:$0xff] }
   0x8   :  { %107 = vmatprep.subr.mxu0 %v57_v12  ;;  %239 = vmatpush1.msra.mxu1 %v5214_v13  ;;  %v185_v18 = vld [vmem:[%s9016_s0 + $0x1] sm:$0xff]  ;;  %v186_v24 = vld [vmem:[%s9016_s0 + $0x9] sm:$0xff]  ;;  %v5227_v28 = vld [vmem:[%s9017_s1 + $0x98] sm:$0xff] }
   0x9   :  { %108 = vmatpush1.msra.mxu0 %v56_v14  ;;  %240 = vmatprep.subr.mxu1 %v5213_v15  ;;  %v5229_v22 = vld [vmem:[%s9017_s1 + $0xa8] sm:$0xff]  ;;  %v5228_v25 = vld [vmem:[%s9017_s1 + $0xa0] sm:$0xff]  ;;  %v5242_v26 = vld [vmem:[%s9017_s1 + $0xf0] sm:$0xff] }
   0xa   :  { %5208 = vmatmul.mubr.msk.f32.vlgmr.msra.gmra.mxu0 %vm64_vm0, %v52_v16  ;;  %241 = vmatpush1.msra.mxu1 %v5212_v17  ;;  %v54_v27 = vld [vmem:[%s9016_s0 + $0x10] sm:$0xff]  ;;  %v5241_v29 = vld [vmem:[%s9017_s1 + $0xe8] sm:$0xff]  ;;  %v5240_v32 = vld [vmem:[%s9017_s1 + $0xe0] sm:$0xff] }
   0xb   :  { %147 = vmatprep.mubr.f32.mxu0 %v6309_v6  ;;  %5220 = vmatmul.mubr.msk.f32.vlgmr.msra.gmra.mxu1 %vm64_vm0, %v185_v18  ;;  %v187_v30 = vld [vmem:[%s9016_s0 + $0x11] sm:$0xff]  ;;  %v5225_v34 = vld [vmem:[%s9017_s1 + $0x88] sm:$0xff]  ;;  %v5224_v36 = vld [vmem:[%s9017_s1 + $0x80] sm:$0xff] }
   0xc   :  { %356 = vmatprep.subr.mxu0 %v5231_v19  ;;  %280 = vmatprep.mubr.f32.mxu1 %v6309_v6  ;;  %v5226_v31 = vld [vmem:[%s9017_s1 + $0x90] sm:$0xff]  ;;  %v55_v33 = vld [vmem:[%s9016_s0 + $0x18] sm:$0xf] }
   0xd   :  { %357 = vmatpush1.msra.mxu0 %v5230_v20  ;;  %478 = vmatprep.subr.mxu1 %v5243_v23  ;;  %v5239_v35 = vld [vmem:[%s9017_s1 + $0xd8] sm:$0xff] }
   0xe   :  { %5209 = vmatmul.mubr.msk.f32.gmra.mxu0 %vm64_vm0, %v53_v21  ;;  %358 = vmatprep.subr.mxu0 %v5229_v22  ;;  %v188_v37 = vld [vmem:[%s9016_s0 + $0x19] sm:$0xf] }
   0xf   :  { %153 = vmatprep.mubr.f32.mxu0 %v6309_v6  ;;  %5221 = vmatmul.mubr.msk.f32.gmra.mxu1 %vm64_vm0, %v186_v24 }
  0x10   :  { %359 = vmatpush1.msra.mxu0 %v5228_v25  ;;  %286 = vmatprep.mubr.f32.mxu1 %v6309_v6 }
  0x11   :  { %479 = vmatpush1.msra.mxu1 %v5242_v26  ;;  %360 = vmatprep.subr.mxu0 %v5227_v28 }
  0x12   :  { %5210 = vmatmul.mubr.msk.f32.gmra.mxu0 %vm64_vm0, %v54_v27  ;;  %480 = vmatprep.subr.mxu1 %v5241_v29 }
  0x13   :  { %159 = vmatprep.mubr.f32.mxu0 %v6309_v6  ;;  %5222 = vmatmul.mubr.msk.f32.gmra.mxu1 %vm64_vm0, %v187_v30 }
  0x14   :  { %361 = vmatpush1.msra.mxu0 %v5226_v31  ;;  %292 = vmatprep.mubr.f32.mxu1 %v6309_v6 }
  0x15   :  { %481 = vmatpush1.msra.mxu1 %v5240_v32 }
  0x16   :  { %20 = vsyncpa [#allocation5], 0  ;;  %5211 = vmatmul.mubr.msk.f32.gmra.mxu0 %vm64_vm0, %v55_v33  ;;  %362 = vmatprep.subr.mxu0 %v5225_v34  ;;  %v5238_v38 = vld [vmem:[%s9017_s1 + $0xd0] sm:$0xff]  ;;  %v307_v39 = vld [vmem:[%s9016_s0 + $0x2] sm:$0xff]  ;;  %v167_v31 = vlaneseq  ;;  %vm690_vm1 = vcmask 1043456   ;;  %vm683_vm2 = vcmask 228352  }
  0x17   :  { %482 = vmatprep.subr.mxu1 %v5239_v35  ;;  %363 = vmatpush1.msra.mxu0 %v5224_v36  ;;  %v5237_v40 = vld [vmem:[%s9017_s1 + $0xc8] sm:$0xff]  ;;  %v5236_v41 = vld [vmem:[%s9017_s1 + $0xc0] sm:$0xff]  ;;  %v5255_v43 = vld [vmem:[%s9017_s1 + $0x138] sm:$0xff]  ;;  %vm885_vm3 = vcmask 326656   ;;  %vm1066_vm4 = vcmask 687104   ;;  %vm1068_vm5 = vcmask 685056  }
  0x18   :  { %5223 = vmatmul.mubr.msk.f32.gmra.mxu1 %vm64_vm0, %v188_v37  ;;  %396 = vmatprep.mubr.f32.mxu0 %v6309_v6  ;;  %v429_v42 = vld [vmem:[%s9016_s0 + $0x3] sm:$0xff]  ;;  %v5254_v44 = vld [vmem:[%s9017_s1 + $0x130] sm:$0xff]  ;;  %v5251_v49 = vld [vmem:[%s9017_s1 + $0x118] sm:$0xff]  ;;  %v168_v36 = vshrl.u32 %v167_v31, 7  ;;  %vm1680_vm6 = vcmask 1041408   ;;  %vm1676_vm7 = vcmask 80896  }
  0x19   :  { %483 = vmatpush1.msra.mxu1 %v5238_v38  ;;  %518 = vmatprep.mubr.f32.mxu1 %v6309_v6  ;;  %v308_v45 = vld [vmem:[%s9016_s0 + $0xa] sm:$0xff]  ;;  %v5252_v47 = vld [vmem:[%s9017_s1 + $0x120] sm:$0xff]  ;;  %v309_v51 = vld [vmem:[%s9016_s0 + $0x12] sm:$0xff]  ;;  %vm6310_vm8 = vmmov 0   ;;  %vm2021_vm9 = vcmask 651264   ;;  %vm2035_vm10 = vcmask 654336  }
  0x1a   :  { %5232 = vmatmul.mubr.msk.f32.vlgmr.msra.gmra.mxu0 %vm64_vm0, %v307_v39  ;;  %484 = vmatprep.subr.mxu1 %v5237_v40  ;;  %v5253_v46 = vld [vmem:[%s9017_s1 + $0x128] sm:$0xff]  ;;  %v5250_v50 = vld [vmem:[%s9017_s1 + $0x110] sm:$0xff]  ;;  %v5248_v53 = vld [vmem:[%s9017_s1 + $0x100] sm:$0xff]  ;;  %v6674_v40 = vsub.s32 0, %v168_v36  ;;  %vm2471_vm11 = vcmask 982016   ;;  %vm2634_vm12 = vcmask 73728  }
  0x1b   :  { %485 = vmatpush1.msra.mxu1 %v5236_v41  ;;  %402 = vmatprep.mubr.f32.mxu0 %v6309_v6  ;;  %v430_v48 = vld [vmem:[%s9016_s0 + $0xb] sm:$0xff]  ;;  %v431_v54 = vld [vmem:[%s9016_s0 + $0x13] sm:$0xff]  ;;  %v432_v56 = vld [vmem:[%s9016_s0 + $0x1b] sm:$0xf] }
  0x1c   :  { %5244 = vmatmul.mubr.msk.f32.vlgmr.msra.gmra.mxu1 %vm64_vm0, %v429_v42  ;;  %600 = vmatprep.subr.mxu0 %v5255_v43  ;;  %v5249_v52 = vld [vmem:[%s9017_s1 + $0x108] sm:$0xff]  ;;  %v310_v55 = vld [vmem:[%s9016_s0 + $0x1a] sm:$0xf]  ;;  %v878_v62 = vld [vmem:[%s9020_s4 + $0x70] sm:$0xff]  ;;  %v6679_v43 = vsub.s32 1, %v168_v36 }
  0x1d   :  { %524 = vmatprep.mubr.f32.mxu1 %v6309_v6  ;;  %601 = vmatpush1.msra.mxu0 %v5254_v44  ;;  %v551_v57 = vld [vmem:[%s9016_s0 + $0x4] sm:$0xff]  ;;  %v552_v58 = vld [vmem:[%s9016_s0 + $0xc] sm:$0xff]  ;;  %v553_v59 = vld [vmem:[%s9016_s0 + $0x14] sm:$0xff] }
  0x1e   :  { %5233 = vmatmul.mubr.msk.f32.gmra.mxu0 %vm64_vm0, %v308_v45  ;;  %602 = vmatprep.subr.mxu0 %v5253_v46  ;;  %v554_v60 = vld [vmem:[%s9016_s0 + $0x1c] sm:$0xf]  ;;  %v877_v63 = vld [vmem:[%s9020_s4 + $0x68] sm:$0xff]  ;;  %v876_v0 = vld [vmem:[%s9020_s4 + $0x60] sm:$0xff] }
  0x1f   :  { %408 = vmatprep.mubr.f32.mxu0 %v6309_v6  ;;  %603 = vmatpush1.msra.mxu0 %v5252_v47  ;;  %v879_v61 = vld [vmem:[%s9020_s4 + $0x78] sm:$0xff]  ;;  %v874_v2 = vld [vmem:[%s9020_s4 + $0x50] sm:$0xff]  ;;  %v873_v3 = vld [vmem:[%s9020_s4 + $0x48] sm:$0xff] }
  0x20   :  { %5245 = vmatmul.mubr.msk.f32.gmra.mxu1 %vm64_vm0, %v430_v48  ;;  %604 = vmatprep.subr.mxu0 %v5251_v49  ;;  %v875_v1 = vld [vmem:[%s9020_s4 + $0x58] sm:$0xff]  ;;  %v872_v4 = vld [vmem:[%s9020_s4 + $0x40] sm:$0xff]  ;;  %v870_v7 = vld [vmem:[%s9020_s4 + $0x30] sm:$0xff] }
  0x21   :  { %530 = vmatprep.mubr.f32.mxu1 %v6309_v6  ;;  %605 = vmatpush1.msra.mxu0 %v5250_v50  ;;  %v871_v5 = vld [vmem:[%s9020_s4 + $0x38] sm:$0xff]  ;;  %v869_v8 = vld [vmem:[%s9020_s4 + $0x28] sm:$0xff]  ;;  %v868_v9 = vld [vmem:[%s9020_s4 + $0x20] sm:$0xff] }
  0x22   :  { %5234 = vmatmul.mubr.msk.f32.gmra.mxu0 %vm64_vm0, %v309_v51  ;;  %606 = vmatprep.subr.mxu0 %v5249_v52  ;;  %v867_v10 = vld [vmem:[%s9020_s4 + $0x18] sm:$0xff]  ;;  %v866_v11 = vld [vmem:[%s9020_s4 + $0x10] sm:$0xff]  ;;  %v51_v42 = vld [vmem:[%s9018_s2] sm:$0x3] }
  0x23   :  { %414 = vmatprep.mubr.f32.mxu0 %v6309_v6  ;;  %607 = vmatpush1.msra.mxu0 %v5248_v53  ;;  %v170_v46 = vrot.slane %v51_v42, %v6674_v40  ;;  %v174_v48 = vrot.slane %v51_v42, %v6679_v43 }
  0x24   :  { %5246 = vmatmul.mubr.msk.f32.gmra.mxu1 %vm64_vm0, %v431_v54  ;;  %892 = vmatprep.subr.mxu0 %v6309_v6 }
  0x25   :  { %536 = vmatprep.mubr.f32.mxu1 %v6309_v6 }
  0x26   :  { %5235 = vmatmul.mubr.msk.f32.gmra.mxu0 %vm64_vm0, %v310_v55 }
  0x27   :  { %640 = vmatprep.mubr.f32.mxu0 %v6309_v6 }
  0x28   :  { %5247 = vmatmul.mubr.msk.f32.gmra.mxu1 %vm64_vm0, %v432_v56 }
  0x29   :  { %761 = vmatprep.mubr.f32.mxu1 %v6309_v6 }
  0x2a   :  { %5256 = vmatmul.mubr.msk.f32.vlgmr.msra.gmra.mxu0 %vm64_vm0, %v551_v57 }
  0x2b   :  { %646 = vmatprep.mubr.f32.mxu0 %v6309_v6  ;;  %893 = vmatpush1.msra.mxu0 %v879_v61 }
  0x2c   :  { %894 = vmatprep.subr.mxu0 %v6309_v6 }
  0x2d   :  { %895 = vmatpush1.msra.mxu0 %v878_v62 }
  0x2e   :  { %5257 = vmatmul.mubr.msk.f32.gmra.mxu0 %vm64_vm0, %v552_v58  ;;  %896 = vmatprep.subr.mxu0 %v6309_v6 }
  0x2f   :  { %652 = vmatprep.mubr.f32.mxu0 %v6309_v6  ;;  %897 = vmatpush1.msra.mxu0 %v877_v63 }
  0x30   :  { %898 = vmatprep.subr.mxu0 %v6309_v6 }
  0x31   :  { %899 = vmatpush1.msra.mxu0 %v876_v0 }
  0x32   :  { %5258 = vmatmul.mubr.msk.f32.gmra.mxu0 %vm64_vm0, %v553_v59  ;;  %900 = vmatprep.subr.mxu0 %v6309_v6 }
  0x33   :  { %658 = vmatprep.mubr.f32.mxu0 %v6309_v6  ;;  %901 = vmatpush1.msra.mxu0 %v875_v1 }
  0x34   :  { %902 = vmatprep.subr.mxu0 %v6309_v6 }
  0x35   :  { %903 = vmatpush1.msra.mxu0 %v874_v2 }
  0x36   :  { %5259 = vmatmul.mubr.msk.f32.gmra.mxu0 %vm64_vm0, %v554_v60  ;;  %904 = vmatprep.subr.mxu0 %v6309_v6 }
  0x37   :  { %905 = vmatpush1.msra.mxu0 %v873_v3 }
  0x38   :  { %906 = vmatprep.subr.mxu0 %v6309_v6 }
  0x39   :  { %907 = vmatpush1.msra.mxu0 %v872_v4 }
  0x3a   :  { %908 = vmatprep.subr.mxu0 %v6309_v6 }
  0x3b   :  { %909 = vmatpush1.msra.mxu0 %v871_v5 }
  0x3c   :  { %910 = vmatprep.subr.mxu0 %v6309_v6 }
  0x3d   :  { %911 = vmatpush1.msra.mxu0 %v870_v7 }
  0x3e   :  { %912 = vmatprep.subr.mxu0 %v6309_v6 }
  0x3f   :  { %913 = vmatpush1.msra.mxu0 %v869_v8 }
  0x40   :  { %914 = vmatprep.subr.mxu0 %v6309_v6 }
  0x41   :  { %915 = vmatpush1.msra.mxu0 %v868_v9 }
  0x42   :  { %916 = vmatprep.subr.mxu0 %v6309_v6 }
  0x43   :  { %917 = vmatpush1.msra.mxu0 %v867_v10 }
  0x44   :  { %918 = vmatprep.subr.mxu0 %v6309_v6 }
  0x45   :  { %919 = vmatpush1.msra.mxu0 %v866_v11 }
  0x46   :  { %920 = vmatprep.subr.mxu0 %v6309_v6 }
  0xca   :  { %v143_v12 = vpop.f32.mrf.mxu0 }
  0xcb   :  { %v6670_v14 = vpop.f32.mrf.mxu1  ;;  %v177_v0 = vadd.f32 %v170_v46, %v143_v12 }
  0xcc   :  { %v145_v13 = vpop.f32.mrf.mxu0 }
  0xcd   :  { %v278_v16 = vpop.f32.mrf.mxu1  ;;  %v178_v61 = vadd.f32 %v174_v48, %v145_v13 }
  0xce   :  { %v149_v15 = vpop.f32.mrf.mxu0 }
  0xcf   :  { %v282_v18 = vpop.f32.mrf.mxu1  ;;  %v179_v57 = vadd.f32 %v170_v46, %v149_v15  ;;  %v299_v15 = vadd.f32 %v6670_v14, %v177_v0  ;;  %v865_v0 = vld [vmem:[%s9020_s4 + $0x8] sm:$0xff] }
  0xd0   :  { %v151_v17 = vpop.f32.mrf.mxu0  ;;  %921 = vmatpush1.msra.mxu0 %v865_v0  ;;  %v5305_v0 = vld [vmem:[%s9021_s5 + $0xe0] sm:$0xff] }
  0xd1   :  { %v284_v20 = vpop.f32.mrf.mxu1  ;;  %v180_v56 = vadd.f32 %v174_v48, %v151_v17  ;;  %v301_v8 = vadd.f32 %v282_v18, %v179_v57  ;;  %v5280_v57 = vld [vmem:[%s9020_s4 + $0xe8] sm:$0xff]  ;;  %922 = vmatprep.subr.mxu0 %v6309_v6 }
  0xd2   :  { %v155_v19 = vpop.f32.mrf.mxu0 }
  0xd3   :  { %v288_v22 = vpop.f32.mrf.mxu1  ;;  %v181_v54 = vadd.f32 %v170_v46, %v155_v19  ;;  %v302_v4 = vadd.f32 %v284_v20, %v180_v56  ;;  %v300_v19 = vadd.f32 %v278_v16, %v178_v61  ;;  %v5281_v56 = vld [vmem:[%s9020_s4 + $0xf0] sm:$0xff]  ;;  %v5276_v61 = vld [vmem:[%s9020_s4 + $0xc8] sm:$0xff] }
  0xd4   :  { %v157_v21 = vpop.f32.mrf.mxu0 }
  0xd5   :  { %v290_v24 = vpop.f32.mrf.mxu1  ;;  %v182_v52 = vadd.f32 %v174_v48, %v157_v21  ;;  %v303_v1 = vadd.f32 %v288_v22, %v181_v54  ;;  %v5283_v54 = vld [vmem:[%s9020_s4 + $0x100] sm:$0xff] }
  0xd6   :  { %v161_v23 = vpop.f32.mrf.mxu0 }
  0xd7   :  { %v183_v49 = vadd.f32 %v170_v46, %v161_v23  ;;  %v304_v62 = vadd.f32 %v290_v24, %v182_v52  ;;  %v5285_v52 = vld [vmem:[%s9020_s4 + $0x110] sm:$0xff] }
  0xd8   :  { %v163_v25 = vpop.f32.mrf.mxu0  ;;  %v294_v26 = vpop.f32.mrf.mxu1 }
  0xd9   :  { %v184_v53 = vadd.f32 %v174_v48, %v163_v25  ;;  %v305_v58 = vadd.f32 %v294_v26, %v183_v49  ;;  %v5264_v48 = vld [vmem:[%s9019_s3 + $0x10] sm:$0xff]  ;;  %v5287_v49 = vld [vmem:[%s9020_s4 + $0x120] sm:$0xff] }
  0xda   :  { %v296_v27 = vpop.f32.mrf.mxu1  ;;  %v398_v28 = vpop.f32.mrf.mxu0 }
  0xdb   :  { %v306_v63 = vadd.f32 %v296_v27, %v184_v53  ;;  %v421_v22 = vadd.f32 %v398_v28, %v299_v15  ;;  %v5284_v53 = vld [vmem:[%s9020_s4 + $0x108] sm:$0xff] }
  0xdc   :  { %v400_v29 = vpop.f32.mrf.mxu0  ;;  %v6672_v30 = vpop.f32.mrf.mxu1  ;;  %v5288_v15 = vld [vmem:[%s9020_s4 + $0x128] sm:$0xff] }
  0xdd   :  { %v422_v24 = vadd.f32 %v400_v29, %v300_v19  ;;  %v543_v14 = vadd.f32 %v6672_v30, %v421_v22  ;;  %v681_v30 = vld [vmem:[%s9019_s3] sm:$0xff]  ;;  %v5289_v19 = vld [vmem:[%s9020_s4 + $0x130] sm:$0xff] }
  0xde   :  { %v404_v32 = vpop.f32.mrf.mxu0  ;;  %v522_v33 = vpop.f32.mrf.mxu1 }
  0xdf   :  { %v423_v21 = vadd.f32 %v404_v32, %v301_v8  ;;  %v544_v16 = vadd.f32 %v522_v33, %v422_v24  ;;  %v5291_v8 = vld [vmem:[%s9020_s4 + $0x140] sm:$0xff] }
  0xe0   :  { %v406_v34 = vpop.f32.mrf.mxu0  ;;  %v526_v35 = vpop.f32.mrf.mxu1 }
  0xe1   :  { %v424_v17 = vadd.f32 %v406_v34, %v302_v4  ;;  %v884_v4 = vld [vmem:[%s9020_s4 + $0xa0] sm:$0xff] }
  0xe2   :  { %v410_v37 = vpop.f32.mrf.mxu0  ;;  %v528_v38 = vpop.f32.mrf.mxu1 }
  0xe3   :  { %v425_v9 = vadd.f32 %v410_v37, %v303_v1  ;;  %v546_v31 = vadd.f32 %v528_v38, %v424_v17  ;;  %v545_v37 = vadd.f32 %v526_v35, %v423_v21  ;;  %v5273_v1 = vld [vmem:[%s9020_s4 + $0xb0] sm:$0xff]  ;;  %v880_v17 = vld [vmem:[%s9020_s4 + $0x80] sm:$0xff]  ;;  %v1094_v21 = vld [vmem:[%s9021_s5 + $0xa8] sm:$0xf] }
  0xe4   :  { %v412_v39 = vpop.f32.mrf.mxu0  ;;  %v532_v44 = vpop.f32.mrf.mxu1 }
  0xe5   :  { %v426_v5 = vadd.f32 %v412_v39, %v304_v62  ;;  %v547_v26 = vadd.f32 %v532_v44, %v425_v9  ;;  %v5275_v62 = vld [vmem:[%s9020_s4 + $0xc0] sm:$0xff]  ;;  %v882_v9 = vld [vmem:[%s9020_s4 + $0x90] sm:$0xff] }
  0xe6   :  { %v416_v41 = vpop.f32.mrf.mxu0  ;;  %v534_v50 = vpop.f32.mrf.mxu1 }
  0xe7   :  { %v427_v2 = vadd.f32 %v416_v41, %v305_v58  ;;  %v548_v25 = vadd.f32 %v534_v50, %v426_v5  ;;  %v5286_v50 = vld [vmem:[%s9020_s4 + $0x118] sm:$0xff]  ;;  %v5279_v58 = vld [vmem:[%s9020_s4 + $0xe0] sm:$0xff]  ;;  %v5292_v5 = vld [vmem:[%s9020_s4 + $0x148] sm:$0xff] }
  0xe8   :  { %v418_v45 = vpop.f32.mrf.mxu0  ;;  %v538_v59 = vpop.f32.mrf.mxu1 }
  0xe9   :  { %v428_v7 = vadd.f32 %v418_v45, %v306_v63  ;;  %v549_v23 = vadd.f32 %v538_v59, %v427_v2  ;;  %v5278_v59 = vld [vmem:[%s9020_s4 + $0xd8] sm:$0xff]  ;;  %v864_v2 = vld [vmem:[%s9020_s4] sm:$0xff] }
  0xea   :  { %v642_v47 = vpop.f32.mrf.mxu0  ;;  %v540_v10 = vpop.f32.mrf.mxu1  ;;  %v5274_v63 = vld [vmem:[%s9020_s4 + $0xb8] sm:$0xff]  ;;  %923 = vmatpush1.msra.mxu0 %v864_v2 }
  0xeb   :  { %v550_v12 = vadd.f32 %v540_v10, %v428_v7  ;;  %v665_v28 = vadd.f32 %v642_v47, %v543_v14  ;;  %v682_v47 = vld [vmem:[%s9019_s3 + $0x8] sm:$0x3f]  ;;  %946 = vmatprep.subr.mxu0 %v6309_v6  ;;  %v883_v7 = vld [vmem:[%s9020_s4 + $0x98] sm:$0xff]  ;;  %v1091_v14 = vld [vmem:[%s9021_s5 + $0x90] sm:$0xff] }
  0xec   :  { %v644_v51 = vpop.f32.mrf.mxu0  ;;  %947 = vmatpush2.msra.mxu0 %v884_v4  ;;  %v5290_v10 = vld [vmem:[%s9020_s4 + $0x138] sm:$0xff]  ;;  %v5303_v4 = vld [vmem:[%s9021_s5 + $0xd0] sm:$0xff] }
  0xed   :  { %v666_v29 = vadd.f32 %v644_v51, %v544_v16  ;;  %v673_v33 = vmax.f32 %v665_v28, 0.0  ;;  %v5265_v51 = vld [vmem:[%s9019_s3 + $0x18] sm:$0x3f]  ;;  %948 = vmatprep.subr.mxu0 %v6309_v6  ;;  %v5315_v28 = vld [vmem:[%s9021_s5 + $0x130] sm:$0xff] }
  0xee   :  { %v648_v55 = vpop.f32.mrf.mxu0  ;;  %949 = vmatpush2.msra.mxu0 %v883_v7  ;;  %v5304_v2 = vld [vmem:[%s9021_s5 + $0xd8] sm:$0xff]  ;;  %v5346_v7 = vld [vmem:[%s9021_s5 + $0x208] sm:$0xf] }
  0xef   :  { %v667_v32 = vadd.f32 %v648_v55, %v545_v37  ;;  %v674_v46 = vmax.f32 %v666_v29, 0.0  ;;  %v5282_v55 = vld [vmem:[%s9020_s4 + $0xf8] sm:$0xff]  ;;  %950 = vmatprep.subr.mxu0 %v6309_v6 }
  0xf0   :  { %v650_v60 = vpop.f32.mrf.mxu0  ;;  %951 = vmatpush2.msra.mxu0 %v882_v9  ;;  %v1092_v37 = vld [vmem:[%s9021_s5 + $0x98] sm:$0xff] }
  0xf1   :  { %v668_v34 = vadd.f32 %v650_v60, %v546_v31  ;;  %v675_v35 = vmax.f32 %v667_v32, 0.0  ;;  %v5277_v60 = vld [vmem:[%s9020_s4 + $0xd0] sm:$0xff]  ;;  %952 = vmatprep.subr.mxu0 %v6309_v6  ;;  %v5317_v32 = vld [vmem:[%s9021_s5 + $0x140] sm:$0xff]  ;;  %v5316_v29 = vld [vmem:[%s9021_s5 + $0x138] sm:$0xff] }
  0xf2   :  { %v654_v3 = vpop.f32.mrf.mxu0  ;;  %v5300_v9 = vld [vmem:[%s9021_s5 + $0xb8] sm:$0xff] }
  0xf3   :  { %v669_v39 = vadd.f32 %v654_v3, %v547_v26  ;;  %v676_v38 = vmax.f32 %v668_v34, 0.0  ;;  %v5272_v3 = vld [vmem:[%s9020_s4 + $0xa8] sm:$0xff] }
  0xf4   :  { %v656_v11 = vpop.f32.mrf.mxu0 }
  0xf5   :  { %v670_v36 = vadd.f32 %v656_v11, %v548_v25  ;;  %v677_v44 = vmax.f32 %v669_v39, 0.0  ;;  %v881_v11 = vld [vmem:[%s9020_s4 + $0x88] sm:$0xff] }
  0xf6   :  { %v660_v13 = vpop.f32.mrf.mxu0  ;;  %953 = vmatpush2.msra.mxu0 %v881_v11  ;;  %v5318_v39 = vld [vmem:[%s9021_s5 + $0x148] sm:$0xff]  ;;  %v5372_v11 = vld [vmem:[%s9021_s5 + $0x2b8] sm:$0xf] }
  0xf7   :  { %v671_v27 = vadd.f32 %v660_v13, %v549_v23  ;;  %v678_v45 = vmax.f32 %v670_v36, 0.0  ;;  %954 = vmatprep.subr.mxu0 %v6309_v6  ;;  %v5320_v23 = vld [vmem:[%s9021_s5 + $0x158] sm:$0xf]  ;;  %v1093_v36 = vld [vmem:[%s9021_s5 + $0xa0] sm:$0xf] }
  0xf8   :  { %v662_v20 = vpop.f32.mrf.mxu0  ;;  %955 = vmatpush2.msra.mxu0 %v880_v17 }
  0xf9   :  { %v672_v18 = vadd.f32 %v662_v20, %v550_v12  ;;  %v679_v42 = vmax.f32 %v671_v27, 0.0  ;;  %5295 = vmatprep.subr.msk.mxu0 %vm690_vm1, %v1094_v21 }
  0xfb   :  { %v680_v41 = vmax.f32 %v672_v18, 0.0  ;;  %v5319_v18 = vld [vmem:[%s9021_s5 + $0x150] sm:$0xf] }
  0xfd   :  { %5260 = vmatprep.subr.msk.mxu1 %vm690_vm1, %v680_v41 }
  0xfe   :  { %5261 = vmatpush1.msk.msra.mxu1 %vm690_vm1, %v679_v42 }
  0xff   :  { %723 = vmatprep.subr.mxu1 %v678_v45 }
 0x100   :  { %724 = vmatpush1.msra.mxu1 %v677_v44 }
 0x101   :  { %725 = vmatprep.subr.mxu1 %v676_v38 }
 0x102   :  { %726 = vmatpush1.msra.mxu1 %v675_v35 }
 0x103   :  { %727 = vmatprep.subr.mxu1 %v674_v46 }
 0x104   :  { %728 = vmatpush1.msra.mxu1 %v673_v33 }
 0x105   :  { %5262 = vmatmul.mubr.msk.f32.vlgmr.msra.gmra.mxu1 %vm683_vm2, %v681_v30  ;;  %5266 = vmatprep.subr.msk.mxu1 %vm690_vm1, %v680_v41  ;;  %v1085_v30 = vld [vmem:[%s9021_s5 + $0x60] sm:$0xff] }
 0x106   :  { %5267 = vmatpush1.msk.msra.mxu1 %vm690_vm1, %v679_v42  ;;  %767 = vmatprep.mubr.f32.mxu1 %v6309_v6  ;;  %v1090_v42 = vld [vmem:[%s9021_s5 + $0x88] sm:$0xff] }
 0x107   :  { %809 = vmatprep.subr.mxu1 %v678_v45  ;;  %v1089_v45 = vld [vmem:[%s9021_s5 + $0x80] sm:$0xff] }
 0x108   :  { %810 = vmatpush1.msra.mxu1 %v677_v44  ;;  %v1088_v44 = vld [vmem:[%s9021_s5 + $0x78] sm:$0xff] }
 0x109   :  { %5263 = vmatmul.mubr.msk.f32.gmra.mxu1 %vm683_vm2, %v682_v47  ;;  %811 = vmatprep.subr.mxu1 %v676_v38  ;;  %v5314_v38 = vld [vmem:[%s9021_s5 + $0x128] sm:$0xff]  ;;  %v1084_v47 = vld [vmem:[%s9021_s5 + $0x58] sm:$0xff] }
 0x10a   :  { %812 = vmatpush1.msra.mxu1 %v675_v35  ;;  %847 = vmatprep.mubr.f32.mxu1 %v6309_v6  ;;  %v1087_v35 = vld [vmem:[%s9021_s5 + $0x70] sm:$0xff] }
 0x10b   :  { %813 = vmatprep.subr.mxu1 %v674_v46  ;;  %v5313_v46 = vld [vmem:[%s9021_s5 + $0x120] sm:$0xff] }
 0x10c   :  { %814 = vmatpush1.msra.mxu1 %v673_v33  ;;  %v1086_v33 = vld [vmem:[%s9021_s5 + $0x68] sm:$0xff] }
 0x10d   :  { %5268 = vmatmul.mubr.msk.f32.vlgmr.msra.gmra.mxu1 %vm683_vm2, %v5264_v48  ;;  %989 = vmatprep.subr.mxu1 %v6309_v6  ;;  %v1083_v48 = vld [vmem:[%s9021_s5 + $0x50] sm:$0xff] }
 0x10e   :  { %853 = vmatprep.mubr.f32.mxu1 %v6309_v6  ;;  %990 = vmatpush1.msra.mxu1 %v5287_v49  ;;  %v1082_v49 = vld [vmem:[%s9021_s5 + $0x48] sm:$0xff] }
 0x10f   :  { %991 = vmatprep.subr.mxu1 %v6309_v6 }
 0x110   :  { %992 = vmatpush1.msra.mxu1 %v5286_v50  ;;  %v5312_v50 = vld [vmem:[%s9021_s5 + $0x118] sm:$0xff] }
 0x111   :  { %5269 = vmatmul.mubr.msk.f32.gmra.mxu1 %vm683_vm2, %v5265_v51  ;;  %993 = vmatprep.subr.mxu1 %v6309_v6  ;;  %v1081_v51 = vld [vmem:[%s9021_s5 + $0x40] sm:$0xff] }
 0x112   :  { %994 = vmatpush1.msra.mxu1 %v5285_v52  ;;  %v5311_v52 = vld [vmem:[%s9021_s5 + $0x110] sm:$0xff] }
 0x113   :  { %995 = vmatprep.subr.mxu1 %v6309_v6 }
 0x114   :  { %996 = vmatpush1.msra.mxu1 %v5284_v53  ;;  %v1080_v53 = vld [vmem:[%s9021_s5 + $0x38] sm:$0xff] }
 0x115   :  { %997 = vmatprep.subr.mxu1 %v6309_v6 }
 0x116   :  { %998 = vmatpush1.msra.mxu1 %v5283_v54  ;;  %v5310_v54 = vld [vmem:[%s9021_s5 + $0x108] sm:$0xff] }
 0x117   :  { %999 = vmatprep.subr.mxu1 %v6309_v6 }
 0x118   :  { %1000 = vmatpush1.msra.mxu1 %v5282_v55  ;;  %v1079_v55 = vld [vmem:[%s9021_s5 + $0x30] sm:$0xff] }
 0x119   :  { %1001 = vmatprep.subr.mxu1 %v6309_v6 }
 0x11a   :  { %1002 = vmatpush1.msra.mxu1 %v5281_v56  ;;  %v5309_v56 = vld [vmem:[%s9021_s5 + $0x100] sm:$0xff] }
 0x11b   :  { %1003 = vmatprep.subr.mxu1 %v6309_v6 }
 0x11c   :  { %1004 = vmatpush1.msra.mxu1 %v5280_v57  ;;  %v1078_v57 = vld [vmem:[%s9021_s5 + $0x28] sm:$0xff] }
 0x11d   :  { %1005 = vmatprep.subr.mxu1 %v6309_v6 }
 0x11e   :  { %1006 = vmatpush1.msra.mxu1 %v5279_v58  ;;  %v5308_v58 = vld [vmem:[%s9021_s5 + $0xf8] sm:$0xff] }
 0x11f   :  { %1007 = vmatprep.subr.mxu1 %v6309_v6 }
 0x120   :  { %1008 = vmatpush1.msra.mxu1 %v5278_v59  ;;  %v1077_v59 = vld [vmem:[%s9021_s5 + $0x20] sm:$0xff] }
 0x121   :  { %1009 = vmatprep.subr.mxu1 %v6309_v6 }
 0x122   :  { %1010 = vmatpush1.msra.mxu1 %v5277_v60  ;;  %v5307_v60 = vld [vmem:[%s9021_s5 + $0xf0] sm:$0xff] }
 0x123   :  { %1011 = vmatprep.subr.mxu1 %v6309_v6 }
 0x124   :  { %1012 = vmatpush1.msra.mxu1 %v5276_v61  ;;  %v1076_v61 = vld [vmem:[%s9021_s5 + $0x18] sm:$0xff] }
 0x125   :  { %1013 = vmatprep.subr.mxu1 %v6309_v6 }
 0x126   :  { %1014 = vmatpush1.msra.mxu1 %v5275_v62  ;;  %v5306_v62 = vld [vmem:[%s9021_s5 + $0xe8] sm:$0xff] }
 0x127   :  { %1015 = vmatprep.subr.mxu1 %v6309_v6 }
 0x128   :  { %1016 = vmatpush1.msra.mxu1 %v5274_v63  ;;  %v1075_v63 = vld [vmem:[%s9021_s5 + $0x10] sm:$0xff] }
 0x129   :  { %1017 = vmatprep.subr.mxu1 %v6309_v6 }
 0x12a   :  { %1018 = vmatpush1.msra.mxu1 %v5273_v1  ;;  %v1074_v1 = vld [vmem:[%s9021_s5 + $0x8] sm:$0xff] }
 0x12b   :  { %1019 = vmatprep.subr.mxu1 %v6309_v6 }
 0x12c   :  { %1020 = vmatpush1.msra.mxu1 %v5272_v3  ;;  %v1073_v3 = vld [vmem:[%s9021_s5] sm:$0xff] }
 0x12d   :  { %1043 = vmatprep.subr.mxu1 %v6309_v6 }
 0x12e   :  { %1044 = vmatpush2.msra.mxu1 %v5292_v5  ;;  %v5302_v5 = vld [vmem:[%s9021_s5 + $0xc8] sm:$0xff] }
 0x12f   :  { %1045 = vmatprep.subr.mxu1 %v6309_v6 }
 0x130   :  { %1046 = vmatpush2.msra.mxu1 %v5291_v8  ;;  %v5301_v8 = vld [vmem:[%s9021_s5 + $0xc0] sm:$0xff] }
 0x131   :  { %1047 = vmatprep.subr.mxu1 %v6309_v6 }
 0x132   :  { %1048 = vmatpush2.msra.mxu1 %v5290_v10  ;;  %v5299_v10 = vld [vmem:[%s9021_s5 + $0xb0] sm:$0xff] }
 0x133   :  { %1049 = vmatprep.subr.mxu1 %v6309_v6 }
 0x134   :  { %1050 = vmatpush2.msra.mxu1 %v5289_v19 }
 0x135   :  { %1051 = vmatprep.subr.mxu1 %v6309_v6 }
 0x136   :  { %1052 = vmatpush2.msra.mxu1 %v5288_v15 }
 0x137   :  { %5321 = vmatprep.subr.msk.mxu1 %vm690_vm1, %v5320_v23 }
 0x1c5   :  { %v763_v13 = vpop.f32.mrf.mxu1 }
 0x1c7   :  { %v765_v24 = vpop.f32.mrf.mxu1 }
 0x1c9   :  { %v769_v25 = vpop.f32.mrf.mxu1 }
 0x1cb   :  { %v771_v12 = vpop.f32.mrf.mxu1 }
 0x1cd   :  { %v849_v22 = vpop.f32.mrf.mxu1 }
 0x1ce   :  { %v860_v20 = vmax.f32 %v763_v13, %v849_v22 }
 0x1cf   :  { %v851_v26 = vpop.f32.mrf.mxu1 }
 0x1d0   :  { %v861_v27 = vmax.f32 %v765_v24, %v851_v26  ;;  %v5345_v26 = vld [vmem:[%s9021_s5 + $0x200] sm:$0xf] }
 0x1d1   :  { %v855_v31 = vpop.f32.mrf.mxu1 }
 0x1d2   :  { %5270 = vmatprep.mubr.msk.f32.mxu0 %vm885_vm3, %v861_v27  ;;  %5293 = vmatprep.mubr.msk.f32.mxu1 %vm885_vm3, %v861_v27  ;;  %v862_v41 = vmax.f32 %v769_v25, %v855_v31  ;;  %v5343_v31 = vld [vmem:[%s9021_s5 + $0x1f0] sm:$0xff] }
 0x1d3   :  { %v857_v16 = vpop.f32.mrf.mxu1  ;;  %957 = vmatmul.mubr.f32.vlgmr.msra.gmra.mxu0 %v860_v20  ;;  %1054 = vmatmul.mubr.f32.vlgmr.msra.gmra.mxu1 %v860_v20  ;;  %v5344_v20 = vld [vmem:[%s9021_s5 + $0x1f8] sm:$0xff] }
 0x1d4   :  { %v863_v34 = vmax.f32 %v771_v12, %v857_v16  ;;  %5296 = vmatpush1.msk.msra.mxu0 %vm690_vm1, %v1093_v36  ;;  %5322 = vmatpush1.msk.msra.mxu1 %vm690_vm1, %v5319_v18  ;;  %v5342_v36 = vld [vmem:[%s9021_s5 + $0x1e8] sm:$0xff]  ;;  %v5341_v18 = vld [vmem:[%s9021_s5 + $0x1e0] sm:$0xff] }
 0x1d5   :  { %1119 = vmatprep.subr.mxu0 %v1092_v37  ;;  %1248 = vmatprep.subr.mxu1 %v5318_v39  ;;  %v5371_v37 = vld [vmem:[%s9021_s5 + $0x2b0] sm:$0xf] }
 0x1d6   :  { %5271 = vmatprep.mubr.msk.f32.mxu0 %vm885_vm3, %v863_v34  ;;  %5294 = vmatprep.mubr.msk.f32.mxu1 %vm885_vm3, %v863_v34  ;;  %v5340_v34 = vld [vmem:[%s9021_s5 + $0x1d8] sm:$0xff] }
 0x1d7   :  { %962 = vmatmul.mubr.f32.gmra.mxu0 %v862_v41  ;;  %1059 = vmatmul.mubr.f32.gmra.mxu1 %v862_v41  ;;  %v5370_v41 = vld [vmem:[%s9021_s5 + $0x2a8] sm:$0xff] }
 0x1d8   :  { %1120 = vmatpush1.msra.mxu0 %v1091_v14  ;;  %1249 = vmatpush1.msra.mxu1 %v5317_v32  ;;  %v5339_v14 = vld [vmem:[%s9021_s5 + $0x1d0] sm:$0xff]  ;;  %v5369_v32 = vld [vmem:[%s9021_s5 + $0x2a0] sm:$0xff] }
 0x1d9   :  { %1121 = vmatprep.subr.mxu0 %v1090_v42  ;;  %1250 = vmatprep.subr.mxu1 %v5316_v29  ;;  %v5338_v42 = vld [vmem:[%s9021_s5 + $0x1c8] sm:$0xff]  ;;  %v5368_v29 = vld [vmem:[%s9021_s5 + $0x298] sm:$0xff] }
 0x1da   :  { %1122 = vmatpush1.msra.mxu0 %v1089_v45  ;;  %1251 = vmatpush1.msra.mxu1 %v5315_v28  ;;  %v5337_v45 = vld [vmem:[%s9021_s5 + $0x1c0] sm:$0xff]  ;;  %v5367_v28 = vld [vmem:[%s9021_s5 + $0x290] sm:$0xff] }
 0x1db   :  { %1123 = vmatprep.subr.mxu0 %v1088_v44  ;;  %1252 = vmatprep.subr.mxu1 %v5314_v38  ;;  %v5336_v44 = vld [vmem:[%s9021_s5 + $0x1b8] sm:$0xff] }
 0x1dc   :  { %1124 = vmatpush1.msra.mxu0 %v1087_v35  ;;  %1253 = vmatpush1.msra.mxu1 %v5313_v46  ;;  %v5366_v35 = vld [vmem:[%s9021_s5 + $0x288] sm:$0xff]  ;;  %v5335_v46 = vld [vmem:[%s9021_s5 + $0x1b0] sm:$0xff] }
 0x1dd   :  { %1125 = vmatprep.subr.mxu0 %v1086_v33  ;;  %1171 = vmatprep.mubr.f32.mxu0 %v6309_v6  ;;  %v5365_v33 = vld [vmem:[%s9021_s5 + $0x280] sm:$0xff] }
 0x1de   :  { %1126 = vmatpush1.msra.mxu0 %v1085_v30  ;;  %1300 = vmatprep.mubr.f32.mxu1 %v6309_v6  ;;  %v5334_v30 = vld [vmem:[%s9021_s5 + $0x1a8] sm:$0xff] }
 0x1df   :  { %1127 = vmatprep.subr.mxu0 %v1084_v47  ;;  %1254 = vmatprep.subr.mxu1 %v5312_v50  ;;  %v5364_v47 = vld [vmem:[%s9021_s5 + $0x278] sm:$0xff] }
 0x1e0   :  { %1128 = vmatpush1.msra.mxu0 %v1083_v48  ;;  %1255 = vmatpush1.msra.mxu1 %v5311_v52  ;;  %v5333_v48 = vld [vmem:[%s9021_s5 + $0x1a0] sm:$0xff]  ;;  %v5332_v50 = vld [vmem:[%s9021_s5 + $0x198] sm:$0xff]  ;;  %v5331_v52 = vld [vmem:[%s9021_s5 + $0x190] sm:$0xff] }
 0x1e1   :  { %1129 = vmatprep.subr.mxu0 %v1082_v49  ;;  %1256 = vmatprep.subr.mxu1 %v5310_v54  ;;  %v5363_v49 = vld [vmem:[%s9021_s5 + $0x270] sm:$0xff]  ;;  %v5330_v54 = vld [vmem:[%s9021_s5 + $0x188] sm:$0xff] }
 0x1e2   :  { %1130 = vmatpush1.msra.mxu0 %v1081_v51  ;;  %1257 = vmatpush1.msra.mxu1 %v5309_v56  ;;  %v5362_v51 = vld [vmem:[%s9021_s5 + $0x268] sm:$0xff]  ;;  %v5329_v56 = vld [vmem:[%s9021_s5 + $0x180] sm:$0xff] }
 0x1e3   :  { %1131 = vmatprep.subr.mxu0 %v1080_v53  ;;  %1258 = vmatprep.subr.mxu1 %v5308_v58  ;;  %v5361_v53 = vld [vmem:[%s9021_s5 + $0x260] sm:$0xff]  ;;  %v5328_v58 = vld [vmem:[%s9021_s5 + $0x178] sm:$0xff] }
 0x1e4   :  { %1132 = vmatpush1.msra.mxu0 %v1079_v55  ;;  %1259 = vmatpush1.msra.mxu1 %v5307_v60  ;;  %v5360_v55 = vld [vmem:[%s9021_s5 + $0x258] sm:$0xff]  ;;  %v5327_v60 = vld [vmem:[%s9021_s5 + $0x170] sm:$0xff] }
 0x1e5   :  { %1133 = vmatprep.subr.mxu0 %v1078_v57  ;;  %1260 = vmatprep.subr.mxu1 %v5306_v62  ;;  %v5359_v57 = vld [vmem:[%s9021_s5 + $0x250] sm:$0xff]  ;;  %v5326_v62 = vld [vmem:[%s9021_s5 + $0x168] sm:$0xff] }
 0x1e6   :  { %1134 = vmatpush1.msra.mxu0 %v1077_v59  ;;  %1261 = vmatpush1.msra.mxu1 %v5305_v0  ;;  %v5358_v59 = vld [vmem:[%s9021_s5 + $0x248] sm:$0xff]  ;;  %v5325_v0 = vld [vmem:[%s9021_s5 + $0x160] sm:$0xff] }
 0x1e7   :  { %1135 = vmatprep.subr.mxu0 %v1076_v61  ;;  %1262 = vmatprep.subr.mxu1 %v5304_v2  ;;  %v5357_v61 = vld [vmem:[%s9021_s5 + $0x240] sm:$0xff]  ;;  %v5354_v2 = vld [vmem:[%s9021_s5 + $0x228] sm:$0xff] }
 0x1e8   :  { %1136 = vmatpush1.msra.mxu0 %v1075_v63  ;;  %1263 = vmatpush1.msra.mxu1 %v5303_v4  ;;  %v5356_v63 = vld [vmem:[%s9021_s5 + $0x238] sm:$0xff]  ;;  %v5353_v4 = vld [vmem:[%s9021_s5 + $0x220] sm:$0xff] }
 0x1e9   :  { %1137 = vmatprep.subr.mxu0 %v1074_v1  ;;  %1264 = vmatprep.subr.mxu1 %v5302_v5  ;;  %v5355_v1 = vld [vmem:[%s9021_s5 + $0x230] sm:$0xff] }
 0x1ea   :  { %1138 = vmatpush1.msra.mxu0 %v1073_v3  ;;  %1265 = vmatpush1.msra.mxu1 %v5301_v8  ;;  %v5398_v3 = vld [vmem:[%s9021_s5 + $0x368] sm:$0xf]  ;;  %v5352_v8 = vld [vmem:[%s9021_s5 + $0x218] sm:$0xff] }
 0x1eb   :  { %5347 = vmatprep.subr.msk.mxu0 %vm690_vm1, %v5346_v7  ;;  %1266 = vmatprep.subr.mxu1 %v5300_v9  ;;  %v5397_v7 = vld [vmem:[%s9021_s5 + $0x360] sm:$0xf]  ;;  %v5396_v9 = vld [vmem:[%s9021_s5 + $0x358] sm:$0xff] }
 0x1ec   :  { %1267 = vmatpush1.msra.mxu1 %v5299_v10  ;;  %v5351_v10 = vld [vmem:[%s9021_s5 + $0x210] sm:$0xff] }
 0x1ed   :  { %5373 = vmatprep.subr.msk.mxu1 %vm690_vm1, %v5372_v11  ;;  %v5395_v11 = vld [vmem:[%s9021_s5 + $0x350] sm:$0xff] }
 0x293   :  { %v958_v19 = vpop.f32.mrf.mxu0  ;;  %v1055_v17 = vpop.f32.mrf.mxu1 }
 0x294   :  { %v1064_v15 = vmax.f32 %v958_v19, %v1055_v17  ;;  %v5394_v19 = vld [vmem:[%s9021_s5 + $0x348] sm:$0xff] }
 0x295   :  { %v960_v21 = vpop.f32.mrf.mxu0  ;;  %v1057_v23 = vpop.f32.mrf.mxu1 }
 0x296   :  { %1067 = vst.msk [vmem:[#allocation2] sm:$0xff] %vm1066_vm4, %v1064_v15  ;;  %v5393_v15 = vld [vmem:[%s9021_s5 + $0x340] sm:$0xff]  ;;  %v5392_v23 = vld [vmem:[%s9021_s5 + $0x338] sm:$0xff] }
 0x297   :  { %v963_v13 = vpop.f32.mrf.mxu0  ;;  %v1060_v24 = vpop.f32.mrf.mxu1 }
 0x298   :  { %v1065_v25 = vmax.f32 %v963_v13, %v1060_v24  ;;  %v5391_v13 = vld [vmem:[%s9021_s5 + $0x330] sm:$0xff]  ;;  %v5390_v24 = vld [vmem:[%s9021_s5 + $0x328] sm:$0xff] }
 0x299   :  { %v965_v12 = vpop.f32.mrf.mxu0  ;;  %v1062_v22 = vpop.f32.mrf.mxu1 }
 0x29a   :  { %1069 = vst.msk [vmem:[#allocation2 + $0x8] sm:$0x3f] %vm1068_vm5, %v1065_v25  ;;  %v5389_v12 = vld [vmem:[%s9021_s5 + $0x320] sm:$0xff]  ;;  %v5388_v22 = vld [vmem:[%s9021_s5 + $0x318] sm:$0xff] }
 0x29d   :  { %v1071_v27 = vld [vmem:[#allocation2] sm:$0xff] }
 0x29e   :  { %5297 = vmatmul.mubr.msk.f32.vlgmr.msra.gmra.mxu0 %vm1066_vm4, %v1071_v27  ;;  %v5386_v27 = vld [vmem:[%s9021_s5 + $0x308] sm:$0xff] }
 0x29f   :  { %5348 = vmatpush1.msk.msra.mxu0 %vm690_vm1, %v5345_v26  ;;  %1177 = vmatprep.mubr.f32.mxu0 %v6309_v6  ;;  %v5387_v26 = vld [vmem:[%s9021_s5 + $0x310] sm:$0xff] }
 0x2a0   :  { %1366 = vmatprep.subr.mxu0 %v5344_v20  ;;  %v5385_v20 = vld [vmem:[%s9021_s5 + $0x300] sm:$0xff] }
 0x2a1   :  { %1367 = vmatpush1.msra.mxu0 %v5343_v31  ;;  %v1072_v39 = vld [vmem:[#allocation2 + $0x8] sm:$0x3]  ;;  %v1318_v21 = vld [vmem:[#allocation2 + $0xa] sm:$0x3]  ;;  %v5384_v31 = vld [vmem:[%s9021_s5 + $0x2f8] sm:$0xff] }
 0x2a2   :  { %v1199_v16 = vld [vmem:[#allocation2 + $0x1] sm:$0xff]  ;;  %1368 = vmatprep.subr.mxu0 %v5342_v36  ;;  %5298 = vmatmul.mubr.msk.f32.gmra.mxu0 %vm1066_vm4, %v1072_v39  ;;  %v1200_v38 = vld [vmem:[#allocation2 + $0x9] sm:$0x3]  ;;  %v1436_v25 = vld [vmem:[#allocation2 + $0xb] sm:$0x3] }
 0x2a3   :  { %5323 = vmatmul.mubr.msk.f32.vlgmr.msra.gmra.mxu1 %vm1066_vm4, %v1199_v16  ;;  %1369 = vmatpush1.msra.mxu0 %v5341_v18  ;;  %v1317_v5 = vld [vmem:[#allocation2 + $0x2] sm:$0xff]  ;;  %v5383_v36 = vld [vmem:[%s9021_s5 + $0x2f0] sm:$0xff]  ;;  %v5380_v39 = vld [vmem:[%s9021_s5 + $0x2d8] sm:$0xff] }
 0x2a4   :  { %5374 = vmatpush1.msk.msra.mxu1 %vm690_vm1, %v5371_v37  ;;  %1370 = vmatprep.subr.mxu0 %v5340_v34  ;;  %v1435_v17 = vld [vmem:[#allocation2 + $0x3] sm:$0xff]  ;;  %v5379_v16 = vld [vmem:[%s9021_s5 + $0x2d0] sm:$0xff] }
 0x2a5   :  { %1484 = vmatprep.subr.mxu1 %v5370_v41  ;;  %1371 = vmatpush1.msra.mxu0 %v5339_v14  ;;  %v5382_v18 = vld [vmem:[%s9021_s5 + $0x2e8] sm:$0xff]  ;;  %v5381_v37 = vld [vmem:[%s9021_s5 + $0x2e0] sm:$0xff] }
 0x2a6   :  { %1485 = vmatpush1.msra.mxu1 %v5369_v32  ;;  %1306 = vmatprep.mubr.f32.mxu1 %v6309_v6  ;;  %v5378_v34 = vld [vmem:[%s9021_s5 + $0x2c8] sm:$0xff]  ;;  %v5377_v41 = vld [vmem:[%s9021_s5 + $0x2c0] sm:$0xff] }
 0x2a7   :  { %1372 = vmatprep.subr.mxu0 %v5338_v42  ;;  %1486 = vmatprep.subr.mxu1 %v5368_v29  ;;  %v1553_v14 = vld [vmem:[#allocation2 + $0x4] sm:$0xff]  ;;  %v1554_v32 = vld [vmem:[#allocation2 + $0xc] sm:$0x3]  ;;  %v5426_v42 = vld [vmem:[%s9024_s8 + $0x118] sm:$0xff] }
 0x2a8   :  { %5324 = vmatmul.mubr.msk.f32.gmra.mxu1 %vm1066_vm4, %v1200_v38  ;;  %1373 = vmatpush1.msra.mxu0 %v5337_v45  ;;  %v5425_v29 = vld [vmem:[%s9024_s8 + $0x110] sm:$0xff]  ;;  %v5424_v45 = vld [vmem:[%s9024_s8 + $0x108] sm:$0xff] }
 0x2a9   :  { %1487 = vmatpush1.msra.mxu1 %v5367_v28  ;;  %1374 = vmatprep.subr.mxu0 %v5336_v44  ;;  %v5423_v28 = vld [vmem:[%s9024_s8 + $0x100] sm:$0xff]  ;;  %v5422_v44 = vld [vmem:[%s9024_s8 + $0xf8] sm:$0xff]  ;;  %v5421_v38 = vld [vmem:[%s9024_s8 + $0xf0] sm:$0xff] }
 0x2aa   :  { %1488 = vmatprep.subr.mxu1 %v5366_v35  ;;  %1375 = vmatpush1.msra.mxu0 %v5335_v46  ;;  %v5420_v35 = vld [vmem:[%s9024_s8 + $0xe8] sm:$0xff]  ;;  %v5419_v46 = vld [vmem:[%s9024_s8 + $0xe0] sm:$0xff] }
 0x2ab   :  { %1489 = vmatpush1.msra.mxu1 %v5365_v33  ;;  %1376 = vmatprep.subr.mxu0 %v5334_v30  ;;  %v5418_v33 = vld [vmem:[%s9024_s8 + $0xd8] sm:$0xff]  ;;  %v5417_v30 = vld [vmem:[%s9024_s8 + $0xd0] sm:$0xff] }
 0x2ac   :  { %1490 = vmatprep.subr.mxu1 %v5364_v47  ;;  %1377 = vmatpush1.msra.mxu0 %v5333_v48  ;;  %v5416_v47 = vld [vmem:[%s9024_s8 + $0xc8] sm:$0xff]  ;;  %v5415_v48 = vld [vmem:[%s9024_s8 + $0xc0] sm:$0xff] }
 0x2ad   :  { %1491 = vmatpush1.msra.mxu1 %v5363_v49  ;;  %1378 = vmatprep.subr.mxu0 %v5332_v50  ;;  %v5414_v49 = vld [vmem:[%s9024_s8 + $0xb8] sm:$0xff]  ;;  %v5413_v50 = vld [vmem:[%s9024_s8 + $0xb0] sm:$0xff] }
 0x2ae   :  { %1492 = vmatprep.subr.mxu1 %v5362_v51  ;;  %1379 = vmatpush1.msra.mxu0 %v5331_v52  ;;  %v5412_v51 = vld [vmem:[%s9024_s8 + $0xa8] sm:$0xff] }
 0x2af   :  { %1493 = vmatpush1.msra.mxu1 %v5361_v53  ;;  %1380 = vmatprep.subr.mxu0 %v5330_v54 }
 0x2b0   :  { %1494 = vmatprep.subr.mxu1 %v5360_v55  ;;  %1381 = vmatpush1.msra.mxu0 %v5329_v56 }
 0x2b1   :  { %1495 = vmatpush1.msra.mxu1 %v5359_v57  ;;  %1382 = vmatprep.subr.mxu0 %v5328_v58 }
 0x2b2   :  { %1496 = vmatprep.subr.mxu1 %v5358_v59  ;;  %1383 = vmatpush1.msra.mxu0 %v5327_v60 }
 0x2b3   :  { %1497 = vmatpush1.msra.mxu1 %v5357_v61  ;;  %1384 = vmatprep.subr.mxu0 %v5326_v62 }
 0x2b4   :  { %1498 = vmatprep.subr.mxu1 %v5356_v63  ;;  %1385 = vmatpush1.msra.mxu0 %v5325_v0  ;;  %v1070_v63 = vld [vmem:[%s9022_s6] sm:$0x3] }
 0x2b5   :  { %1418 = vmatprep.mubr.f32.mxu0 %v6309_v6  ;;  %1499 = vmatpush1.msra.mxu1 %v5355_v1 }
 0x2b6   :  { %5349 = vmatmul.mubr.msk.f32.vlgmr.msra.gmra.mxu0 %vm1066_vm4, %v1317_v5  ;;  %1500 = vmatprep.subr.mxu1 %v5354_v2  ;;  %v1192_v2 = vrot.slane %v1070_v63, %v6679_v43 }
 0x2b7   :  { %5399 = vmatprep.subr.msk.mxu0 %vm690_vm1, %v5398_v3  ;;  %1501 = vmatpush1.msra.mxu1 %v5353_v4  ;;  %v1188_v3 = vrot.slane %v1070_v63, %v6674_v40  ;;  %v1852_v63 = vld [vmem:[%s9024_s8 + $0x80] sm:$0xff] }
 0x2b8   :  { %5400 = vmatpush1.msk.msra.mxu0 %vm690_vm1, %v5397_v7  ;;  %1502 = vmatprep.subr.mxu1 %v5352_v8 }
 0x2b9   :  { %1602 = vmatprep.subr.mxu0 %v5396_v9  ;;  %1424 = vmatprep.mubr.f32.mxu0 %v6309_v6 }
 0x2ba   :  { %1503 = vmatpush1.msra.mxu1 %v5351_v10  ;;  %1536 = vmatprep.mubr.f32.mxu1 %v6309_v6 }
 0x2bb   :  { %1603 = vmatpush1.msra.mxu0 %v5395_v11  ;;  %5375 = vmatmul.mubr.msk.f32.vlgmr.msra.gmra.mxu1 %vm1066_vm4, %v1435_v17 }
 0x2bc   :  { %5350 = vmatmul.mubr.msk.f32.gmra.mxu0 %vm1066_vm4, %v1318_v21  ;;  %1604 = vmatprep.subr.mxu0 %v5394_v19 }
 0x2bd   :  { %1605 = vmatpush1.msra.mxu0 %v5393_v15  ;;  %1542 = vmatprep.mubr.f32.mxu1 %v6309_v6 }
 0x2be   :  { %1606 = vmatprep.subr.mxu0 %v5392_v23  ;;  %1654 = vmatprep.mubr.f32.mxu0 %v6309_v6 }
 0x2bf   :  { %1607 = vmatpush1.msra.mxu0 %v5391_v13  ;;  %5376 = vmatmul.mubr.msk.f32.gmra.mxu1 %vm1066_vm4, %v1436_v25 }
 0x2c0   :  { %1608 = vmatprep.subr.mxu0 %v5390_v24  ;;  %1751 = vmatprep.mubr.f32.mxu1 %v6309_v6 }
 0x2c1   :  { %1609 = vmatpush1.msra.mxu0 %v5389_v12 }
 0x2c2   :  { %1610 = vmatprep.subr.mxu0 %v5388_v22 }
 0x2c3   :  { %1611 = vmatpush1.msra.mxu0 %v5387_v26 }
 0x2c4   :  { %1612 = vmatprep.subr.mxu0 %v5386_v27 }
 0x2c5   :  { %1613 = vmatpush1.msra.mxu0 %v5385_v20 }
 0x2c6   :  { %1614 = vmatprep.subr.mxu0 %v5384_v31 }
 0x2c7   :  { %1615 = vmatpush1.msra.mxu0 %v5383_v36 }
 0x2c8   :  { %1616 = vmatprep.subr.mxu0 %v5382_v18 }
 0x2c9   :  { %1617 = vmatpush1.msra.mxu0 %v5381_v37 }
 0x2ca   :  { %1618 = vmatprep.subr.mxu0 %v5380_v39 }
 0x2cb   :  { %1619 = vmatpush1.msra.mxu0 %v5379_v16 }
 0x2cc   :  { %1620 = vmatprep.subr.mxu0 %v5378_v34 }
 0x2cd   :  { %1621 = vmatpush1.msra.mxu0 %v5377_v41 }
 0x2ce   :  { %5401 = vmatmul.mubr.msk.f32.vlgmr.msra.gmra.mxu0 %vm1066_vm4, %v1553_v14  ;;  %1950 = vmatprep.subr.mxu0 %v6309_v6 }
 0x2cf   :  { %1660 = vmatprep.mubr.f32.mxu0 %v6309_v6  ;;  %1951 = vmatpush1.msra.mxu0 %v5426_v42 }
 0x2d0   :  { %1952 = vmatprep.subr.mxu0 %v6309_v6 }
 0x2d1   :  { %1953 = vmatpush1.msra.mxu0 %v5425_v29  ;;  %v1675_v29 = vld [vmem:[%s9023_s7] sm:$0x1f] }
 0x2d2   :  { %5402 = vmatmul.mubr.msk.f32.gmra.mxu0 %vm1066_vm4, %v1554_v32  ;;  %1954 = vmatprep.subr.mxu0 %v6309_v6 }
 0x2d3   :  { %1955 = vmatpush1.msra.mxu0 %v5424_v45  ;;  %v5406_v45 = vld [vmem:[%s9023_s7 + $0x8] sm:$0x1f] }
 0x2d4   :  { %1956 = vmatprep.subr.mxu0 %v6309_v6 }
 0x2d5   :  { %1957 = vmatpush1.msra.mxu0 %v5423_v28  ;;  %v1851_v28 = vld [vmem:[%s9024_s8 + $0x78] sm:$0xff] }
 0x2d6   :  { %1958 = vmatprep.subr.mxu0 %v6309_v6 }
 0x2d7   :  { %1959 = vmatpush1.msra.mxu0 %v5422_v44  ;;  %v1850_v44 = vld [vmem:[%s9024_s8 + $0x70] sm:$0xff] }
 0x2d8   :  { %1960 = vmatprep.subr.mxu0 %v6309_v6 }
 0x2d9   :  { %1961 = vmatpush1.msra.mxu0 %v5421_v38  ;;  %v1849_v38 = vld [vmem:[%s9024_s8 + $0x68] sm:$0xff] }
 0x2da   :  { %1962 = vmatprep.subr.mxu0 %v6309_v6 }
 0x2db   :  { %1963 = vmatpush1.msra.mxu0 %v5420_v35  ;;  %v1848_v35 = vld [vmem:[%s9024_s8 + $0x60] sm:$0xff] }
 0x2dc   :  { %1964 = vmatprep.subr.mxu0 %v6309_v6 }
 0x2dd   :  { %1965 = vmatpush1.msra.mxu0 %v5419_v46  ;;  %v1847_v46 = vld [vmem:[%s9024_s8 + $0x58] sm:$0xff] }
 0x2de   :  { %1966 = vmatprep.subr.mxu0 %v6309_v6 }
 0x2df   :  { %1967 = vmatpush1.msra.mxu0 %v5418_v33  ;;  %v1846_v33 = vld [vmem:[%s9024_s8 + $0x50] sm:$0xff] }
 0x2e0   :  { %1968 = vmatprep.subr.mxu0 %v6309_v6 }
 0x2e1   :  { %1969 = vmatpush1.msra.mxu0 %v5417_v30  ;;  %v1845_v30 = vld [vmem:[%s9024_s8 + $0x48] sm:$0xff] }
 0x2e2   :  { %1970 = vmatprep.subr.mxu0 %v6309_v6 }
 0x2e3   :  { %1971 = vmatpush1.msra.mxu0 %v5416_v47  ;;  %v1844_v47 = vld [vmem:[%s9024_s8 + $0x40] sm:$0xff] }
 0x2e4   :  { %1972 = vmatprep.subr.mxu0 %v6309_v6 }
 0x2e5   :  { %1973 = vmatpush1.msra.mxu0 %v5415_v48  ;;  %v1843_v48 = vld [vmem:[%s9024_s8 + $0x38] sm:$0xff] }
 0x2e6   :  { %1974 = vmatprep.subr.mxu0 %v6309_v6 }
 0x2e7   :  { %1975 = vmatpush1.msra.mxu0 %v5414_v49  ;;  %v1842_v49 = vld [vmem:[%s9024_s8 + $0x30] sm:$0xff] }
 0x2e8   :  { %1976 = vmatprep.subr.mxu0 %v6309_v6 }
 0x2e9   :  { %1977 = vmatpush1.msra.mxu0 %v5413_v50  ;;  %v1841_v50 = vld [vmem:[%s9024_s8 + $0x28] sm:$0xff] }
 0x2ea   :  { %1978 = vmatprep.subr.mxu0 %v6309_v6 }
 0x2eb   :  { %1979 = vmatpush1.msra.mxu0 %v5412_v51  ;;  %v1840_v51 = vld [vmem:[%s9024_s8 + $0x20] sm:$0xff] }
 0x2ec   :  { %1980 = vmatprep.subr.mxu0 %v6309_v6 }
 0x35e   :  { %v1173_v52 = vpop.f32.mrf.mxu0 }
 0x35f   :  { %v1195_v10 = vadd.f32 %v1188_v3, %v1173_v52  ;;  %v1839_v52 = vld [vmem:[%s9024_s8 + $0x18] sm:$0xff] }
 0x360   :  { %v1175_v53 = vpop.f32.mrf.mxu0 }
 0x361   :  { %v1196_v8 = vadd.f32 %v1192_v2, %v1175_v53  ;;  %v1838_v53 = vld [vmem:[%s9024_s8 + $0x10] sm:$0xff] }
 0x362   :  { %v1179_v55 = vpop.f32.mrf.mxu0 }
 0x363   :  { %v1302_v54 = vpop.f32.mrf.mxu1  ;;  %v1197_v4 = vadd.f32 %v1188_v3, %v1179_v55  ;;  %v1836_v55 = vld [vmem:[%s9024_s8] sm:$0xff] }
 0x364   :  { %v1181_v57 = vpop.f32.mrf.mxu0  ;;  %v1313_v21 = vadd.f32 %v1302_v54, %v1195_v10  ;;  %v1837_v54 = vld [vmem:[%s9024_s8 + $0x8] sm:$0xff]  ;;  %v2033_v10 = vld [vmem:[%s9025_s9 + $0x40] sm:$0xff] }
 0x365   :  { %v1304_v56 = vpop.f32.mrf.mxu1  ;;  %v1198_v9 = vadd.f32 %v1192_v2, %v1181_v57  ;;  %v1855_v57 = vld [vmem:[%s9024_s8 + $0x98] sm:$0xff] }
 0x366   :  { %v1314_v17 = vadd.f32 %v1304_v56, %v1196_v8  ;;  %v5411_v56 = vld [vmem:[%s9024_s8 + $0xa0] sm:$0xff]  ;;  %v2034_v8 = vld [vmem:[%s9025_s9 + $0x48] sm:$0xff] }
 0x367   :  { %1981 = vmatpush1.msra.mxu0 %v5411_v56  ;;  %v5455_v56 = vld [vmem:[%s9025_s9 + $0xf0] sm:$0xff] }
 0x368   :  { %v1308_v58 = vpop.f32.mrf.mxu1  ;;  %2006 = vmatprep.subr.mxu0 %v6309_v6 }
 0x369   :  { %v1315_v11 = vadd.f32 %v1308_v58, %v1197_v4  ;;  %v5430_v58 = vld [vmem:[%s9024_s8 + $0x138] sm:$0xff] }
 0x36a   :  { %v1310_v60 = vpop.f32.mrf.mxu1  ;;  %2007 = vmatpush2.msra.mxu0 %v5430_v58 }
 0x36b   :  { %v1316_v15 = vadd.f32 %v1310_v60, %v1198_v9  ;;  %2008 = vmatprep.subr.mxu0 %v6309_v6  ;;  %v5429_v60 = vld [vmem:[%s9024_s8 + $0x130] sm:$0xff]  ;;  %v5442_v9 = vld [vmem:[%s9025_s9 + $0x98] sm:$0xff] }
 0x36c   :  { %2009 = vmatpush2.msra.mxu0 %v5429_v60  ;;  %v5474_v60 = vld [vmem:[%s9025_s9 + $0x180] sm:$0xff] }
 0x36d   :  { %2010 = vmatprep.subr.mxu0 %v6309_v6 }
 0x376   :  { %v1420_v59 = vpop.f32.mrf.mxu0 }
 0x377   :  { %v1431_v22 = vadd.f32 %v1420_v59, %v1313_v21  ;;  %v1854_v59 = vld [vmem:[%s9024_s8 + $0x90] sm:$0xff]  ;;  %v5439_v21 = vld [vmem:[%s9025_s9 + $0x80] sm:$0xff] }
 0x378   :  { %v1422_v61 = vpop.f32.mrf.mxu0 }
 0x379   :  { %v1432_v25 = vadd.f32 %v1422_v61, %v1314_v17  ;;  %v1853_v61 = vld [vmem:[%s9024_s8 + $0x88] sm:$0xff] }
 0x37a   :  { %v5440_v17 = vld [vmem:[%s9025_s9 + $0x88] sm:$0xff] }
 0x37b   :  { %v1538_v62 = vpop.f32.mrf.mxu1 }
 0x37c   :  { %v1426_v0 = vpop.f32.mrf.mxu0  ;;  %v1549_v36 = vadd.f32 %v1538_v62, %v1431_v22  ;;  %v5428_v62 = vld [vmem:[%s9024_s8 + $0x128] sm:$0xff] }
 0x37d   :  { %v1540_v1 = vpop.f32.mrf.mxu1  ;;  %v1433_v23 = vadd.f32 %v1426_v0, %v1315_v11  ;;  %2011 = vmatpush2.msra.mxu0 %v5428_v62  ;;  %v5427_v0 = vld [vmem:[%s9024_s8 + $0x120] sm:$0xff]  ;;  %v5441_v11 = vld [vmem:[%s9025_s9 + $0x90] sm:$0xff]  ;;  %v5436_v22 = vld [vmem:[%s9025_s9 + $0x68] sm:$0xff] }
 0x37e   :  { %v1428_v5 = vpop.f32.mrf.mxu0  ;;  %v1550_v20 = vadd.f32 %v1540_v1, %v1432_v25  ;;  %2012 = vmatprep.subr.mxu0 %v6309_v6  ;;  %v5437_v25 = vld [vmem:[%s9025_s9 + $0x70] sm:$0xff] }
 0x37f   :  { %v1544_v7 = vpop.f32.mrf.mxu1  ;;  %v1434_v12 = vadd.f32 %v1428_v5, %v1316_v15  ;;  %2013 = vmatpush2.msra.mxu0 %v5427_v0  ;;  %v2031_v15 = vld [vmem:[%s9025_s9 + $0x30] sm:$0xff]  ;;  %v5470_v0 = vld [vmem:[%s9025_s9 + $0x160] sm:$0xff] }
 0x380   :  { %v1551_v26 = vadd.f32 %v1544_v7, %v1433_v23  ;;  %5961 = vmatprep.subr.mxu0 %v6309_v6  ;;  %v2030_v23 = vld [vmem:[%s9025_s9 + $0x28] sm:$0xff]  ;;  %v5472_v62 = vld [vmem:[%s9025_s9 + $0x170] sm:$0xff] }
 0x381   :  { %v1546_v13 = vpop.f32.mrf.mxu1 }
 0x382   :  { %v1552_v31 = vadd.f32 %v1546_v13, %v1434_v12  ;;  %v5438_v13 = vld [vmem:[%s9025_s9 + $0x78] sm:$0xff] }
 0x383   :  { %v2028_v12 = vld [vmem:[%s9025_s9 + $0x18] sm:$0xff] }
 0x38e   :  { %v1656_v19 = vpop.f32.mrf.mxu0 }
 0x38f   :  { %v1667_v34 = vadd.f32 %v1656_v19, %v1549_v36  ;;  %v2032_v19 = vld [vmem:[%s9025_s9 + $0x38] sm:$0xff]  ;;  %v2025_v36 = vld [vmem:[%s9025_s9] sm:$0xff] }
 0x390   :  { %v1658_v24 = vpop.f32.mrf.mxu0 }
 0x391   :  { %v1668_v39 = vadd.f32 %v1658_v24, %v1550_v20  ;;  %v1671_v42 = vmax.f32 %v1667_v34, 0.0  ;;  %v2029_v24 = vld [vmem:[%s9025_s9 + $0x20] sm:$0xff]  ;;  %v2026_v20 = vld [vmem:[%s9025_s9 + $0x8] sm:$0xff] }
 0x392   :  { %v1662_v27 = vpop.f32.mrf.mxu0 }
 0x393   :  { %v1669_v18 = vadd.f32 %v1662_v27, %v1551_v26  ;;  %v1672_v32 = vmax.f32 %v1668_v39, 0.0  ;;  %v2027_v26 = vld [vmem:[%s9025_s9 + $0x10] sm:$0xff]  ;;  %v5435_v27 = vld [vmem:[%s9025_s9 + $0x60] sm:$0xff] }
 0x394   :  { %v1664_v37 = vpop.f32.mrf.mxu0 }
 0x395   :  { %v1670_v16 = vadd.f32 %v1664_v37, %v1552_v31  ;;  %v1673_v14 = vmax.f32 %v1669_v18, 0.0  ;;  %v5434_v31 = vld [vmem:[%s9025_s9 + $0x58] sm:$0xff]  ;;  %v5433_v18 = vld [vmem:[%s9025_s9 + $0x50] sm:$0xff] }
 0x397   :  { %v1674_v41 = vmax.f32 %v1670_v16, 0.0 }
 0x399   :  { %5403 = vmatprep.subr.msk.mxu1 %vm1680_vm6, %v1674_v41 }
 0x39a   :  { %5404 = vmatpush1.msk.msra.mxu1 %vm1680_vm6, %v1673_v14 }
 0x39b   :  { %1717 = vmatprep.subr.mxu1 %v1672_v32 }
 0x39c   :  { %1718 = vmatpush1.msra.mxu1 %v1671_v42 }
 0x39d   :  { %5405 = vmatmul.mubr.msk.f32.vlgmr.msra.gmra.mxu1 %vm1676_vm7, %v1675_v29  ;;  %5407 = vmatprep.subr.msk.mxu1 %vm1680_vm6, %v1674_v41 }
 0x39e   :  { %5408 = vmatpush1.msk.msra.mxu1 %vm1680_vm6, %v1673_v14  ;;  %1827 = vmatprep.mubr.f32.mxu1 %v6309_v6  ;;  %v5453_v14 = vld [vmem:[%s9025_s9 + $0xe8] sm:$0xff] }
 0x39f   :  { %1793 = vmatprep.subr.mxu1 %v1672_v32  ;;  %v5464_v32 = vld [vmem:[%s9025_s9 + $0x138] sm:$0xff] }
 0x3a0   :  { %1794 = vmatpush1.msra.mxu1 %v1671_v42 }
 0x3a1   :  { %5409 = vmatmul.mubr.msk.f32.vlgmr.msra.gmra.mxu1 %vm1676_vm7, %v5406_v45  ;;  %1859 = vmatprep.subr.mxu1 %v6309_v6  ;;  %v5452_v45 = vld [vmem:[%s9025_s9 + $0xe0] sm:$0xff] }
 0x3a2   :  { %1860 = vmatpush1.msra.mxu1 %v1851_v28  ;;  %v5463_v28 = vld [vmem:[%s9025_s9 + $0x130] sm:$0xff] }
 0x3a3   :  { %1861 = vmatprep.subr.mxu1 %v6309_v6 }
 0x3a4   :  { %1862 = vmatpush1.msra.mxu1 %v1850_v44  ;;  %v5451_v44 = vld [vmem:[%s9025_s9 + $0xd8] sm:$0xff] }
 0x3a5   :  { %1863 = vmatprep.subr.mxu1 %v6309_v6 }
 0x3a6   :  { %1864 = vmatpush1.msra.mxu1 %v1849_v38  ;;  %v5462_v38 = vld [vmem:[%s9025_s9 + $0x128] sm:$0xff] }
 0x3a7   :  { %1865 = vmatprep.subr.mxu1 %v6309_v6 }
 0x3a8   :  { %1866 = vmatpush1.msra.mxu1 %v1848_v35  ;;  %v5450_v35 = vld [vmem:[%s9025_s9 + $0xd0] sm:$0xff] }
 0x3a9   :  { %1867 = vmatprep.subr.mxu1 %v6309_v6 }
 0x3aa   :  { %1868 = vmatpush1.msra.mxu1 %v1847_v46  ;;  %v5461_v46 = vld [vmem:[%s9025_s9 + $0x120] sm:$0xff] }
 0x3ab   :  { %1869 = vmatprep.subr.mxu1 %v6309_v6 }
 0x3ac   :  { %1870 = vmatpush1.msra.mxu1 %v1846_v33  ;;  %v5449_v33 = vld [vmem:[%s9025_s9 + $0xc8] sm:$0xff] }
 0x3ad   :  { %1871 = vmatprep.subr.mxu1 %v6309_v6 }
 0x3ae   :  { %1872 = vmatpush1.msra.mxu1 %v1845_v30  ;;  %v5460_v30 = vld [vmem:[%s9025_s9 + $0x118] sm:$0xff] }
 0x3af   :  { %1873 = vmatprep.subr.mxu1 %v6309_v6 }
 0x3b0   :  { %1874 = vmatpush1.msra.mxu1 %v1844_v47  ;;  %v5448_v47 = vld [vmem:[%s9025_s9 + $0xc0] sm:$0xff] }
 0x3b1   :  { %1875 = vmatprep.subr.mxu1 %v6309_v6 }
 0x3b2   :  { %1876 = vmatpush1.msra.mxu1 %v1843_v48  ;;  %v5459_v48 = vld [vmem:[%s9025_s9 + $0x110] sm:$0xff] }
 0x3b3   :  { %1877 = vmatprep.subr.mxu1 %v6309_v6 }
 0x3b4   :  { %1878 = vmatpush1.msra.mxu1 %v1842_v49  ;;  %v5447_v49 = vld [vmem:[%s9025_s9 + $0xb8] sm:$0xff] }
 0x3b5   :  { %1879 = vmatprep.subr.mxu1 %v6309_v6 }
 0x3b6   :  { %1880 = vmatpush1.msra.mxu1 %v1841_v50  ;;  %v5458_v50 = vld [vmem:[%s9025_s9 + $0x108] sm:$0xff] }
 0x3b7   :  { %1881 = vmatprep.subr.mxu1 %v6309_v6 }
 0x3b8   :  { %1882 = vmatpush1.msra.mxu1 %v1840_v51  ;;  %v5446_v51 = vld [vmem:[%s9025_s9 + $0xb0] sm:$0xff] }
 0x3b9   :  { %1883 = vmatprep.subr.mxu1 %v6309_v6 }
 0x3ba   :  { %1884 = vmatpush1.msra.mxu1 %v1839_v52  ;;  %v5457_v52 = vld [vmem:[%s9025_s9 + $0x100] sm:$0xff] }
 0x3bb   :  { %1885 = vmatprep.subr.mxu1 %v6309_v6 }
 0x3bc   :  { %1886 = vmatpush1.msra.mxu1 %v1838_v53  ;;  %v5445_v53 = vld [vmem:[%s9025_s9 + $0xa8] sm:$0xff] }
 0x3bd   :  { %1887 = vmatprep.subr.mxu1 %v6309_v6 }
 0x3be   :  { %1888 = vmatpush1.msra.mxu1 %v1837_v54  ;;  %v5456_v54 = vld [vmem:[%s9025_s9 + $0xf8] sm:$0xff] }
 0x3bf   :  { %1889 = vmatprep.subr.mxu1 %v6309_v6 }
 0x3c0   :  { %1890 = vmatpush1.msra.mxu1 %v1836_v55  ;;  %v5444_v55 = vld [vmem:[%s9025_s9 + $0xa0] sm:$0xff] }
 0x3c1   :  { %1915 = vmatprep.subr.mxu1 %v6309_v6 }
 0x3c2   :  { %1916 = vmatpush2.msra.mxu1 %v1855_v57 }
 0x3c3   :  { %1917 = vmatprep.subr.mxu1 %v6309_v6 }
 0x3c4   :  { %1918 = vmatpush2.msra.mxu1 %v1854_v59  ;;  %v5475_v59 = vld [vmem:[%s9025_s9 + $0x188] sm:$0xff] }
 0x3c5   :  { %1919 = vmatprep.subr.mxu1 %v6309_v6 }
 0x3c6   :  { %1920 = vmatpush2.msra.mxu1 %v1853_v61  ;;  %v5473_v61 = vld [vmem:[%s9025_s9 + $0x178] sm:$0xff] }
 0x3c7   :  { %1921 = vmatprep.subr.mxu1 %v6309_v6 }
 0x3c8   :  { %1922 = vmatpush2.msra.mxu1 %v1852_v63  ;;  %v5471_v63 = vld [vmem:[%s9025_s9 + $0x168] sm:$0xff] }
 0x3c9   :  { %5938 = vmatprep.subr.mxu1 %v6309_v6 }
 0x45d   :  { %v1753_v1 = vpop.f32.mrf.mxu1 }
 0x45f   :  { %v1755_v2 = vpop.f32.mrf.mxu1 }
 0x461   :  { %v1829_v3 = vpop.f32.mrf.mxu1 }
 0x462   :  { %v1834_v7 = vmax.f32 %v1753_v1, %v1829_v3  ;;  %v5469_v1 = vld [vmem:[%s9025_s9 + $0x158] sm:$0xff]  ;;  %v5467_v3 = vld [vmem:[%s9025_s9 + $0x148] sm:$0xff] }
 0x463   :  { %v1831_v4 = vpop.f32.mrf.mxu1 }
 0x464   :  { %v1835_v5 = vmax.f32 %v1755_v2, %v1831_v4  ;;  %v5468_v2 = vld [vmem:[%s9025_s9 + $0x150] sm:$0xff]  ;;  %v5466_v4 = vld [vmem:[%s9025_s9 + $0x140] sm:$0xff] }
 0x466   :  { %5410 = vmatprep.mubr.msk.f32.mxu1 %vm64_vm0, %v1835_v5  ;;  %5431 = vmatprep.mubr.msk.f32.mxu0 %vm64_vm0, %v1835_v5 }
 0x467   :  { %1924 = vmatmul.mubr.f32.vlgmr.msra.gmra.mxu1 %v1834_v7  ;;  %2015 = vmatmul.mubr.f32.vlgmr.msra.gmra.mxu0 %v1834_v7  ;;  %v2469_v7 = vld [vmem:[%s9027_s11 + $0x70] sm:$0xff] }
 0x468   :  { %5939 = vmatpush3.msra.mxu1 %v2034_v8  ;;  %5962 = vmatpush3.msra.mxu0 %v5442_v9  ;;  %v2468_v8 = vld [vmem:[%s9027_s11 + $0x68] sm:$0xff]  ;;  %v2467_v9 = vld [vmem:[%s9027_s11 + $0x60] sm:$0xff] }
 0x469   :  { %5940 = vmatprep.subr.mxu1 %v6309_v6  ;;  %5963 = vmatprep.subr.mxu0 %v6309_v6 }
 0x46a   :  { %5941 = vmatpush3.msra.mxu1 %v2033_v10  ;;  %5964 = vmatpush3.msra.mxu0 %v5441_v11  ;;  %v2466_v10 = vld [vmem:[%s9027_s11 + $0x58] sm:$0xff]  ;;  %v2465_v11 = vld [vmem:[%s9027_s11 + $0x50] sm:$0xff] }
 0x46b   :  { %5942 = vmatprep.subr.mxu1 %v6309_v6  ;;  %5965 = vmatprep.subr.mxu0 %v6309_v6 }
 0x46c   :  { %5943 = vmatpush3.msra.mxu1 %v2032_v19  ;;  %5966 = vmatpush3.msra.mxu0 %v5440_v17  ;;  %v2464_v19 = vld [vmem:[%s9027_s11 + $0x48] sm:$0xff]  ;;  %v2463_v17 = vld [vmem:[%s9027_s11 + $0x40] sm:$0xff] }
 0x46d   :  { %5944 = vmatprep.subr.mxu1 %v6309_v6  ;;  %5967 = vmatprep.subr.mxu0 %v6309_v6 }
 0x46e   :  { %5945 = vmatpush3.msra.mxu1 %v2031_v15  ;;  %5968 = vmatpush3.msra.mxu0 %v5439_v21  ;;  %v2462_v15 = vld [vmem:[%s9027_s11 + $0x38] sm:$0xff]  ;;  %v2461_v21 = vld [vmem:[%s9027_s11 + $0x30] sm:$0xff] }
 0x46f   :  { %5946 = vmatprep.subr.mxu1 %v6309_v6  ;;  %5969 = vmatprep.subr.mxu0 %v6309_v6 }
 0x470   :  { %5947 = vmatpush3.msra.mxu1 %v2030_v23  ;;  %5970 = vmatpush3.msra.mxu0 %v5438_v13  ;;  %v2460_v23 = vld [vmem:[%s9027_s11 + $0x28] sm:$0xff]  ;;  %v2459_v13 = vld [vmem:[%s9027_s11 + $0x20] sm:$0xff] }
 0x471   :  { %5948 = vmatprep.subr.mxu1 %v6309_v6  ;;  %5971 = vmatprep.subr.mxu0 %v6309_v6 }
 0x472   :  { %5949 = vmatpush3.msra.mxu1 %v2029_v24  ;;  %5972 = vmatpush3.msra.mxu0 %v5437_v25  ;;  %v2458_v24 = vld [vmem:[%s9027_s11 + $0x18] sm:$0xff]  ;;  %v2457_v25 = vld [vmem:[%s9027_s11 + $0x10] sm:$0xff] }
 0x473   :  { %5950 = vmatprep.subr.mxu1 %v6309_v6  ;;  %5973 = vmatprep.subr.mxu0 %v6309_v6 }
 0x474   :  { %5951 = vmatpush3.msra.mxu1 %v2028_v12  ;;  %5974 = vmatpush3.msra.mxu0 %v5436_v22  ;;  %v2456_v12 = vld [vmem:[%s9027_s11 + $0x8] sm:$0xff]  ;;  %v2455_v22 = vld [vmem:[%s9027_s11] sm:$0xff] }
 0x475   :  { %5952 = vmatprep.subr.mxu1 %v6309_v6  ;;  %5975 = vmatprep.subr.mxu0 %v6309_v6 }
 0x476   :  { %5953 = vmatpush3.msra.mxu1 %v2027_v26  ;;  %5976 = vmatpush3.msra.mxu0 %v5435_v27  ;;  %v2556_v26 = vld [vmem:[%s9029_s13 + $0x50] sm:$0xf]  ;;  %v2555_v27 = vld [vmem:[%s9029_s13 + $0x48] sm:$0xff] }
 0x477   :  { %5954 = vmatprep.subr.mxu1 %v6309_v6  ;;  %5977 = vmatprep.subr.mxu0 %v6309_v6 }
 0x478   :  { %5955 = vmatpush3.msra.mxu1 %v2026_v20  ;;  %5978 = vmatpush3.msra.mxu0 %v5434_v31  ;;  %v2649_v20 = vld [vmem:[%s9017_s1 + $0x38] sm:$0xff]  ;;  %v2554_v31 = vld [vmem:[%s9029_s13 + $0x40] sm:$0xff] }
 0x479   :  { %5956 = vmatprep.subr.mxu1 %v6309_v6  ;;  %5979 = vmatprep.subr.mxu0 %v6309_v6 }
 0x47a   :  { %5957 = vmatpush3.msra.mxu1 %v2025_v36  ;;  %5980 = vmatpush3.msra.mxu0 %v5433_v18  ;;  %v2553_v36 = vld [vmem:[%s9029_s13 + $0x38] sm:$0xff]  ;;  %v2552_v18 = vld [vmem:[%s9029_s13 + $0x30] sm:$0xff] }
 0x47b   :  { %5958 = vmatprep.mubr.msk.f32.mxu1 %vm6310_vm8, %v6309_v6  ;;  %5981 = vmatprep.mubr.msk.f32.mxu0 %vm6310_vm8, %v6309_v6 }
 0x47c   :  { %5984 = vmatprep.subr.mxu1 %v6309_v6  ;;  %6007 = vmatprep.subr.mxu0 %v6309_v6 }
 0x527   :  { %v1925_v37 = vpop.f32.mrf.mxu1  ;;  %v2016_v39 = vpop.f32.mrf.mxu0 }
 0x528   :  { %v2020_v16 = vmax.f32 %v1925_v37, %v2016_v39  ;;  %v2551_v37 = vld [vmem:[%s9029_s13 + $0x28] sm:$0xff]  ;;  %v2550_v39 = vld [vmem:[%s9029_s13 + $0x20] sm:$0xff] }
 0x529   :  { %v1927_v34 = vpop.f32.mrf.mxu1  ;;  %v2018_v41 = vpop.f32.mrf.mxu0 }
 0x52a   :  { %2022 = vst.msk [vmem:[#allocation3] sm:$0x1f] %vm2021_vm9, %v2020_v16  ;;  %v2549_v16 = vld [vmem:[%s9029_s13 + $0x18] sm:$0xff]  ;;  %v2548_v34 = vld [vmem:[%s9029_s13 + $0x10] sm:$0xff] }
 0x531   :  { %v2024_v42 = vld [vmem:[#allocation3] sm:$0x1]  ;;  %v2110_v29 = vld [vmem:[#allocation3 + $0x1] sm:$0x1]  ;;  %v2196_v57 = vld [vmem:[#allocation3 + $0x2] sm:$0x1] }
 0x532   :  { %5959 = vmatmul.mubr.msk.f32.vlgmr.msra.gmra.mxu1 %vm2035_vm10, %v2024_v42  ;;  %5982 = vmatmul.mubr.msk.f32.vlgmr.msra.gmra.mxu0 %vm2035_vm10, %v2110_v29  ;;  %v2282_v58 = vld [vmem:[#allocation3 + $0x3] sm:$0x1]  ;;  %v2368_v5 = vld [vmem:[#allocation3 + $0x4] sm:$0x1] }
 0x533   :  { %5985 = vmatpush3.msra.mxu1 %v5453_v14  ;;  %6008 = vmatpush3.msra.mxu0 %v5464_v32 }
 0x534   :  { %5986 = vmatprep.subr.mxu1 %v6309_v6  ;;  %6009 = vmatprep.subr.mxu0 %v6309_v6 }
 0x535   :  { %5987 = vmatpush3.msra.mxu1 %v5452_v45  ;;  %6010 = vmatpush3.msra.mxu0 %v5463_v28 }
 0x536   :  { %5988 = vmatprep.subr.mxu1 %v6309_v6  ;;  %6011 = vmatprep.subr.mxu0 %v6309_v6 }
 0x537   :  { %5989 = vmatpush3.msra.mxu1 %v5451_v44  ;;  %6012 = vmatpush3.msra.mxu0 %v5462_v38  ;;  %v2023_v38 = vld [vmem:[%s9026_s10] sm:$0x1] }
 0x538   :  { %5990 = vmatprep.subr.mxu1 %v6309_v6  ;;  %6013 = vmatprep.subr.mxu0 %v6309_v6 }
 0x539   :  { %5991 = vmatpush3.msra.mxu1 %v5450_v35  ;;  %6014 = vmatpush3.msra.mxu0 %v5461_v46 }
 0x53a   :  { %5992 = vmatprep.subr.mxu1 %v6309_v6  ;;  %6015 = vmatprep.subr.mxu0 %v6309_v6 }
 0x53b   :  { %5993 = vmatpush3.msra.mxu1 %v5449_v33  ;;  %6016 = vmatpush3.msra.mxu0 %v5460_v30 }
 0x53c   :  { %5994 = vmatprep.subr.mxu1 %v6309_v6  ;;  %6017 = vmatprep.subr.mxu0 %v6309_v6 }
 0x53d   :  { %5995 = vmatpush3.msra.mxu1 %v5448_v47  ;;  %6018 = vmatpush3.msra.mxu0 %v5459_v48 }
 0x53e   :  { %5996 = vmatprep.subr.mxu1 %v6309_v6  ;;  %6019 = vmatprep.subr.mxu0 %v6309_v6 }
 0x53f   :  { %5997 = vmatpush3.msra.mxu1 %v5447_v49  ;;  %6020 = vmatpush3.msra.mxu0 %v5458_v50 }
 0x540   :  { %5998 = vmatprep.subr.mxu1 %v6309_v6  ;;  %6021 = vmatprep.subr.mxu0 %v6309_v6 }
 0x541   :  { %5999 = vmatpush3.msra.mxu1 %v5446_v51  ;;  %6022 = vmatpush3.msra.mxu0 %v5457_v52  ;;  %v2648_v51 = vld [vmem:[%s9017_s1 + $0x30] sm:$0xff]  ;;  %v2647_v52 = vld [vmem:[%s9017_s1 + $0x28] sm:$0xff] }
 0x542   :  { %6000 = vmatprep.subr.mxu1 %v6309_v6  ;;  %6023 = vmatprep.subr.mxu0 %v6309_v6 }
 0x543   :  { %6001 = vmatpush3.msra.mxu1 %v5445_v53  ;;  %6024 = vmatpush3.msra.mxu0 %v5456_v54  ;;  %v2646_v53 = vld [vmem:[%s9017_s1 + $0x20] sm:$0xff]  ;;  %v2645_v54 = vld [vmem:[%s9017_s1 + $0x18] sm:$0xff] }
 0x544   :  { %6002 = vmatprep.subr.mxu1 %v6309_v6  ;;  %6025 = vmatprep.subr.mxu0 %v6309_v6 }
 0x545   :  { %6003 = vmatpush3.msra.mxu1 %v5444_v55  ;;  %6004 = vmatprep.mubr.msk.f32.mxu1 %vm6310_vm8, %v6309_v6  ;;  %v2644_v55 = vld [vmem:[%s9017_s1 + $0x10] sm:$0xff] }
 0x546   :  { %6026 = vmatpush3.msra.mxu0 %v5455_v56  ;;  %6027 = vmatprep.mubr.msk.f32.mxu0 %vm6310_vm8, %v6309_v6  ;;  %v2643_v56 = vld [vmem:[%s9017_s1 + $0x8] sm:$0xff] }
 0x547   :  { %6005 = vmatmul.mubr.msk.f32.vlgmr.msra.gmra.mxu1 %vm2035_vm10, %v2196_v57  ;;  %6028 = vmatmul.mubr.msk.f32.vlgmr.msra.gmra.mxu0 %vm2035_vm10, %v2282_v58  ;;  %v2642_v57 = vld [vmem:[%s9017_s1] sm:$0xff] }
 0x548   :  { %6030 = vmatprep.subr.mxu1 %v6309_v6  ;;  %6050 = vmatprep.mubr.msk.f32.mxu1 %vm6310_vm8, %v6309_v6  ;;  %v5480_v58 = vld [vmem:[%s9016_s0 + $0x20] sm:$0xff] }
 0x549   :  { %6031 = vmatpush3.msra.mxu1 %v5475_v59  ;;  %6053 = vmatprep.subr.mxu0 %v6309_v6  ;;  %v5481_v59 = vld [vmem:[%s9016_s0 + $0x28] sm:$0xff] }
 0x54a   :  { %6032 = vmatprep.subr.mxu1 %v6309_v6  ;;  %6083 = vmatprep.mubr.msk.f32.mxu0 %vm6310_vm8, %v6309_v6 }
 0x54b   :  { %6033 = vmatpush3.msra.mxu1 %v5474_v60  ;;  %6054 = vmatpush3.msra.mxu0 %v2469_v7  ;;  %v2547_v60 = vld [vmem:[%s9029_s13 + $0x8] sm:$0xff]  ;;  %v5510_v7 = vld [vmem:[%s9017_s1 + $0x90] sm:$0xff] }
 0x54c   :  { %6034 = vmatprep.subr.mxu1 %v6309_v6  ;;  %6055 = vmatprep.subr.mxu0 %v6309_v6 }
 0x54d   :  { %6035 = vmatpush3.msra.mxu1 %v5473_v61  ;;  %6056 = vmatpush3.msra.mxu0 %v2468_v8  ;;  %v2546_v61 = vld [vmem:[%s9029_s13] sm:$0xff]  ;;  %v5509_v8 = vld [vmem:[%s9017_s1 + $0x88] sm:$0xff] }
 0x54e   :  { %6036 = vmatprep.subr.mxu1 %v6309_v6  ;;  %6057 = vmatprep.subr.mxu0 %v6309_v6 }
 0x54f   :  { %6037 = vmatpush3.msra.mxu1 %v5472_v62  ;;  %6058 = vmatpush3.msra.mxu0 %v2467_v9  ;;  %v5482_v62 = vld [vmem:[%s9016_s0 + $0x30] sm:$0xff]  ;;  %v5508_v9 = vld [vmem:[%s9017_s1 + $0x80] sm:$0xff] }
 0x550   :  { %6038 = vmatprep.subr.mxu1 %v6309_v6  ;;  %6059 = vmatprep.subr.mxu0 %v6309_v6 }
 0x551   :  { %6039 = vmatpush3.msra.mxu1 %v5471_v63  ;;  %6060 = vmatpush3.msra.mxu0 %v2466_v10  ;;  %v5499_v63 = vld [vmem:[%s9017_s1 + $0x78] sm:$0xff]  ;;  %v5504_v10 = vld [vmem:[%s9016_s0 + $0x22] sm:$0xff] }
 0x552   :  { %6040 = vmatprep.subr.mxu1 %v6309_v6  ;;  %6061 = vmatprep.subr.mxu0 %v6309_v6 }
 0x553   :  { %6041 = vmatpush3.msra.mxu1 %v5470_v0  ;;  %6062 = vmatpush3.msra.mxu0 %v2465_v11  ;;  %v5515_v0 = vld [vmem:[%s9017_s1 + $0xb8] sm:$0xff]  ;;  %v5505_v11 = vld [vmem:[%s9016_s0 + $0x2a] sm:$0xff] }
 0x554   :  { %6042 = vmatprep.subr.mxu1 %v6309_v6  ;;  %6063 = vmatprep.subr.mxu0 %v6309_v6 }
 0x555   :  { %6043 = vmatpush3.msra.mxu1 %v5469_v1  ;;  %6064 = vmatpush3.msra.mxu0 %v2464_v19  ;;  %v5514_v1 = vld [vmem:[%s9017_s1 + $0xb0] sm:$0xff] }
 0x556   :  { %6044 = vmatprep.subr.mxu1 %v6309_v6  ;;  %6065 = vmatprep.subr.mxu0 %v6309_v6  ;;  %v5506_v19 = vld [vmem:[%s9016_s0 + $0x32] sm:$0xff] }
 0x557   :  { %6045 = vmatpush3.msra.mxu1 %v5468_v2  ;;  %6066 = vmatpush3.msra.mxu0 %v2463_v17  ;;  %v5513_v2 = vld [vmem:[%s9017_s1 + $0xa8] sm:$0xff]  ;;  %v5547_v17 = vld [vmem:[%s9017_s1 + $0x138] sm:$0xff] }
 0x558   :  { %6046 = vmatprep.subr.mxu1 %v6309_v6  ;;  %6067 = vmatprep.subr.mxu0 %v6309_v6 }
 0x559   :  { %6047 = vmatpush3.msra.mxu1 %v5467_v3  ;;  %6068 = vmatpush3.msra.mxu0 %v2462_v15  ;;  %v5512_v3 = vld [vmem:[%s9017_s1 + $0xa0] sm:$0xff]  ;;  %v5546_v15 = vld [vmem:[%s9017_s1 + $0x130] sm:$0xff] }
 0x55a   :  { %6048 = vmatprep.subr.mxu1 %v6309_v6  ;;  %6069 = vmatprep.subr.mxu0 %v6309_v6 }
 0x55b   :  { %6049 = vmatpush3.msra.mxu1 %v5466_v4  ;;  %6070 = vmatpush3.msra.mxu0 %v2461_v21  ;;  %v5483_v4 = vld [vmem:[%s9016_s0 + $0x38] sm:$0xf]  ;;  %v5545_v21 = vld [vmem:[%s9017_s1 + $0x128] sm:$0xff] }
 0x55c   :  { %6051 = vmatmul.mubr.msk.f32.vlgmr.msra.gmra.mxu1 %vm2035_vm10, %v2368_v5  ;;  %6086 = vmatprep.subr.mxu1 %v6309_v6  ;;  %v5511_v5 = vld [vmem:[%s9017_s1 + $0x98] sm:$0xff] }
 0x55d   :  { %6108 = vmatprep.mubr.msk.f32.mxu1 %vm6310_vm8, %v6309_v6  ;;  %6071 = vmatprep.subr.mxu0 %v6309_v6 }
 0x55e   :  { %6072 = vmatpush3.msra.mxu0 %v2460_v23  ;;  %6087 = vmatpush3.msk.msra.mxu1 %vm690_vm1, %v2556_v26  ;;  %v5544_v23 = vld [vmem:[%s9017_s1 + $0x120] sm:$0xff] }
 0x55f   :  { %6073 = vmatprep.subr.mxu0 %v6309_v6  ;;  %6088 = vmatprep.subr.mxu1 %v6309_v6  ;;  %v5536_v26 = vld [vmem:[%s9016_s0 + $0x24] sm:$0xff] }
 0x560   :  { %6074 = vmatpush3.msra.mxu0 %v2459_v13  ;;  %6089 = vmatpush3.msra.mxu1 %v2555_v27  ;;  %v5507_v13 = vld [vmem:[%s9016_s0 + $0x3a] sm:$0xf]  ;;  %v5537_v27 = vld [vmem:[%s9016_s0 + $0x2c] sm:$0xff] }
 0x561   :  { %6075 = vmatprep.subr.mxu0 %v6309_v6  ;;  %6090 = vmatprep.subr.mxu1 %v6309_v6 }
 0x562   :  { %6076 = vmatpush3.msra.mxu0 %v2458_v24  ;;  %6091 = vmatpush3.msra.mxu1 %v2554_v31  ;;  %v5543_v24 = vld [vmem:[%s9017_s1 + $0x118] sm:$0xff] }
 0x563   :  { %6077 = vmatprep.subr.mxu0 %v6309_v6  ;;  %6092 = vmatprep.subr.mxu1 %v6309_v6  ;;  %v5539_v31 = vld [vmem:[%s9016_s0 + $0x3c] sm:$0xf] }
 0x564   :  { %6078 = vmatpush3.msra.mxu0 %v2457_v25  ;;  %6093 = vmatpush3.msra.mxu1 %v2553_v36  ;;  %v5542_v25 = vld [vmem:[%s9017_s1 + $0x110] sm:$0xff]  ;;  %v2470_v36 = vld [vmem:[%s9028_s12] sm:$0x1] }
 0x565   :  { %6079 = vmatprep.subr.mxu0 %v6309_v6  ;;  %6094 = vmatprep.subr.mxu1 %v6309_v6 }
 0x566   :  { %6080 = vmatpush3.msra.mxu0 %v2456_v12  ;;  %6095 = vmatpush3.msra.mxu1 %v2552_v18  ;;  %v5541_v12 = vld [vmem:[%s9017_s1 + $0x108] sm:$0xff] }
 0x567   :  { %6081 = vmatprep.subr.mxu0 %v6309_v6  ;;  %6096 = vmatprep.subr.mxu1 %v6309_v6 }
 0x568   :  { %6082 = vmatpush3.msra.mxu0 %v2455_v22  ;;  %6097 = vmatpush3.msra.mxu1 %v2551_v37  ;;  %v5540_v22 = vld [vmem:[%s9017_s1 + $0x100] sm:$0xff] }
 0x569   :  { %2686 = vmatprep.subr.mxu0 %v2649_v20  ;;  %6098 = vmatprep.subr.mxu1 %v6309_v6  ;;  %v5538_v20 = vld [vmem:[%s9016_s0 + $0x34] sm:$0xff] }
 0x56a   :  { %6099 = vmatpush3.msra.mxu1 %v2550_v39 }
 0x56b   :  { %6100 = vmatprep.subr.mxu1 %v6309_v6 }
 0x56c   :  { %6101 = vmatpush3.msra.mxu1 %v2549_v16 }
 0x56d   :  { %6102 = vmatprep.subr.mxu1 %v6309_v6 }
 0x56e   :  { %6103 = vmatpush3.msra.mxu1 %v2548_v34  ;;  %v5498_v34 = vld [vmem:[%s9017_s1 + $0x70] sm:$0xff] }
 0x56f   :  { %6104 = vmatprep.subr.mxu1 %v6309_v6 }
 0x570   :  { %6105 = vmatpush3.msra.mxu1 %v2547_v60 }
 0x571   :  { %6106 = vmatprep.subr.mxu1 %v6309_v6 }
 0x572   :  { %6107 = vmatpush3.msra.mxu1 %v2546_v61 }
 0x573   :  { %2818 = vmatprep.subr.mxu1 %v5499_v63 }
 0x5f2   :  { %v2105_v41 = vpop.f32.mrf.mxu1  ;;  %v2191_v14 = vpop.f32.mrf.mxu0 }
 0x5f3   :  { %v2109_v35 = vadd.f32 %v2105_v41, %v2023_v38  ;;  %v5497_v41 = vld [vmem:[%s9017_s1 + $0x68] sm:$0xff]  ;;  %v5530_v38 = vld [vmem:[%s9017_s1 + $0xf0] sm:$0xff] }
 0x5f4   :  { %v5960_v32 = vpop.f32.mrf.mxu1  ;;  %v5983_v42 = vpop.f32.mrf.mxu0 }
 0x5f5   :  { %v2195_v46 = vadd.f32 %v2191_v14, %v2109_v35  ;;  %v5496_v14 = vld [vmem:[%s9017_s1 + $0x60] sm:$0xff]  ;;  %v5495_v32 = vld [vmem:[%s9017_s1 + $0x58] sm:$0xff]  ;;  %v5494_v42 = vld [vmem:[%s9017_s1 + $0x50] sm:$0xff] }
 0x5f6   :  { %v5529_v35 = vld [vmem:[%s9017_s1 + $0xe8] sm:$0xff] }
 0x607   :  { %v2277_v29 = vpop.f32.mrf.mxu1  ;;  %v2363_v45 = vpop.f32.mrf.mxu0 }
 0x608   :  { %v2281_v33 = vadd.f32 %v2277_v29, %v2195_v46  ;;  %v5493_v29 = vld [vmem:[%s9017_s1 + $0x48] sm:$0xff]  ;;  %v5528_v46 = vld [vmem:[%s9017_s1 + $0xe0] sm:$0xff] }
 0x609   :  { %v6006_v28 = vpop.f32.mrf.mxu1  ;;  %v6029_v44 = vpop.f32.mrf.mxu0 }
 0x60a   :  { %v2367_v30 = vadd.f32 %v2363_v45, %v2281_v33  ;;  %v5492_v45 = vld [vmem:[%s9017_s1 + $0x40] sm:$0xff]  ;;  %v5531_v44 = vld [vmem:[%s9017_s1 + $0xf8] sm:$0xff]  ;;  %v5489_v33 = vld [vmem:[%s9016_s0 + $0x29] sm:$0xff] }
 0x60b   :  { %v5488_v28 = vld [vmem:[%s9016_s0 + $0x21] sm:$0xff] }
 0x61c   :  { %v2449_v47 = vpop.f32.mrf.mxu1 }
 0x61d   :  { %v2453_v48 = vadd.f32 %v2449_v47, %v2367_v30  ;;  %v5527_v30 = vld [vmem:[%s9017_s1 + $0xd8] sm:$0xff]  ;;  %v5526_v47 = vld [vmem:[%s9017_s1 + $0xd0] sm:$0xff] }
 0x61e   :  { %v6052_v49 = vpop.f32.mrf.mxu1 }
 0x61f   :  { %v2454_v50 = vmax.f32 %v2453_v48, 0.0  ;;  %v5525_v48 = vld [vmem:[%s9017_s1 + $0xc8] sm:$0xff]  ;;  %v5524_v49 = vld [vmem:[%s9017_s1 + $0xc0] sm:$0xff] }
 0x621   :  { %6084 = vmatmul.mubr.msk.f32.vlgmr.msra.gmra.mxu0 %vm2471_vm11, %v2454_v50  ;;  %v5490_v50 = vld [vmem:[%s9016_s0 + $0x31] sm:$0xff] }
 0x622   :  { %2687 = vmatpush1.msra.mxu0 %v2648_v51  ;;  %2726 = vmatprep.mubr.f32.mxu0 %v6309_v6  ;;  %v5491_v51 = vld [vmem:[%s9016_s0 + $0x39] sm:$0xf] }
 0x623   :  { %2688 = vmatprep.subr.mxu0 %v2647_v52  ;;  %v5520_v52 = vld [vmem:[%s9016_s0 + $0x23] sm:$0xff] }
 0x624   :  { %2689 = vmatpush1.msra.mxu0 %v2646_v53  ;;  %v5521_v53 = vld [vmem:[%s9016_s0 + $0x2b] sm:$0xff] }
 0x625   :  { %2690 = vmatprep.subr.mxu0 %v2645_v54  ;;  %v5522_v54 = vld [vmem:[%s9016_s0 + $0x33] sm:$0xff] }
 0x626   :  { %2691 = vmatpush1.msra.mxu0 %v2644_v55  ;;  %v5523_v55 = vld [vmem:[%s9016_s0 + $0x3b] sm:$0xf] }
 0x627   :  { %2692 = vmatprep.subr.mxu0 %v2643_v56 }
 0x628   :  { %2693 = vmatpush1.msra.mxu0 %v2642_v57 }
 0x629   :  { %5484 = vmatmul.mubr.msk.f32.vlgmr.msra.gmra.mxu0 %vm64_vm0, %v5480_v58  ;;  %2939 = vmatprep.subr.mxu0 %v5515_v0 }
 0x62a   :  { %2732 = vmatprep.mubr.f32.mxu0 %v6309_v6  ;;  %2940 = vmatpush1.msra.mxu0 %v5514_v1 }
 0x62b   :  { %2941 = vmatprep.subr.mxu0 %v5513_v2 }
 0x62c   :  { %2942 = vmatpush1.msra.mxu0 %v5512_v3 }
 0x62d   :  { %5485 = vmatmul.mubr.msk.f32.gmra.mxu0 %vm64_vm0, %v5481_v59  ;;  %2943 = vmatprep.subr.mxu0 %v5511_v5  ;;  %v2557_v5 = vld [vmem:[%s9030_s14] sm:$0x1] }
 0x62e   :  { %2738 = vmatprep.mubr.f32.mxu0 %v6309_v6  ;;  %2944 = vmatpush1.msra.mxu0 %v5510_v7 }
 0x62f   :  { %2945 = vmatprep.subr.mxu0 %v5509_v8 }
 0x630   :  { %2946 = vmatpush1.msra.mxu0 %v5508_v9 }
 0x631   :  { %5486 = vmatmul.mubr.msk.f32.gmra.mxu0 %vm64_vm0, %v5482_v62  ;;  %3181 = vmatprep.subr.mxu0 %v5547_v17 }
 0x632   :  { %2744 = vmatprep.mubr.f32.mxu0 %v6309_v6 }
 0x635   :  { %5487 = vmatmul.mubr.msk.f32.gmra.mxu0 %vm64_vm0, %v5483_v4 }
 0x636   :  { %2979 = vmatprep.mubr.f32.mxu0 %v6309_v6 }
 0x639   :  { %5516 = vmatmul.mubr.msk.f32.vlgmr.msra.gmra.mxu0 %vm64_vm0, %v5504_v10 }
 0x63a   :  { %2985 = vmatprep.mubr.f32.mxu0 %v6309_v6  ;;  %3182 = vmatpush1.msra.mxu0 %v5546_v15 }
 0x63b   :  { %3183 = vmatprep.subr.mxu0 %v5545_v21 }
 0x63c   :  { %3184 = vmatpush1.msra.mxu0 %v5544_v23 }
 0x63d   :  { %5517 = vmatmul.mubr.msk.f32.gmra.mxu0 %vm64_vm0, %v5505_v11  ;;  %3185 = vmatprep.subr.mxu0 %v5543_v24 }
 0x63e   :  { %2991 = vmatprep.mubr.f32.mxu0 %v6309_v6  ;;  %3186 = vmatpush1.msra.mxu0 %v5542_v25 }
 0x63f   :  { %3187 = vmatprep.subr.mxu0 %v5541_v12 }
 0x640   :  { %3188 = vmatpush1.msra.mxu0 %v5540_v22 }
 0x641   :  { %5518 = vmatmul.mubr.msk.f32.gmra.mxu0 %vm64_vm0, %v5506_v19 }
 0x642   :  { %2997 = vmatprep.mubr.f32.mxu0 %v6309_v6 }
 0x645   :  { %5519 = vmatmul.mubr.msk.f32.gmra.mxu0 %vm64_vm0, %v5507_v13 }
 0x646   :  { %3221 = vmatprep.mubr.f32.mxu0 %v6309_v6 }
 0x649   :  { %5548 = vmatmul.mubr.msk.f32.vlgmr.msra.gmra.mxu0 %vm64_vm0, %v5536_v26 }
 0x64a   :  { %3227 = vmatprep.mubr.f32.mxu0 %v6309_v6 }
 0x64d   :  { %5549 = vmatmul.mubr.msk.f32.gmra.mxu0 %vm64_vm0, %v5537_v27 }
 0x64e   :  { %3233 = vmatprep.mubr.f32.mxu0 %v6309_v6 }
 0x651   :  { %5550 = vmatmul.mubr.msk.f32.gmra.mxu0 %vm64_vm0, %v5538_v20  ;;  %v2636_v20 = vld [vmem:[%s9018_s2] sm:$0x3]  ;;  %s6311_s2 = smov [#allocation4]  }
 0x652   :  { %3239 = vmatprep.mubr.f32.mxu0 %v6309_v6 }
 0x655   :  { %5551 = vmatmul.mubr.msk.f32.gmra.mxu0 %vm64_vm0, %v5539_v31 }
 0x656   :  { %3425 = vmatprep.mubr.f32.mxu0 %v6309_v6 }
 0x6e1   :  { %v2541_v18 = vpop.f32.mrf.mxu0 }
 0x6e2   :  { %v2542_v37 = vadd.f32 %v2541_v18, %v2470_v36 }
 0x6e3   :  { %v6085_v39 = vpop.f32.mrf.mxu0 }
 0x6e4   :  { %v2545_v16 = vmax.f32 %v2542_v37, 0.0  ;;  %v2755_v37 = vrot.slane %v2636_v20, %v6674_v40  ;;  %v2759_v39 = vrot.slane %v2636_v20, %v6679_v43 }
 0x6e6   :  { %6109 = vmatmul.mubr.msk.f32.vlgmr.msra.gmra.mxu1 %vm1066_vm4, %v2545_v16 }
 0x6e7   :  { %2819 = vmatpush1.msra.mxu1 %v5498_v34  ;;  %2858 = vmatprep.mubr.f32.mxu1 %v6309_v6 }
 0x6e8   :  { %2820 = vmatprep.subr.mxu1 %v5497_v41 }
 0x6e9   :  { %2821 = vmatpush1.msra.mxu1 %v5496_v14  ;;  %v2728_v56 = vpop.f32.mrf.mxu0 }
 0x6ea   :  { %2822 = vmatprep.subr.mxu1 %v5495_v32 }
 0x6eb   :  { %2823 = vmatpush1.msra.mxu1 %v5494_v42  ;;  %v2730_v57 = vpop.f32.mrf.mxu0 }
 0x6ec   :  { %2824 = vmatprep.subr.mxu1 %v5493_v29 }
 0x6ed   :  { %2825 = vmatpush1.msra.mxu1 %v5492_v45  ;;  %v2734_v58 = vpop.f32.mrf.mxu0 }
 0x6ee   :  { %5500 = vmatmul.mubr.msk.f32.vlgmr.msra.gmra.mxu1 %vm64_vm0, %v5488_v28  ;;  %3060 = vmatprep.subr.mxu1 %v5531_v44 }
 0x6ef   :  { %2864 = vmatprep.mubr.f32.mxu1 %v6309_v6  ;;  %3061 = vmatpush1.msra.mxu1 %v5530_v38  ;;  %v2736_v59 = vpop.f32.mrf.mxu0  ;;  %v2764_v38 = vadd.f32 %v2755_v37, %v2734_v58 }
 0x6f0   :  { %3062 = vmatprep.subr.mxu1 %v5529_v35  ;;  %v2765_v29 = vadd.f32 %v2759_v39, %v2736_v59 }
 0x6f1   :  { %3063 = vmatpush1.msra.mxu1 %v5528_v46  ;;  %v2740_v60 = vpop.f32.mrf.mxu0 }
 0x6f2   :  { %5501 = vmatmul.mubr.msk.f32.gmra.mxu1 %vm64_vm0, %v5489_v33  ;;  %3064 = vmatprep.subr.mxu1 %v5527_v30  ;;  %v2766_v32 = vadd.f32 %v2755_v37, %v2740_v60  ;;  %v2763_v30 = vadd.f32 %v2759_v39, %v2730_v57 }
 0x6f3   :  { %2870 = vmatprep.mubr.f32.mxu1 %v6309_v6  ;;  %3065 = vmatpush1.msra.mxu1 %v5526_v47  ;;  %v2742_v61 = vpop.f32.mrf.mxu0 }
 0x6f4   :  { %3066 = vmatprep.subr.mxu1 %v5525_v48  ;;  %v2767_v41 = vadd.f32 %v2759_v39, %v2742_v61 }
 0x6f5   :  { %3067 = vmatpush1.msra.mxu1 %v5524_v49  ;;  %v2746_v62 = vpop.f32.mrf.mxu0  ;;  %v2762_v49 = vadd.f32 %v2755_v37, %v2728_v56 }
 0x6f6   :  { %5502 = vmatmul.mubr.msk.f32.gmra.mxu1 %vm64_vm0, %v5490_v50  ;;  %v2768_v14 = vadd.f32 %v2755_v37, %v2746_v62 }
 0x6f7   :  { %2876 = vmatprep.mubr.f32.mxu1 %v6309_v6  ;;  %v2748_v63 = vpop.f32.mrf.mxu0 }
 0x6f8   :  { %v2769_v45 = vadd.f32 %v2759_v39, %v2748_v63  ;;  %v3457_v39 = vld [vmem:[%s9020_s4 + $0x78] sm:$0xff] }
 0x6f9   :  { %v7921_v0 = vpop.f32.mrf.mxu0 }
 0x6fa   :  { %5503 = vmatmul.mubr.msk.f32.gmra.mxu1 %vm64_vm0, %v5491_v51 }
 0x6fb   :  { %3100 = vmatprep.mubr.f32.mxu1 %v6309_v6  ;;  %v7923_v1 = vpop.f32.mrf.mxu0 }
 0x6fd   :  { %v2987_v2 = vpop.f32.mrf.mxu0 }
 0x6fe   :  { %5532 = vmatmul.mubr.msk.f32.vlgmr.msra.gmra.mxu1 %vm64_vm0, %v5520_v52 }
 0x6ff   :  { %3106 = vmatprep.mubr.f32.mxu1 %v6309_v6  ;;  %v2989_v3 = vpop.f32.mrf.mxu0 }
 0x701   :  { %v2993_v4 = vpop.f32.mrf.mxu0 }
 0x702   :  { %5533 = vmatmul.mubr.msk.f32.gmra.mxu1 %vm64_vm0, %v5521_v53 }
 0x703   :  { %3112 = vmatprep.mubr.f32.mxu1 %v6309_v6  ;;  %v2995_v8 = vpop.f32.mrf.mxu0 }
 0x705   :  { %v2999_v11 = vpop.f32.mrf.mxu0 }
 0x706   :  { %5534 = vmatmul.mubr.msk.f32.gmra.mxu1 %vm64_vm0, %v5522_v54 }
 0x707   :  { %3118 = vmatprep.mubr.f32.mxu1 %v6309_v6  ;;  %v3001_v17 = vpop.f32.mrf.mxu0 }
 0x709   :  { %v7929_v23 = vpop.f32.mrf.mxu0 }
 0x70a   :  { %5535 = vmatmul.mubr.msk.f32.gmra.mxu1 %vm64_vm0, %v5523_v55 }
 0x70b   :  { %3340 = vmatprep.mubr.f32.mxu1 %v6309_v6  ;;  %v3225_v25 = vpop.f32.mrf.mxu0 }
 0x70d   :  { %v3229_v26 = vpop.f32.mrf.mxu0 }
 0x70f   :  { %v3231_v36 = vpop.f32.mrf.mxu0 }
 0x711   :  { %v3235_v34 = vpop.f32.mrf.mxu0 }
 0x713   :  { %v3237_v33 = vpop.f32.mrf.mxu0 }
 0x715   :  { %v3241_v59 = vpop.f32.mrf.mxu0 }
 0x7a6   :  { %v2630_v7 = vpop.f32.mrf.mxu1 }
 0x7a7   :  { %v2631_v9 = vadd.f32 %v2630_v7, %v2557_v5 }
 0x7a8   :  { %v6110_v10 = vpop.f32.mrf.mxu1 }
 0x7a9   :  { %2635 = vst.msk [vmem:[#allocation4] sm:$0x1] %vm2634_vm12, %v2631_v9 }
 0x7ae   :  { %v2860_v19 = vpop.f32.mrf.mxu1 }
 0x7af   :  { %v2883_v55 = vadd.f32 %v2860_v19, %v2762_v49  ;;  %v3449_v49 = vld [vmem:[%s9020_s4 + $0x38] sm:$0xff] }
 0x7b0   :  { %v2862_v15 = vpop.f32.mrf.mxu1 }
 0x7b1   :  { %v2884_v52 = vadd.f32 %v2862_v15, %v2763_v30  ;;  %v5573_v30 = vld [vmem:[%s9020_s4 + $0xf0] sm:$0xff] }
 0x7b2   :  { %v2866_v21 = vpop.f32.mrf.mxu1 }
 0x7b3   :  { %v2885_v50 = vadd.f32 %v2866_v21, %v2764_v38  ;;  %v3005_v57 = vadd.f32 %v7923_v1, %v2884_v52  ;;  %v3004_v21 = vadd.f32 %v7921_v0, %v2883_v55  ;;  %v5575_v38 = vld [vmem:[%s9020_s4 + $0x100] sm:$0xff]  ;;  %v5570_v52 = vld [vmem:[%s9020_s4 + $0xd8] sm:$0xff] }
 0x7b4   :  { %v2868_v13 = vpop.f32.mrf.mxu1  ;;  %v3446_v55 = vld [vmem:[%s9020_s4 + $0x20] sm:$0xff] }
 0x7b5   :  { %v2886_v47 = vadd.f32 %v2868_v13, %v2765_v29  ;;  %v3006_v7 = vadd.f32 %v2987_v2, %v2885_v50  ;;  %v5577_v29 = vld [vmem:[%s9020_s4 + $0x110] sm:$0xff]  ;;  %v5571_v50 = vld [vmem:[%s9020_s4 + $0xe0] sm:$0xff] }
 0x7b6   :  { %v2872_v24 = vpop.f32.mrf.mxu1 }
 0x7b7   :  { %v2887_v35 = vadd.f32 %v2872_v24, %v2766_v32  ;;  %v3007_v62 = vadd.f32 %v2989_v3, %v2886_v47  ;;  %v5578_v32 = vld [vmem:[%s9020_s4 + $0x118] sm:$0xff]  ;;  %v3450_v47 = vld [vmem:[%s9020_s4 + $0x40] sm:$0xff] }
 0x7b8   :  { %v2874_v12 = vpop.f32.mrf.mxu1 }
 0x7b9   :  { %v2888_v28 = vadd.f32 %v2874_v12, %v2767_v41  ;;  %v3008_v60 = vadd.f32 %v2993_v4, %v2887_v35  ;;  %v5557_v41 = vld [vmem:[%s9019_s3 + $0x18] sm:$0x3f]  ;;  %v3452_v35 = vld [vmem:[%s9020_s4 + $0x50] sm:$0xff] }
 0x7ba   :  { %v2878_v22 = vpop.f32.mrf.mxu1 }
 0x7bb   :  { %v2889_v44 = vadd.f32 %v2878_v22, %v2768_v14  ;;  %v3009_v53 = vadd.f32 %v2995_v8, %v2888_v28  ;;  %v3456_v14 = vld [vmem:[%s9020_s4 + $0x70] sm:$0xff]  ;;  %v5576_v28 = vld [vmem:[%s9020_s4 + $0x108] sm:$0xff] }
 0x7bc   :  { %v2880_v27 = vpop.f32.mrf.mxu1 }
 0x7bd   :  { %v2890_v48 = vadd.f32 %v2880_v27, %v2769_v45  ;;  %v3010_v54 = vadd.f32 %v2999_v11, %v2889_v44  ;;  %v3243_v11 = vpop.f32.mrf.mxu0  ;;  %v3454_v45 = vld [vmem:[%s9020_s4 + $0x60] sm:$0xff]  ;;  %v3453_v44 = vld [vmem:[%s9020_s4 + $0x58] sm:$0xff] }
 0x7be   :  { %v3102_v31 = vpop.f32.mrf.mxu1 }
 0x7bf   :  { %v3011_v63 = vadd.f32 %v3001_v17, %v2890_v48  ;;  %v3125_v12 = vadd.f32 %v3102_v31, %v3004_v21  ;;  %v5572_v48 = vld [vmem:[%s9020_s4 + $0xe8] sm:$0xff]  ;;  %v3460_v21 = vld [vmem:[%s9020_s4 + $0x90] sm:$0xff] }
 0x7c0   :  { %v3104_v18 = vpop.f32.mrf.mxu1 }
 0x7c1   :  { %v3126_v19 = vadd.f32 %v3104_v18, %v3005_v57  ;;  %v3246_v0 = vadd.f32 %v7929_v23, %v3125_v12  ;;  %v3262_v23 = vld [vmem:[%s9019_s3] sm:$0xff]  ;;  %v5584_v57 = vld [vmem:[%s9020_s4 + $0x148] sm:$0xff]  ;;  %v5612_v12 = vld [vmem:[%s9021_s5 + $0x158] sm:$0xf] }
 0x7c2   :  { %v3108_v16 = vpop.f32.mrf.mxu1 }
 0x7c3   :  { %v3127_v15 = vadd.f32 %v3108_v16, %v3006_v7  ;;  %v3247_v20 = vadd.f32 %v3225_v25, %v3126_v19  ;;  %v3254_v25 = vmax.f32 %v3246_v0, 0.0  ;;  %v5579_v16 = vld [vmem:[%s9020_s4 + $0x120] sm:$0xff] }
 0x7c4   :  { %v3110_v42 = vpop.f32.mrf.mxu1  ;;  %v3442_v7 = vld [vmem:[%s9020_s4] sm:$0xff] }
 0x7c5   :  { %v3128_v13 = vadd.f32 %v3110_v42, %v3007_v62  ;;  %v3248_v27 = vadd.f32 %v3229_v26, %v3127_v15  ;;  %v3255_v26 = vmax.f32 %v3247_v20, 0.0  ;;  %v3455_v42 = vld [vmem:[%s9020_s4 + $0x68] sm:$0xff]  ;;  %v3444_v62 = vld [vmem:[%s9020_s4 + $0x10] sm:$0xff]  ;;  %v5582_v15 = vld [vmem:[%s9020_s4 + $0x138] sm:$0xff] }
 0x7c6   :  { %v3114_v46 = vpop.f32.mrf.mxu1  ;;  %v3458_v19 = vld [vmem:[%s9020_s4 + $0x80] sm:$0xff] }
 0x7c7   :  { %v3129_v9 = vadd.f32 %v3114_v46, %v3008_v60  ;;  %v3249_v17 = vadd.f32 %v3231_v36, %v3128_v13  ;;  %v3256_v31 = vmax.f32 %v3248_v27, 0.0  ;;  %v5556_v36 = vld [vmem:[%s9019_s3 + $0x10] sm:$0xff]  ;;  %v5574_v46 = vld [vmem:[%s9020_s4 + $0xf8] sm:$0xff]  ;;  %v5568_v60 = vld [vmem:[%s9020_s4 + $0xc8] sm:$0xff] }
 0x7c8   :  { %v3116_v51 = vpop.f32.mrf.mxu1  ;;  %v3461_v13 = vld [vmem:[%s9020_s4 + $0x98] sm:$0xff] }
 0x7c9   :  { %v3130_v5 = vadd.f32 %v3116_v51, %v3009_v53  ;;  %v3250_v3 = vadd.f32 %v3235_v34, %v3129_v9  ;;  %v3257_v18 = vmax.f32 %v3249_v17, 0.0  ;;  %v3263_v34 = vld [vmem:[%s9019_s3 + $0x8] sm:$0x3f]  ;;  %v3448_v51 = vld [vmem:[%s9020_s4 + $0x30] sm:$0xff] }
 0x7ca   :  { %v3120_v61 = vpop.f32.mrf.mxu1  ;;  %v3447_v53 = vld [vmem:[%s9020_s4 + $0x28] sm:$0xff] }
 0x7cb   :  { %v3131_v58 = vadd.f32 %v3120_v61, %v3010_v54  ;;  %v3251_v4 = vadd.f32 %v3237_v33, %v3130_v5  ;;  %v3258_v1 = vmax.f32 %v3250_v3, 0.0  ;;  %v3451_v33 = vld [vmem:[%s9020_s4 + $0x48] sm:$0xff]  ;;  %v5569_v54 = vld [vmem:[%s9020_s4 + $0xd0] sm:$0xff]  ;;  %v3445_v61 = vld [vmem:[%s9020_s4 + $0x18] sm:$0xff] }
 0x7cc   :  { %v3122_v10 = vpop.f32.mrf.mxu1  ;;  %v3443_v5 = vld [vmem:[%s9020_s4 + $0x8] sm:$0xff] }
 0x7cd   :  { %v3132_v56 = vadd.f32 %v3122_v10, %v3011_v63  ;;  %v3252_v8 = vadd.f32 %v3241_v59, %v3131_v58  ;;  %v3259_v37 = vmax.f32 %v3251_v4, 0.0  ;;  %v5567_v59 = vld [vmem:[%s9020_s4 + $0xc0] sm:$0xff]  ;;  %v5566_v63 = vld [vmem:[%s9020_s4 + $0xb8] sm:$0xff]  ;;  %v5565_v58 = vld [vmem:[%s9020_s4 + $0xb0] sm:$0xff] }
 0x7ce   :  { %v5564_v9 = vld [vmem:[%s9020_s4 + $0xa8] sm:$0xff]  ;;  %v3462_v10 = vld [vmem:[%s9020_s4 + $0xa0] sm:$0xff] }
 0x7cf   :  { %v3253_v24 = vadd.f32 %v3243_v11, %v3132_v56  ;;  %v3260_v2 = vmax.f32 %v3252_v8, 0.0  ;;  %v5583_v56 = vld [vmem:[%s9020_s4 + $0x140] sm:$0xff]  ;;  %v3459_v8 = vld [vmem:[%s9020_s4 + $0x88] sm:$0xff]  ;;  %v5581_v11 = vld [vmem:[%s9020_s4 + $0x130] sm:$0xff] }
 0x7d0   :  { %v5580_v4 = vld [vmem:[%s9020_s4 + $0x128] sm:$0xff]  ;;  %s5200_s4 = sshll.u32 %s6311_s2, 4  ;;  %s5201_s4 = int_to_ptr.vmem [resolvable:$true] %s5200_s4 }
 0x7d1   :  { %v3261_v22 = vmax.f32 %v3253_v24, 0.0  ;;  %v3668_v24 = vld [vmem:[%s9021_s5 + $0xa8] sm:$0xf]  ;;  %p6292_p1 = scmp.lt.s32.totalorder %s5201_s4, %s5201_s4 }
 0x7d3   :  { %5552 = vmatprep.subr.msk.mxu1 %vm690_vm1, %v3261_v22  ;;  %5558 = vmatprep.subr.msk.mxu0 %vm690_vm1, %v3261_v22 }
 0x7d4   :  { %5553 = vmatpush1.msk.msra.mxu1 %vm690_vm1, %v3260_v2  ;;  %5559 = vmatpush1.msk.msra.mxu0 %vm690_vm1, %v3260_v2 }
 0x7d5   :  { %3302 = vmatprep.subr.mxu1 %v3259_v37  ;;  %3387 = vmatprep.subr.mxu0 %v3259_v37 }
 0x7d6   :  { %3303 = vmatpush1.msra.mxu1 %v3258_v1  ;;  %3388 = vmatpush1.msra.mxu0 %v3258_v1  ;;  %v3667_v1 = vld [vmem:[%s9021_s5 + $0xa0] sm:$0xf] }
 0x7d7   :  { %3304 = vmatprep.subr.mxu1 %v3257_v18  ;;  %3389 = vmatprep.subr.mxu0 %v3257_v18  ;;  %v5611_v18 = vld [vmem:[%s9021_s5 + $0x150] sm:$0xf] }
 0x7d8   :  { %3305 = vmatpush1.msra.mxu1 %v3256_v31  ;;  %3390 = vmatpush1.msra.mxu0 %v3256_v31  ;;  %v3666_v31 = vld [vmem:[%s9021_s5 + $0x98] sm:$0xff] }
 0x7d9   :  { %3306 = vmatprep.subr.mxu1 %v3255_v26  ;;  %3391 = vmatprep.subr.mxu0 %v3255_v26  ;;  %v5610_v26 = vld [vmem:[%s9021_s5 + $0x148] sm:$0xff] }
 0x7da   :  { %3307 = vmatpush1.msra.mxu1 %v3254_v25  ;;  %3392 = vmatpush1.msra.mxu0 %v3254_v25 }
 0x7db   :  { %5554 = vmatmul.mubr.msk.f32.vlgmr.msra.gmra.mxu1 %vm683_vm2, %v3262_v23  ;;  %5560 = vmatmul.mubr.msk.f32.vlgmr.msra.gmra.mxu0 %vm683_vm2, %v5556_v36 }
 0x7dc   :  { %3346 = vmatprep.mubr.f32.mxu1 %v6309_v6  ;;  %3431 = vmatprep.mubr.f32.mxu0 %v6309_v6 }
 0x7dd   :  { %3469 = vmatprep.subr.mxu1 %v6309_v6  ;;  %3565 = vmatprep.subr.mxu0 %v6309_v6 }
 0x7de   :  { %3470 = vmatpush1.msra.mxu1 %v3457_v39  ;;  %3566 = vmatpush1.msra.mxu0 %v5579_v16  ;;  %v3665_v16 = vld [vmem:[%s9021_s5 + $0x90] sm:$0xff] }
 0x7df   :  { %5555 = vmatmul.mubr.msk.f32.gmra.mxu1 %vm683_vm2, %v3263_v34  ;;  %5561 = vmatmul.mubr.msk.f32.gmra.mxu0 %vm683_vm2, %v5557_v41  ;;  %v5609_v34 = vld [vmem:[%s9021_s5 + $0x140] sm:$0xff]  ;;  %v3664_v41 = vld [vmem:[%s9021_s5 + $0x88] sm:$0xff] }
 0x7e0   :  { %3471 = vmatprep.subr.mxu1 %v6309_v6  ;;  %3567 = vmatprep.subr.mxu0 %v6309_v6 }
 0x7e1   :  { %3472 = vmatpush1.msra.mxu1 %v3456_v14  ;;  %3568 = vmatpush1.msra.mxu0 %v5578_v32  ;;  %v5608_v14 = vld [vmem:[%s9021_s5 + $0x138] sm:$0xff]  ;;  %v3663_v32 = vld [vmem:[%s9021_s5 + $0x80] sm:$0xff] }
 0x7e2   :  { %3473 = vmatprep.subr.mxu1 %v6309_v6  ;;  %3569 = vmatprep.subr.mxu0 %v6309_v6 }
 0x7e3   :  { %3474 = vmatpush1.msra.mxu1 %v3455_v42  ;;  %3570 = vmatpush1.msra.mxu0 %v5577_v29  ;;  %v5607_v42 = vld [vmem:[%s9021_s5 + $0x130] sm:$0xff]  ;;  %v3662_v29 = vld [vmem:[%s9021_s5 + $0x78] sm:$0xff] }
 0x7e4   :  { %3475 = vmatprep.subr.mxu1 %v6309_v6  ;;  %3571 = vmatprep.subr.mxu0 %v6309_v6 }
 0x7e5   :  { %3476 = vmatpush1.msra.mxu1 %v3454_v45  ;;  %3572 = vmatpush1.msra.mxu0 %v5576_v28  ;;  %v5606_v45 = vld [vmem:[%s9021_s5 + $0x128] sm:$0xff]  ;;  %v3661_v28 = vld [vmem:[%s9021_s5 + $0x70] sm:$0xff] }
 0x7e6   :  { %3477 = vmatprep.subr.mxu1 %v6309_v6  ;;  %3573 = vmatprep.subr.mxu0 %v6309_v6 }
 0x7e7   :  { %3478 = vmatpush1.msra.mxu1 %v3453_v44  ;;  %3574 = vmatpush1.msra.mxu0 %v5575_v38  ;;  %v5605_v44 = vld [vmem:[%s9021_s5 + $0x120] sm:$0xff]  ;;  %v3660_v38 = vld [vmem:[%s9021_s5 + $0x68] sm:$0xff] }
 0x7e8   :  { %3479 = vmatprep.subr.mxu1 %v6309_v6  ;;  %3575 = vmatprep.subr.mxu0 %v6309_v6 }
 0x7e9   :  { %3480 = vmatpush1.msra.mxu1 %v3452_v35  ;;  %3576 = vmatpush1.msra.mxu0 %v5574_v46  ;;  %v3659_v35 = vld [vmem:[%s9021_s5 + $0x60] sm:$0xff]  ;;  %v3658_v46 = vld [vmem:[%s9021_s5 + $0x58] sm:$0xff] }
 0x7ea   :  { %3481 = vmatprep.subr.mxu1 %v6309_v6  ;;  %3577 = vmatprep.subr.mxu0 %v6309_v6 }
 0x7eb   :  { %3482 = vmatpush1.msra.mxu1 %v3451_v33  ;;  %3578 = vmatpush1.msra.mxu0 %v5573_v30  ;;  %v3657_v33 = vld [vmem:[%s9021_s5 + $0x50] sm:$0xff]  ;;  %v3656_v30 = vld [vmem:[%s9021_s5 + $0x48] sm:$0xff] }
 0x7ec   :  { %3483 = vmatprep.subr.mxu1 %v6309_v6  ;;  %3579 = vmatprep.subr.mxu0 %v6309_v6 }
 0x7ed   :  { %3484 = vmatpush1.msra.mxu1 %v3450_v47  ;;  %3580 = vmatpush1.msra.mxu0 %v5572_v48  ;;  %v5604_v47 = vld [vmem:[%s9021_s5 + $0x118] sm:$0xff]  ;;  %v3655_v48 = vld [vmem:[%s9021_s5 + $0x40] sm:$0xff] }
 0x7ee   :  { %3485 = vmatprep.subr.mxu1 %v6309_v6  ;;  %3581 = vmatprep.subr.mxu0 %v6309_v6 }
 0x7ef   :  { %3486 = vmatpush1.msra.mxu1 %v3449_v49  ;;  %3582 = vmatpush1.msra.mxu0 %v5571_v50  ;;  %v5603_v49 = vld [vmem:[%s9021_s5 + $0x110] sm:$0xff]  ;;  %v3654_v50 = vld [vmem:[%s9021_s5 + $0x38] sm:$0xff] }
 0x7f0   :  { %3487 = vmatprep.subr.mxu1 %v6309_v6  ;;  %3583 = vmatprep.subr.mxu0 %v6309_v6 }
 0x7f1   :  { %3488 = vmatpush1.msra.mxu1 %v3448_v51  ;;  %3584 = vmatpush1.msra.mxu0 %v5570_v52  ;;  %v5602_v51 = vld [vmem:[%s9021_s5 + $0x108] sm:$0xff]  ;;  %v3653_v52 = vld [vmem:[%s9021_s5 + $0x30] sm:$0xff] }
 0x7f2   :  { %3489 = vmatprep.subr.mxu1 %v6309_v6  ;;  %3585 = vmatprep.subr.mxu0 %v6309_v6 }
 0x7f3   :  { %3490 = vmatpush1.msra.mxu1 %v3447_v53  ;;  %3586 = vmatpush1.msra.mxu0 %v5569_v54  ;;  %v5601_v53 = vld [vmem:[%s9021_s5 + $0x100] sm:$0xff]  ;;  %v3652_v54 = vld [vmem:[%s9021_s5 + $0x28] sm:$0xff] }
 0x7f4   :  { %3491 = vmatprep.subr.mxu1 %v6309_v6  ;;  %3587 = vmatprep.subr.mxu0 %v6309_v6 }
 0x7f5   :  { %3492 = vmatpush1.msra.mxu1 %v3446_v55  ;;  %3588 = vmatpush1.msra.mxu0 %v5568_v60  ;;  %v5600_v55 = vld [vmem:[%s9021_s5 + $0xf8] sm:$0xff]  ;;  %v3651_v60 = vld [vmem:[%s9021_s5 + $0x20] sm:$0xff] }
 0x7f6   :  { %3493 = vmatprep.subr.mxu1 %v6309_v6  ;;  %3589 = vmatprep.subr.mxu0 %v6309_v6 }
 0x7f7   :  { %3494 = vmatpush1.msra.mxu1 %v3445_v61  ;;  %3590 = vmatpush1.msra.mxu0 %v5567_v59  ;;  %v5599_v61 = vld [vmem:[%s9021_s5 + $0xf0] sm:$0xff]  ;;  %v3650_v59 = vld [vmem:[%s9021_s5 + $0x18] sm:$0xff] }
 0x7f8   :  { %3495 = vmatprep.subr.mxu1 %v6309_v6  ;;  %3591 = vmatprep.subr.mxu0 %v6309_v6 }
 0x7f9   :  { %3496 = vmatpush1.msra.mxu1 %v3444_v62  ;;  %3592 = vmatpush1.msra.mxu0 %v5566_v63  ;;  %v5598_v62 = vld [vmem:[%s9021_s5 + $0xe8] sm:$0xff]  ;;  %v3649_v63 = vld [vmem:[%s9021_s5 + $0x10] sm:$0xff] }
 0x7fa   :  { %3497 = vmatprep.subr.mxu1 %v6309_v6  ;;  %3593 = vmatprep.subr.mxu0 %v6309_v6 }
 0x7fb   :  { %3498 = vmatpush1.msra.mxu1 %v3443_v5  ;;  %3594 = vmatpush1.msra.mxu0 %v5565_v58  ;;  %v5597_v5 = vld [vmem:[%s9021_s5 + $0xe0] sm:$0xff]  ;;  %v3648_v58 = vld [vmem:[%s9021_s5 + $0x8] sm:$0xff] }
 0x7fc   :  { %3499 = vmatprep.subr.mxu1 %v6309_v6  ;;  %3595 = vmatprep.subr.mxu0 %v6309_v6 }
 0x7fd   :  { %3500 = vmatpush1.msra.mxu1 %v3442_v7  ;;  %3596 = vmatpush1.msra.mxu0 %v5564_v9  ;;  %v5596_v7 = vld [vmem:[%s9021_s5 + $0xd8] sm:$0xff]  ;;  %v3647_v9 = vld [vmem:[%s9021_s5] sm:$0xff] }
 0x7fe   :  { %3523 = vmatprep.subr.mxu1 %v6309_v6  ;;  %3619 = vmatprep.subr.mxu0 %v6309_v6 }
 0x7ff   :  { %3524 = vmatpush2.msra.mxu1 %v3462_v10  ;;  %3620 = vmatpush2.msra.mxu0 %v5584_v57  ;;  %v5595_v10 = vld [vmem:[%s9021_s5 + $0xd0] sm:$0xff]  ;;  %v5594_v57 = vld [vmem:[%s9021_s5 + $0xc8] sm:$0xff] }
 0x800   :  { %3525 = vmatprep.subr.mxu1 %v6309_v6  ;;  %3621 = vmatprep.subr.mxu0 %v6309_v6 }
 0x801   :  { %3526 = vmatpush2.msra.mxu1 %v3461_v13  ;;  %3622 = vmatpush2.msra.mxu0 %v5583_v56  ;;  %v5638_v13 = vld [vmem:[%s9021_s5 + $0x208] sm:$0xf]  ;;  %v5593_v56 = vld [vmem:[%s9021_s5 + $0xc0] sm:$0xff] }
 0x802   :  { %3527 = vmatprep.subr.mxu1 %v6309_v6  ;;  %3623 = vmatprep.subr.mxu0 %v6309_v6 }
 0x803   :  { %3528 = vmatpush2.msra.mxu1 %v3460_v21  ;;  %3624 = vmatpush2.msra.mxu0 %v5582_v15  ;;  %v5592_v21 = vld [vmem:[%s9021_s5 + $0xb8] sm:$0xff]  ;;  %v5591_v15 = vld [vmem:[%s9021_s5 + $0xb0] sm:$0xff] }
 0x804   :  { %3529 = vmatprep.subr.mxu1 %v6309_v6  ;;  %3625 = vmatprep.subr.mxu0 %v6309_v6 }
 0x805   :  { %3530 = vmatpush2.msra.mxu1 %v3459_v8  ;;  %3626 = vmatpush2.msra.mxu0 %v5581_v11  ;;  %v5664_v8 = vld [vmem:[%s9021_s5 + $0x2b8] sm:$0xf] }
 0x806   :  { %3531 = vmatprep.subr.mxu1 %v6309_v6  ;;  %3627 = vmatprep.subr.mxu0 %v6309_v6 }
 0x807   :  { %3532 = vmatpush2.msra.mxu1 %v3458_v19  ;;  %3628 = vmatpush2.msra.mxu0 %v5580_v4 }
 0x808   :  { %5587 = vmatprep.subr.msk.mxu1 %vm690_vm1, %v3668_v24  ;;  %5613 = vmatprep.subr.msk.mxu0 %vm690_vm1, %v5612_v12 }
 0x89b   :  { %v3342_v3 = vpop.f32.mrf.mxu1  ;;  %v3427_v17 = vpop.f32.mrf.mxu0 }
 0x89c   :  { %v3438_v20 = vmax.f32 %v3342_v3, %v3427_v17 }
 0x89d   :  { %v3344_v22 = vpop.f32.mrf.mxu1  ;;  %v3429_v27 = vpop.f32.mrf.mxu0 }
 0x89e   :  { %v3439_v2 = vmax.f32 %v3344_v22, %v3429_v27 }
 0x89f   :  { %v3348_v37 = vpop.f32.mrf.mxu1  ;;  %v3433_v0 = vpop.f32.mrf.mxu0 }
 0x8a0   :  { %5562 = vmatprep.mubr.msk.f32.mxu1 %vm885_vm3, %v3439_v2  ;;  %5585 = vmatprep.mubr.msk.f32.mxu0 %vm885_vm3, %v3439_v2  ;;  %v3440_v25 = vmax.f32 %v3348_v37, %v3433_v0  ;;  %v5636_v0 = vld [vmem:[%s9021_s5 + $0x1f8] sm:$0xff] }
 0x8a1   :  { %v3350_v23 = vpop.f32.mrf.mxu1  ;;  %v3435_v36 = vpop.f32.mrf.mxu0  ;;  %3534 = vmatmul.mubr.f32.vlgmr.msra.gmra.mxu1 %v3438_v20  ;;  %3630 = vmatmul.mubr.f32.vlgmr.msra.gmra.mxu0 %v3438_v20  ;;  %v5637_v20 = vld [vmem:[%s9021_s5 + $0x200] sm:$0xf] }
 0x8a2   :  { %v3441_v39 = vmax.f32 %v3350_v23, %v3435_v36  ;;  %5588 = vmatpush1.msk.msra.mxu1 %vm690_vm1, %v3667_v1  ;;  %5614 = vmatpush1.msk.msra.mxu0 %vm690_vm1, %v5611_v18  ;;  %v5635_v1 = vld [vmem:[%s9021_s5 + $0x1f0] sm:$0xff]  ;;  %v5634_v18 = vld [vmem:[%s9021_s5 + $0x1e8] sm:$0xff]  ;;  %v5632_v23 = vld [vmem:[%s9021_s5 + $0x1d8] sm:$0xff] }
 0x8a3   :  { %3693 = vmatprep.subr.mxu1 %v3666_v31  ;;  %3821 = vmatprep.subr.mxu0 %v5610_v26  ;;  %v5633_v31 = vld [vmem:[%s9021_s5 + $0x1e0] sm:$0xff]  ;;  %v5663_v26 = vld [vmem:[%s9021_s5 + $0x2b0] sm:$0xf]  ;;  %v5662_v36 = vld [vmem:[%s9021_s5 + $0x2a8] sm:$0xff] }
 0x8a4   :  { %5563 = vmatprep.mubr.msk.f32.mxu1 %vm885_vm3, %v3441_v39  ;;  %5586 = vmatprep.mubr.msk.f32.mxu0 %vm885_vm3, %v3441_v39  ;;  %v5631_v39 = vld [vmem:[%s9021_s5 + $0x1d0] sm:$0xff] }
 0x8a5   :  { %3539 = vmatmul.mubr.f32.gmra.mxu1 %v3440_v25  ;;  %3635 = vmatmul.mubr.f32.gmra.mxu0 %v3440_v25 }
 0x8a6   :  { %3694 = vmatpush1.msra.mxu1 %v3665_v16  ;;  %3822 = vmatpush1.msra.mxu0 %v5609_v34  ;;  %v5661_v16 = vld [vmem:[%s9021_s5 + $0x2a0] sm:$0xff]  ;;  %v5630_v34 = vld [vmem:[%s9021_s5 + $0x1c8] sm:$0xff] }
 0x8a7   :  { %3695 = vmatprep.subr.mxu1 %v3664_v41  ;;  %3823 = vmatprep.subr.mxu0 %v5608_v14  ;;  %v5660_v41 = vld [vmem:[%s9021_s5 + $0x298] sm:$0xff]  ;;  %v5629_v14 = vld [vmem:[%s9021_s5 + $0x1c0] sm:$0xff] }
 0x8a8   :  { %3696 = vmatpush1.msra.mxu1 %v3663_v32  ;;  %3824 = vmatpush1.msra.mxu0 %v5607_v42  ;;  %v5659_v32 = vld [vmem:[%s9021_s5 + $0x290] sm:$0xff]  ;;  %v5628_v42 = vld [vmem:[%s9021_s5 + $0x1b8] sm:$0xff] }
 0x8a9   :  { %3697 = vmatprep.subr.mxu1 %v3662_v29  ;;  %3825 = vmatprep.subr.mxu0 %v5606_v45  ;;  %v5658_v29 = vld [vmem:[%s9021_s5 + $0x288] sm:$0xff]  ;;  %v5627_v45 = vld [vmem:[%s9021_s5 + $0x1b0] sm:$0xff] }
 0x8aa   :  { %3698 = vmatpush1.msra.mxu1 %v3661_v28  ;;  %3826 = vmatpush1.msra.mxu0 %v5605_v44  ;;  %v5657_v28 = vld [vmem:[%s9021_s5 + $0x280] sm:$0xff]  ;;  %v5626_v44 = vld [vmem:[%s9021_s5 + $0x1a8] sm:$0xff] }
 0x8ab   :  { %3699 = vmatprep.subr.mxu1 %v3660_v38  ;;  %3745 = vmatprep.mubr.f32.mxu1 %v6309_v6  ;;  %v5656_v38 = vld [vmem:[%s9021_s5 + $0x278] sm:$0xff] }
 0x8ac   :  { %3700 = vmatpush1.msra.mxu1 %v3659_v35  ;;  %3873 = vmatprep.mubr.f32.mxu0 %v6309_v6  ;;  %v5625_v35 = vld [vmem:[%s9021_s5 + $0x1a0] sm:$0xff] }
 0x8ad   :  { %3701 = vmatprep.subr.mxu1 %v3658_v46  ;;  %3827 = vmatprep.subr.mxu0 %v5604_v47  ;;  %v5655_v46 = vld [vmem:[%s9021_s5 + $0x270] sm:$0xff] }
 0x8ae   :  { %3702 = vmatpush1.msra.mxu1 %v3657_v33  ;;  %3828 = vmatpush1.msra.mxu0 %v5603_v49  ;;  %v5624_v33 = vld [vmem:[%s9021_s5 + $0x198] sm:$0xff]  ;;  %v5623_v47 = vld [vmem:[%s9021_s5 + $0x190] sm:$0xff] }
 0x8af   :  { %3703 = vmatprep.subr.mxu1 %v3656_v30  ;;  %3829 = vmatprep.subr.mxu0 %v5602_v51  ;;  %v5654_v30 = vld [vmem:[%s9021_s5 + $0x268] sm:$0xff]  ;;  %v5652_v51 = vld [vmem:[%s9021_s5 + $0x258] sm:$0xff] }
 0x8b0   :  { %3704 = vmatpush1.msra.mxu1 %v3655_v48  ;;  %3830 = vmatpush1.msra.mxu0 %v5601_v53  ;;  %v5653_v48 = vld [vmem:[%s9021_s5 + $0x260] sm:$0xff]  ;;  %v5651_v53 = vld [vmem:[%s9021_s5 + $0x250] sm:$0xff] }
 0x8b1   :  { %3705 = vmatprep.subr.mxu1 %v3654_v50  ;;  %3831 = vmatprep.subr.mxu0 %v5600_v55  ;;  %v5622_v50 = vld [vmem:[%s9021_s5 + $0x188] sm:$0xff]  ;;  %v5620_v55 = vld [vmem:[%s9021_s5 + $0x178] sm:$0xff] }
 0x8b2   :  { %3706 = vmatpush1.msra.mxu1 %v3653_v52  ;;  %3832 = vmatpush1.msra.mxu0 %v5599_v61  ;;  %v5621_v52 = vld [vmem:[%s9021_s5 + $0x180] sm:$0xff]  ;;  %v5619_v61 = vld [vmem:[%s9021_s5 + $0x170] sm:$0xff] }
 0x8b3   :  { %3707 = vmatprep.subr.mxu1 %v3652_v54  ;;  %3833 = vmatprep.subr.mxu0 %v5598_v62  ;;  %v5618_v62 = vld [vmem:[%s9021_s5 + $0x168] sm:$0xff] }
 0x8b4   :  { %3708 = vmatpush1.msra.mxu1 %v3651_v60  ;;  %3834 = vmatpush1.msra.mxu0 %v5597_v5  ;;  %v5650_v60 = vld [vmem:[%s9021_s5 + $0x248] sm:$0xff]  ;;  %v5617_v5 = vld [vmem:[%s9021_s5 + $0x160] sm:$0xff] }
 0x8b5   :  { %3709 = vmatprep.subr.mxu1 %v3650_v59  ;;  %3835 = vmatprep.subr.mxu0 %v5596_v7  ;;  %v5649_v59 = vld [vmem:[%s9021_s5 + $0x240] sm:$0xff]  ;;  %v5646_v7 = vld [vmem:[%s9021_s5 + $0x228] sm:$0xff] }
 0x8b6   :  { %3710 = vmatpush1.msra.mxu1 %v3649_v63  ;;  %3836 = vmatpush1.msra.mxu0 %v5595_v10  ;;  %v5648_v63 = vld [vmem:[%s9021_s5 + $0x238] sm:$0xff]  ;;  %v5645_v10 = vld [vmem:[%s9021_s5 + $0x220] sm:$0xff] }
 0x8b7   :  { %3711 = vmatprep.subr.mxu1 %v3648_v58  ;;  %3837 = vmatprep.subr.mxu0 %v5594_v57  ;;  %v5647_v58 = vld [vmem:[%s9021_s5 + $0x230] sm:$0xff] }
 0x8b8   :  { %3712 = vmatpush1.msra.mxu1 %v3647_v9  ;;  %3838 = vmatpush1.msra.mxu0 %v5593_v56  ;;  %v5690_v9 = vld [vmem:[%s9021_s5 + $0x368] sm:$0xf]  ;;  %v5644_v56 = vld [vmem:[%s9021_s5 + $0x218] sm:$0xff] }
 0x8b9   :  { %5639 = vmatprep.subr.msk.mxu1 %vm690_vm1, %v5638_v13  ;;  %3839 = vmatprep.subr.mxu0 %v5592_v21  ;;  %v5689_v13 = vld [vmem:[%s9021_s5 + $0x360] sm:$0xf]  ;;  %v5688_v21 = vld [vmem:[%s9021_s5 + $0x358] sm:$0xff] }
 0x8ba   :  { %3840 = vmatpush1.msra.mxu0 %v5591_v15  ;;  %v5643_v15 = vld [vmem:[%s9021_s5 + $0x210] sm:$0xff] }
 0x8bb   :  { %5665 = vmatprep.subr.msk.mxu0 %vm690_vm1, %v5664_v8  ;;  %v5687_v8 = vld [vmem:[%s9021_s5 + $0x350] sm:$0xff] }
 0x961   :  { %v3535_v11 = vpop.f32.mrf.mxu1  ;;  %v3631_v19 = vpop.f32.mrf.mxu0 }
 0x962   :  { %v3640_v4 = vmax.f32 %v3535_v11, %v3631_v19  ;;  %v5686_v11 = vld [vmem:[%s9021_s5 + $0x348] sm:$0xff] }
 0x963   :  { %v3537_v24 = vpop.f32.mrf.mxu1  ;;  %v3633_v12 = vpop.f32.mrf.mxu0 }
 0x964   :  { %3642 = vst.msk [vmem:[#allocation2] sm:$0xff] %vm1066_vm4, %v3640_v4  ;;  %v5685_v4 = vld [vmem:[%s9021_s5 + $0x340] sm:$0xff]  ;;  %v5684_v12 = vld [vmem:[%s9021_s5 + $0x338] sm:$0xff] }
 0x965   :  { %v3540_v3 = vpop.f32.mrf.mxu1  ;;  %v3636_v17 = vpop.f32.mrf.mxu0 }
 0x966   :  { %v3641_v22 = vmax.f32 %v3540_v3, %v3636_v17  ;;  %v5683_v3 = vld [vmem:[%s9021_s5 + $0x330] sm:$0xff]  ;;  %v5682_v17 = vld [vmem:[%s9021_s5 + $0x328] sm:$0xff] }
 0x967   :  { %v3542_v27 = vpop.f32.mrf.mxu1  ;;  %v3638_v2 = vpop.f32.mrf.mxu0 }
 0x968   :  { %3643 = vst.msk [vmem:[#allocation2 + $0x8] sm:$0x3f] %vm1068_vm5, %v3641_v22  ;;  %v5681_v27 = vld [vmem:[%s9021_s5 + $0x320] sm:$0xff]  ;;  %v5680_v2 = vld [vmem:[%s9021_s5 + $0x318] sm:$0xff] }
 0x96b   :  { %v3645_v37 = vld [vmem:[#allocation2] sm:$0xff] }
 0x96c   :  { %5589 = vmatmul.mubr.msk.f32.vlgmr.msra.gmra.mxu1 %vm1066_vm4, %v3645_v37  ;;  %v5678_v37 = vld [vmem:[%s9021_s5 + $0x308] sm:$0xff] }
 0x96d   :  { %5640 = vmatpush1.msk.msra.mxu1 %vm690_vm1, %v5637_v20  ;;  %3751 = vmatprep.mubr.f32.mxu1 %v6309_v6  ;;  %v5679_v20 = vld [vmem:[%s9021_s5 + $0x310] sm:$0xff] }
 0x96e   :  { %3938 = vmatprep.subr.mxu1 %v5636_v0  ;;  %v5677_v0 = vld [vmem:[%s9021_s5 + $0x300] sm:$0xff] }
 0x96f   :  { %3939 = vmatpush1.msra.mxu1 %v5635_v1  ;;  %v3773_v25 = vld [vmem:[#allocation2 + $0x1] sm:$0xff]  ;;  %v3774_v54 = vld [vmem:[#allocation2 + $0x9] sm:$0x3]  ;;  %v4008_v22 = vld [vmem:[#allocation2 + $0xb] sm:$0x3] }
 0x970   :  { %3940 = vmatprep.subr.mxu1 %v5634_v18  ;;  %5615 = vmatmul.mubr.msk.f32.vlgmr.msra.gmra.mxu0 %vm1066_vm4, %v3773_v25  ;;  %v3646_v49 = vld [vmem:[#allocation2 + $0x8] sm:$0x3]  ;;  %v3891_v24 = vld [vmem:[#allocation2 + $0xa] sm:$0x3]  ;;  %v5676_v1 = vld [vmem:[%s9021_s5 + $0x2f8] sm:$0xff] }
 0x971   :  { %3941 = vmatpush1.msra.mxu1 %v5633_v31  ;;  %5666 = vmatpush1.msk.msra.mxu0 %vm690_vm1, %v5663_v26  ;;  %v3890_v57 = vld [vmem:[#allocation2 + $0x2] sm:$0xff]  ;;  %v5675_v18 = vld [vmem:[%s9021_s5 + $0x2f0] sm:$0xff]  ;;  %v5672_v25 = vld [vmem:[%s9021_s5 + $0x2d8] sm:$0xff] }
 0x972   :  { %3942 = vmatprep.subr.mxu1 %v5632_v23  ;;  %4055 = vmatprep.subr.mxu0 %v5662_v36  ;;  %v4007_v19 = vld [vmem:[#allocation2 + $0x3] sm:$0xff]  ;;  %v5671_v23 = vld [vmem:[%s9021_s5 + $0x2d0] sm:$0xff] }
 0x973   :  { %3943 = vmatpush1.msra.mxu1 %v5631_v39  ;;  %4056 = vmatpush1.msra.mxu0 %v5661_v16  ;;  %v5674_v31 = vld [vmem:[%s9021_s5 + $0x2e8] sm:$0xff]  ;;  %v5673_v26 = vld [vmem:[%s9021_s5 + $0x2e0] sm:$0xff] }
 0x974   :  { %3944 = vmatprep.subr.mxu1 %v5630_v34  ;;  %4057 = vmatprep.subr.mxu0 %v5660_v41  ;;  %v5670_v36 = vld [vmem:[%s9021_s5 + $0x2c8] sm:$0xff]  ;;  %v5669_v39 = vld [vmem:[%s9021_s5 + $0x2c0] sm:$0xff]  ;;  %v5718_v41 = vld [vmem:[%s9024_s8 + $0x118] sm:$0xff] }
 0x975   :  { %3945 = vmatpush1.msra.mxu1 %v5629_v14  ;;  %4058 = vmatpush1.msra.mxu0 %v5659_v32  ;;  %v4124_v16 = vld [vmem:[#allocation2 + $0x4] sm:$0xff]  ;;  %v4125_v34 = vld [vmem:[#allocation2 + $0xc] sm:$0x3]  ;;  %v5717_v14 = vld [vmem:[%s9024_s8 + $0x110] sm:$0xff] }
 0x976   :  { %3946 = vmatprep.subr.mxu1 %v5628_v42  ;;  %4059 = vmatprep.subr.mxu0 %v5658_v29  ;;  %v5716_v32 = vld [vmem:[%s9024_s8 + $0x108] sm:$0xff]  ;;  %v5715_v42 = vld [vmem:[%s9024_s8 + $0x100] sm:$0xff]  ;;  %v5714_v29 = vld [vmem:[%s9024_s8 + $0xf8] sm:$0xff] }
 0x977   :  { %3947 = vmatpush1.msra.mxu1 %v5627_v45  ;;  %4060 = vmatpush1.msra.mxu0 %v5657_v28  ;;  %v5713_v45 = vld [vmem:[%s9024_s8 + $0xf0] sm:$0xff]  ;;  %v5712_v28 = vld [vmem:[%s9024_s8 + $0xe8] sm:$0xff] }
 0x978   :  { %3948 = vmatprep.subr.mxu1 %v5626_v44  ;;  %4061 = vmatprep.subr.mxu0 %v5656_v38  ;;  %v5711_v44 = vld [vmem:[%s9024_s8 + $0xe0] sm:$0xff]  ;;  %v5710_v38 = vld [vmem:[%s9024_s8 + $0xd8] sm:$0xff] }
 0x979   :  { %3949 = vmatpush1.msra.mxu1 %v5625_v35  ;;  %4062 = vmatpush1.msra.mxu0 %v5655_v46  ;;  %v5709_v35 = vld [vmem:[%s9024_s8 + $0xd0] sm:$0xff]  ;;  %v5708_v46 = vld [vmem:[%s9024_s8 + $0xc8] sm:$0xff] }
 0x97a   :  { %3950 = vmatprep.subr.mxu1 %v5624_v33  ;;  %4063 = vmatprep.subr.mxu0 %v5654_v30  ;;  %v5707_v33 = vld [vmem:[%s9024_s8 + $0xc0] sm:$0xff]  ;;  %v5706_v30 = vld [vmem:[%s9024_s8 + $0xb8] sm:$0xff] }
 0x97b   :  { %3951 = vmatpush1.msra.mxu1 %v5623_v47  ;;  %4064 = vmatpush1.msra.mxu0 %v5653_v48  ;;  %v5705_v47 = vld [vmem:[%s9024_s8 + $0xb0] sm:$0xff]  ;;  %v5704_v48 = vld [vmem:[%s9024_s8 + $0xa8] sm:$0xff] }
 0x97c   :  { %5590 = vmatmul.mubr.msk.f32.gmra.mxu1 %vm1066_vm4, %v3646_v49  ;;  %3952 = vmatprep.subr.mxu1 %v5622_v50 }
 0x97d   :  { %4065 = vmatprep.subr.mxu0 %v5652_v51  ;;  %3879 = vmatprep.mubr.f32.mxu0 %v6309_v6 }
 0x97e   :  { %3953 = vmatpush1.msra.mxu1 %v5621_v52  ;;  %4066 = vmatpush1.msra.mxu0 %v5651_v53 }
 0x97f   :  { %5616 = vmatmul.mubr.msk.f32.gmra.mxu0 %vm1066_vm4, %v3774_v54  ;;  %3954 = vmatprep.subr.mxu1 %v5620_v55 }
 0x980   :  { %4067 = vmatprep.subr.mxu0 %v5650_v60  ;;  %3955 = vmatpush1.msra.mxu1 %v5619_v61 }
 0x981   :  { %4068 = vmatpush1.msra.mxu0 %v5649_v59  ;;  %3956 = vmatprep.subr.mxu1 %v5618_v62 }
 0x982   :  { %4069 = vmatprep.subr.mxu0 %v5648_v63  ;;  %3957 = vmatpush1.msra.mxu1 %v5617_v5  ;;  %v3644_v63 = vld [vmem:[%s9022_s6] sm:$0x3] }
 0x983   :  { %3990 = vmatprep.mubr.f32.mxu1 %v6309_v6  ;;  %4070 = vmatpush1.msra.mxu0 %v5647_v58  ;;  %v3762_v5 = vrot.slane %v3644_v63, %v6674_v40 }
 0x984   :  { %5641 = vmatmul.mubr.msk.f32.vlgmr.msra.gmra.mxu1 %vm1066_vm4, %v3890_v57  ;;  %4071 = vmatprep.subr.mxu0 %v5646_v7 }
 0x985   :  { %5691 = vmatprep.subr.msk.mxu1 %vm690_vm1, %v5690_v9  ;;  %4072 = vmatpush1.msra.mxu0 %v5645_v10  ;;  %v3766_v9 = vrot.slane %v3644_v63, %v6679_v43 }
 0x986   :  { %5692 = vmatpush1.msk.msra.mxu1 %vm690_vm1, %v5689_v13  ;;  %4073 = vmatprep.subr.mxu0 %v5644_v56 }
 0x987   :  { %4172 = vmatprep.subr.mxu1 %v5688_v21  ;;  %3996 = vmatprep.mubr.f32.mxu1 %v6309_v6 }
 0x988   :  { %4074 = vmatpush1.msra.mxu0 %v5643_v15  ;;  %4107 = vmatprep.mubr.f32.mxu0 %v6309_v6 }
 0x989   :  { %4173 = vmatpush1.msra.mxu1 %v5687_v8  ;;  %5667 = vmatmul.mubr.msk.f32.vlgmr.msra.gmra.mxu0 %vm1066_vm4, %v4007_v19 }
 0x98a   :  { %5642 = vmatmul.mubr.msk.f32.gmra.mxu1 %vm1066_vm4, %v3891_v24  ;;  %4174 = vmatprep.subr.mxu1 %v5686_v11 }
 0x98b   :  { %4175 = vmatpush1.msra.mxu1 %v5685_v4  ;;  %4113 = vmatprep.mubr.f32.mxu0 %v6309_v6 }
 0x98c   :  { %4176 = vmatprep.subr.mxu1 %v5684_v12  ;;  %4224 = vmatprep.mubr.f32.mxu1 %v6309_v6 }
 0x98d   :  { %4177 = vmatpush1.msra.mxu1 %v5683_v3  ;;  %5668 = vmatmul.mubr.msk.f32.gmra.mxu0 %vm1066_vm4, %v4008_v22 }
 0x98e   :  { %4178 = vmatprep.subr.mxu1 %v5682_v17  ;;  %4319 = vmatprep.mubr.f32.mxu0 %v6309_v6 }
 0x98f   :  { %4179 = vmatpush1.msra.mxu1 %v5681_v27 }
 0x990   :  { %4180 = vmatprep.subr.mxu1 %v5680_v2 }
 0x991   :  { %4181 = vmatpush1.msra.mxu1 %v5679_v20 }
 0x992   :  { %4182 = vmatprep.subr.mxu1 %v5678_v37 }
 0x993   :  { %4183 = vmatpush1.msra.mxu1 %v5677_v0 }
 0x994   :  { %4184 = vmatprep.subr.mxu1 %v5676_v1 }
 0x995   :  { %4185 = vmatpush1.msra.mxu1 %v5675_v18 }
 0x996   :  { %4186 = vmatprep.subr.mxu1 %v5674_v31 }
 0x997   :  { %4187 = vmatpush1.msra.mxu1 %v5673_v26 }
 0x998   :  { %4188 = vmatprep.subr.mxu1 %v5672_v25 }
 0x999   :  { %4189 = vmatpush1.msra.mxu1 %v5671_v23 }
 0x99a   :  { %4190 = vmatprep.subr.mxu1 %v5670_v36 }
 0x99b   :  { %4191 = vmatpush1.msra.mxu1 %v5669_v39 }
 0x99c   :  { %5693 = vmatmul.mubr.msk.f32.vlgmr.msra.gmra.mxu1 %vm1066_vm4, %v4124_v16  ;;  %4516 = vmatprep.subr.mxu1 %v6309_v6 }
 0x99d   :  { %4230 = vmatprep.mubr.f32.mxu1 %v6309_v6  ;;  %4517 = vmatpush1.msra.mxu1 %v5718_v41  ;;  %v5698_v41 = vld [vmem:[%s9023_s7 + $0x8] sm:$0x1f] }
 0x99e   :  { %4518 = vmatprep.subr.mxu1 %v6309_v6 }
 0x99f   :  { %4519 = vmatpush1.msra.mxu1 %v5717_v14  ;;  %v4418_v14 = vld [vmem:[%s9024_s8 + $0x78] sm:$0xff] }
 0x9a0   :  { %5694 = vmatmul.mubr.msk.f32.gmra.mxu1 %vm1066_vm4, %v4125_v34  ;;  %4520 = vmatprep.subr.mxu1 %v6309_v6  ;;  %v4245_v34 = vld [vmem:[%s9023_s7] sm:$0x1f] }
 0x9a1   :  { %4521 = vmatpush1.msra.mxu1 %v5716_v32  ;;  %v4417_v32 = vld [vmem:[%s9024_s8 + $0x70] sm:$0xff] }
 0x9a2   :  { %4522 = vmatprep.subr.mxu1 %v6309_v6 }
 0x9a3   :  { %4523 = vmatpush1.msra.mxu1 %v5715_v42  ;;  %v4416_v42 = vld [vmem:[%s9024_s8 + $0x68] sm:$0xff] }
 0x9a4   :  { %4524 = vmatprep.subr.mxu1 %v6309_v6 }
 0x9a5   :  { %4525 = vmatpush1.msra.mxu1 %v5714_v29  ;;  %v4415_v29 = vld [vmem:[%s9024_s8 + $0x60] sm:$0xff] }
 0x9a6   :  { %4526 = vmatprep.subr.mxu1 %v6309_v6 }
 0x9a7   :  { %4527 = vmatpush1.msra.mxu1 %v5713_v45  ;;  %v4414_v45 = vld [vmem:[%s9024_s8 + $0x58] sm:$0xff] }
 0x9a8   :  { %4528 = vmatprep.subr.mxu1 %v6309_v6 }
 0x9a9   :  { %4529 = vmatpush1.msra.mxu1 %v5712_v28  ;;  %v4413_v28 = vld [vmem:[%s9024_s8 + $0x50] sm:$0xff] }
 0x9aa   :  { %4530 = vmatprep.subr.mxu1 %v6309_v6 }
 0x9ab   :  { %4531 = vmatpush1.msra.mxu1 %v5711_v44  ;;  %v4412_v44 = vld [vmem:[%s9024_s8 + $0x48] sm:$0xff] }
 0x9ac   :  { %4532 = vmatprep.subr.mxu1 %v6309_v6 }
 0x9ad   :  { %4533 = vmatpush1.msra.mxu1 %v5710_v38  ;;  %v4411_v38 = vld [vmem:[%s9024_s8 + $0x40] sm:$0xff] }
 0x9ae   :  { %4534 = vmatprep.subr.mxu1 %v6309_v6 }
 0x9af   :  { %4535 = vmatpush1.msra.mxu1 %v5709_v35  ;;  %v4410_v35 = vld [vmem:[%s9024_s8 + $0x38] sm:$0xff] }
 0x9b0   :  { %4536 = vmatprep.subr.mxu1 %v6309_v6 }
 0x9b1   :  { %4537 = vmatpush1.msra.mxu1 %v5708_v46  ;;  %v4409_v46 = vld [vmem:[%s9024_s8 + $0x30] sm:$0xff] }
 0x9b2   :  { %4538 = vmatprep.subr.mxu1 %v6309_v6 }
 0x9b3   :  { %4539 = vmatpush1.msra.mxu1 %v5707_v33  ;;  %v4408_v33 = vld [vmem:[%s9024_s8 + $0x28] sm:$0xff] }
 0x9b4   :  { %4540 = vmatprep.subr.mxu1 %v6309_v6 }
 0x9b5   :  { %4541 = vmatpush1.msra.mxu1 %v5706_v30  ;;  %v4407_v30 = vld [vmem:[%s9024_s8 + $0x20] sm:$0xff] }
 0x9b6   :  { %4542 = vmatprep.subr.mxu1 %v6309_v6 }
 0x9b7   :  { %4543 = vmatpush1.msra.mxu1 %v5705_v47  ;;  %v4406_v47 = vld [vmem:[%s9024_s8 + $0x18] sm:$0xff] }
 0x9b8   :  { %4544 = vmatprep.subr.mxu1 %v6309_v6 }
 0x9b9   :  { %4545 = vmatpush1.msra.mxu1 %v5704_v48  ;;  %v4405_v48 = vld [vmem:[%s9024_s8 + $0x10] sm:$0xff] }
 0x9ba   :  { %4546 = vmatprep.subr.mxu1 %v6309_v6 }
 0xa2c   :  { %v3747_v49 = vpop.f32.mrf.mxu1 }
 0xa2d   :  { %v3769_v15 = vadd.f32 %v3762_v5, %v3747_v49  ;;  %v4404_v49 = vld [vmem:[%s9024_s8 + $0x8] sm:$0xff] }
 0xa2e   :  { %v3749_v50 = vpop.f32.mrf.mxu1 }
 0xa2f   :  { %v3770_v21 = vadd.f32 %v3766_v9, %v3749_v50  ;;  %v4403_v50 = vld [vmem:[%s9024_s8] sm:$0xff] }
 0xa30   :  { %v3875_v51 = vpop.f32.mrf.mxu0 }
 0xa31   :  { %v3886_v24 = vadd.f32 %v3875_v51, %v3769_v15  ;;  %v5703_v51 = vld [vmem:[%s9024_s8 + $0xa0] sm:$0xff]  ;;  %v4597_v15 = vld [vmem:[%s9025_s9 + $0x38] sm:$0xff] }
 0xa32   :  { %v3877_v53 = vpop.f32.mrf.mxu0  ;;  %4547 = vmatpush1.msra.mxu1 %v5703_v51 }
 0xa33   :  { %v3887_v19 = vadd.f32 %v3877_v53, %v3770_v21  ;;  %4572 = vmatprep.subr.mxu1 %v6309_v6  ;;  %v5722_v53 = vld [vmem:[%s9024_s8 + $0x138] sm:$0xff]  ;;  %v5733_v21 = vld [vmem:[%s9025_s9 + $0x90] sm:$0xff] }
 0xa34   :  { %4573 = vmatpush2.msra.mxu1 %v5722_v53  ;;  %v5766_v53 = vld [vmem:[%s9025_s9 + $0x180] sm:$0xff] }
 0xa35   :  { %4574 = vmatprep.subr.mxu1 %v6309_v6 }
 0xa3c   :  { %v3753_v52 = vpop.f32.mrf.mxu1 }
 0xa3d   :  { %v3771_v10 = vadd.f32 %v3762_v5, %v3753_v52  ;;  %v4422_v52 = vld [vmem:[%s9024_s8 + $0x98] sm:$0xff] }
 0xa3e   :  { %v3755_v54 = vpop.f32.mrf.mxu1 }
 0xa3f   :  { %v3881_v55 = vpop.f32.mrf.mxu0  ;;  %v3772_v57 = vadd.f32 %v3766_v9, %v3755_v54  ;;  %v4421_v54 = vld [vmem:[%s9024_s8 + $0x90] sm:$0xff] }
 0xa40   :  { %v3888_v8 = vadd.f32 %v3881_v55, %v3771_v10  ;;  %v5721_v55 = vld [vmem:[%s9024_s8 + $0x130] sm:$0xff] }
 0xa41   :  { %v3883_v61 = vpop.f32.mrf.mxu0  ;;  %4575 = vmatpush2.msra.mxu1 %v5721_v55  ;;  %v5764_v55 = vld [vmem:[%s9025_s9 + $0x170] sm:$0xff] }
 0xa42   :  { %v3889_v4 = vadd.f32 %v3883_v61, %v3772_v57  ;;  %4576 = vmatprep.subr.mxu1 %v6309_v6  ;;  %v5720_v61 = vld [vmem:[%s9024_s8 + $0x128] sm:$0xff] }
 0xa43   :  { %4577 = vmatpush2.msra.mxu1 %v5720_v61  ;;  %v4599_v57 = vld [vmem:[%s9025_s9 + $0x48] sm:$0xff]  ;;  %v5762_v61 = vld [vmem:[%s9025_s9 + $0x160] sm:$0xff] }
 0xa44   :  { %v3992_v60 = vpop.f32.mrf.mxu1  ;;  %4578 = vmatprep.subr.mxu1 %v6309_v6 }
 0xa45   :  { %v4003_v27 = vadd.f32 %v3992_v60, %v3886_v24  ;;  %v4420_v60 = vld [vmem:[%s9024_s8 + $0x88] sm:$0xff]  ;;  %v5730_v24 = vld [vmem:[%s9025_s9 + $0x78] sm:$0xff] }
 0xa46   :  { %v3994_v59 = vpop.f32.mrf.mxu1 }
 0xa47   :  { %v4004_v22 = vadd.f32 %v3994_v59, %v3887_v19  ;;  %v4419_v59 = vld [vmem:[%s9024_s8 + $0x80] sm:$0xff] }
 0xa48   :  { %v5731_v19 = vld [vmem:[%s9025_s9 + $0x80] sm:$0xff] }
 0xa49   :  { %v4109_v62 = vpop.f32.mrf.mxu0 }
 0xa4a   :  { %v3998_v58 = vpop.f32.mrf.mxu1  ;;  %v4120_v0 = vadd.f32 %v4109_v62, %v4003_v27  ;;  %v5719_v62 = vld [vmem:[%s9024_s8 + $0x120] sm:$0xff] }
 0xa4b   :  { %v4111_v7 = vpop.f32.mrf.mxu0  ;;  %v4005_v12 = vadd.f32 %v3998_v58, %v3888_v8  ;;  %4579 = vmatpush2.msra.mxu1 %v5719_v62  ;;  %v5732_v8 = vld [vmem:[%s9025_s9 + $0x88] sm:$0xff]  ;;  %v5727_v27 = vld [vmem:[%s9025_s9 + $0x60] sm:$0xff]  ;;  %v5760_v62 = vld [vmem:[%s9025_s9 + $0x150] sm:$0xff] }
 0xa4c   :  { %v4000_v13 = vpop.f32.mrf.mxu1  ;;  %v4121_v43 = vadd.f32 %v4111_v7, %v4004_v22  ;;  %6134 = vmatprep.subr.mxu1 %v6309_v6  ;;  %v5728_v22 = vld [vmem:[%s9025_s9 + $0x68] sm:$0xff] }
 0xa4d   :  { %v4115_v56 = vpop.f32.mrf.mxu0  ;;  %v4006_v40 = vadd.f32 %v4000_v13, %v3889_v4  ;;  %v5734_v13 = vld [vmem:[%s9025_s9 + $0x98] sm:$0xff]  ;;  %v4595_v4 = vld [vmem:[%s9025_s9 + $0x28] sm:$0xff] }
 0xa4e   :  { %v4122_v2 = vadd.f32 %v4115_v56, %v4005_v12  ;;  %v4598_v56 = vld [vmem:[%s9025_s9 + $0x40] sm:$0xff] }
 0xa4f   :  { %v4117_v3 = vpop.f32.mrf.mxu0  ;;  %v4594_v12 = vld [vmem:[%s9025_s9 + $0x20] sm:$0xff] }
 0xa50   :  { %v4123_v37 = vadd.f32 %v4117_v3, %v4006_v40  ;;  %v5729_v3 = vld [vmem:[%s9025_s9 + $0x70] sm:$0xff] }
 0xa51   :  { %v4592_v40 = vld [vmem:[%s9025_s9 + $0x10] sm:$0xff] }
 0xa5c   :  { %v4226_v11 = vpop.f32.mrf.mxu1 }
 0xa5d   :  { %v4237_v25 = vadd.f32 %v4226_v11, %v4120_v0  ;;  %v4596_v11 = vld [vmem:[%s9025_s9 + $0x30] sm:$0xff] }
 0xa5e   :  { %v4228_v17 = vpop.f32.mrf.mxu1 }
 0xa5f   :  { %v4238_v31 = vadd.f32 %v4228_v17, %v4121_v43  ;;  %v4241_v16 = vmax.f32 %v4237_v25, 0.0  ;;  %v4593_v17 = vld [vmem:[%s9025_s9 + $0x18] sm:$0xff]  ;;  %v4590_v43 = vld [vmem:[%s9025_s9] sm:$0xff]  ;;  %v5745_v25 = vld [vmem:[%s9025_s9 + $0xe8] sm:$0xff] }
 0xa60   :  { %v4232_v20 = vpop.f32.mrf.mxu1 }
 0xa61   :  { %v4239_v1 = vadd.f32 %v4232_v20, %v4122_v2  ;;  %v4242_v39 = vmax.f32 %v4238_v31, 0.0  ;;  %v4591_v2 = vld [vmem:[%s9025_s9 + $0x8] sm:$0xff]  ;;  %v5726_v20 = vld [vmem:[%s9025_s9 + $0x58] sm:$0xff] }
 0xa62   :  { %v4234_v18 = vpop.f32.mrf.mxu1 }
 0xa63   :  { %v4240_v26 = vadd.f32 %v4234_v18, %v4123_v37  ;;  %v4243_v36 = vmax.f32 %v4239_v1, 0.0  ;;  %v5725_v37 = vld [vmem:[%s9025_s9 + $0x50] sm:$0xff] }
 0xa65   :  { %v4244_v23 = vmax.f32 %v4240_v26, 0.0 }
 0xa67   :  { %5695 = vmatprep.subr.msk.mxu0 %vm1680_vm6, %v4244_v23 }
 0xa68   :  { %5696 = vmatpush1.msk.msra.mxu0 %vm1680_vm6, %v4243_v36 }
 0xa69   :  { %4285 = vmatprep.subr.mxu0 %v4242_v39 }
 0xa6a   :  { %4286 = vmatpush1.msra.mxu0 %v4241_v16 }
 0xa6b   :  { %5697 = vmatmul.mubr.msk.f32.vlgmr.msra.gmra.mxu0 %vm1676_vm7, %v4245_v34  ;;  %5699 = vmatprep.subr.msk.mxu0 %vm1680_vm6, %v4244_v23  ;;  %v5756_v23 = vld [vmem:[%s9025_s9 + $0x138] sm:$0xff]  ;;  %v5755_v34 = vld [vmem:[%s9025_s9 + $0x130] sm:$0xff] }
 0xa6c   :  { %5700 = vmatpush1.msk.msra.mxu0 %vm1680_vm6, %v4243_v36  ;;  %4394 = vmatprep.mubr.f32.mxu0 %v6309_v6 }
 0xa6d   :  { %4360 = vmatprep.subr.mxu0 %v4242_v39 }
 0xa6e   :  { %4361 = vmatpush1.msra.mxu0 %v4241_v16  ;;  %v5744_v16 = vld [vmem:[%s9025_s9 + $0xe0] sm:$0xff] }
 0xa6f   :  { %5701 = vmatmul.mubr.msk.f32.vlgmr.msra.gmra.mxu0 %vm1676_vm7, %v5698_v41  ;;  %4426 = vmatprep.subr.mxu0 %v6309_v6  ;;  %v5743_v41 = vld [vmem:[%s9025_s9 + $0xd8] sm:$0xff] }
 0xa70   :  { %4427 = vmatpush1.msra.mxu0 %v4418_v14  ;;  %v5754_v14 = vld [vmem:[%s9025_s9 + $0x128] sm:$0xff] }
 0xa71   :  { %4428 = vmatprep.subr.mxu0 %v6309_v6 }
 0xa72   :  { %4429 = vmatpush1.msra.mxu0 %v4417_v32  ;;  %v5742_v32 = vld [vmem:[%s9025_s9 + $0xd0] sm:$0xff] }
 0xa73   :  { %4430 = vmatprep.subr.mxu0 %v6309_v6 }
 0xa74   :  { %4431 = vmatpush1.msra.mxu0 %v4416_v42  ;;  %v5753_v42 = vld [vmem:[%s9025_s9 + $0x120] sm:$0xff] }
 0xa75   :  { %4432 = vmatprep.subr.mxu0 %v6309_v6 }
 0xa76   :  { %4433 = vmatpush1.msra.mxu0 %v4415_v29  ;;  %v5741_v29 = vld [vmem:[%s9025_s9 + $0xc8] sm:$0xff] }
 0xa77   :  { %4434 = vmatprep.subr.mxu0 %v6309_v6 }
 0xa78   :  { %4435 = vmatpush1.msra.mxu0 %v4414_v45  ;;  %v5752_v45 = vld [vmem:[%s9025_s9 + $0x118] sm:$0xff] }
 0xa79   :  { %4436 = vmatprep.subr.mxu0 %v6309_v6 }
 0xa7a   :  { %4437 = vmatpush1.msra.mxu0 %v4413_v28  ;;  %v5740_v28 = vld [vmem:[%s9025_s9 + $0xc0] sm:$0xff] }
 0xa7b   :  { %4438 = vmatprep.subr.mxu0 %v6309_v6 }
 0xa7c   :  { %4439 = vmatpush1.msra.mxu0 %v4412_v44  ;;  %v5751_v44 = vld [vmem:[%s9025_s9 + $0x110] sm:$0xff] }
 0xa7d   :  { %4440 = vmatprep.subr.mxu0 %v6309_v6 }
 0xa7e   :  { %4441 = vmatpush1.msra.mxu0 %v4411_v38  ;;  %v5739_v38 = vld [vmem:[%s9025_s9 + $0xb8] sm:$0xff] }
 0xa7f   :  { %4442 = vmatprep.subr.mxu0 %v6309_v6 }
 0xa80   :  { %4443 = vmatpush1.msra.mxu0 %v4410_v35  ;;  %v5750_v35 = vld [vmem:[%s9025_s9 + $0x108] sm:$0xff] }
 0xa81   :  { %4444 = vmatprep.subr.mxu0 %v6309_v6 }
 0xa82   :  { %4445 = vmatpush1.msra.mxu0 %v4409_v46  ;;  %v5738_v46 = vld [vmem:[%s9025_s9 + $0xb0] sm:$0xff] }
 0xa83   :  { %4446 = vmatprep.subr.mxu0 %v6309_v6 }
 0xa84   :  { %4447 = vmatpush1.msra.mxu0 %v4408_v33  ;;  %v5749_v33 = vld [vmem:[%s9025_s9 + $0x100] sm:$0xff] }
 0xa85   :  { %4448 = vmatprep.subr.mxu0 %v6309_v6 }
 0xa86   :  { %4449 = vmatpush1.msra.mxu0 %v4407_v30  ;;  %v5737_v30 = vld [vmem:[%s9025_s9 + $0xa8] sm:$0xff] }
 0xa87   :  { %4450 = vmatprep.subr.mxu0 %v6309_v6 }
 0xa88   :  { %4451 = vmatpush1.msra.mxu0 %v4406_v47  ;;  %v5748_v47 = vld [vmem:[%s9025_s9 + $0xf8] sm:$0xff] }
 0xa89   :  { %4452 = vmatprep.subr.mxu0 %v6309_v6 }
 0xa8a   :  { %4453 = vmatpush1.msra.mxu0 %v4405_v48  ;;  %v5736_v48 = vld [vmem:[%s9025_s9 + $0xa0] sm:$0xff] }
 0xa8b   :  { %4454 = vmatprep.subr.mxu0 %v6309_v6 }
 0xa8c   :  { %4455 = vmatpush1.msra.mxu0 %v4404_v49  ;;  %v5747_v49 = vld [vmem:[%s9025_s9 + $0xf0] sm:$0xff] }
 0xa8d   :  { %4456 = vmatprep.subr.mxu0 %v6309_v6 }
 0xa8e   :  { %4457 = vmatpush1.msra.mxu0 %v4403_v50 }
 0xa8f   :  { %4482 = vmatprep.subr.mxu0 %v6309_v6 }
 0xa90   :  { %4483 = vmatpush2.msra.mxu0 %v4422_v52  ;;  %v5767_v52 = vld [vmem:[%s9025_s9 + $0x188] sm:$0xff] }
 0xa91   :  { %4484 = vmatprep.subr.mxu0 %v6309_v6 }
 0xa92   :  { %4485 = vmatpush2.msra.mxu0 %v4421_v54  ;;  %v5765_v54 = vld [vmem:[%s9025_s9 + $0x178] sm:$0xff] }
 0xa93   :  { %4486 = vmatprep.subr.mxu0 %v6309_v6 }
 0xa94   :  { %4487 = vmatpush2.msra.mxu0 %v4420_v60  ;;  %v5763_v60 = vld [vmem:[%s9025_s9 + $0x168] sm:$0xff] }
 0xa95   :  { %4488 = vmatprep.subr.mxu0 %v6309_v6 }
 0xa96   :  { %4489 = vmatpush2.msra.mxu0 %v4419_v59  ;;  %v5761_v59 = vld [vmem:[%s9025_s9 + $0x158] sm:$0xff] }
 0xa97   :  { %6111 = vmatprep.subr.mxu0 %v6309_v6 }
 0xb2b   :  { %v4321_v63 = vpop.f32.mrf.mxu0 }
 0xb2d   :  { %v4323_v5 = vpop.f32.mrf.mxu0 }
 0xb2f   :  { %v4396_v58 = vpop.f32.mrf.mxu0 }
 0xb30   :  { %v4401_v10 = vmax.f32 %v4321_v63, %v4396_v58  ;;  %v5759_v63 = vld [vmem:[%s9025_s9 + $0x148] sm:$0xff] }
 0xb31   :  { %v4398_v7 = vpop.f32.mrf.mxu0 }
 0xb32   :  { %v4402_v9 = vmax.f32 %v4323_v5, %v4398_v7  ;;  %v5758_v5 = vld [vmem:[%s9025_s9 + $0x140] sm:$0xff]  ;;  %v5029_v7 = vld [vmem:[%s9027_s11 + $0x70] sm:$0xff] }
 0xb34   :  { %5702 = vmatprep.mubr.msk.f32.mxu0 %vm64_vm0, %v4402_v9  ;;  %5723 = vmatprep.mubr.msk.f32.mxu1 %vm64_vm0, %v4402_v9  ;;  %v5028_v9 = vld [vmem:[%s9027_s11 + $0x68] sm:$0xff] }
 0xb35   :  { %4491 = vmatmul.mubr.f32.vlgmr.msra.gmra.mxu0 %v4401_v10  ;;  %4581 = vmatmul.mubr.f32.vlgmr.msra.gmra.mxu1 %v4401_v10  ;;  %v5027_v10 = vld [vmem:[%s9027_s11 + $0x60] sm:$0xff] }
 0xb36   :  { %6112 = vmatpush3.msra.mxu0 %v4599_v57  ;;  %6135 = vmatpush3.msra.mxu1 %v5734_v13  ;;  %v5026_v57 = vld [vmem:[%s9027_s11 + $0x58] sm:$0xff]  ;;  %v5025_v13 = vld [vmem:[%s9027_s11 + $0x50] sm:$0xff] }
 0xb37   :  { %6113 = vmatprep.subr.mxu0 %v6309_v6  ;;  %6136 = vmatprep.subr.mxu1 %v6309_v6 }
 0xb38   :  { %6114 = vmatpush3.msra.mxu0 %v4598_v56  ;;  %6137 = vmatpush3.msra.mxu1 %v5733_v21  ;;  %v5024_v56 = vld [vmem:[%s9027_s11 + $0x48] sm:$0xff]  ;;  %v5023_v21 = vld [vmem:[%s9027_s11 + $0x40] sm:$0xff] }
 0xb39   :  { %6115 = vmatprep.subr.mxu0 %v6309_v6  ;;  %6138 = vmatprep.subr.mxu1 %v6309_v6 }
 0xb3a   :  { %6116 = vmatpush3.msra.mxu0 %v4597_v15  ;;  %6139 = vmatpush3.msra.mxu1 %v5732_v8  ;;  %v5022_v15 = vld [vmem:[%s9027_s11 + $0x38] sm:$0xff]  ;;  %v5021_v8 = vld [vmem:[%s9027_s11 + $0x30] sm:$0xff] }
 0xb3b   :  { %6117 = vmatprep.subr.mxu0 %v6309_v6  ;;  %6140 = vmatprep.subr.mxu1 %v6309_v6 }
 0xb3c   :  { %6118 = vmatpush3.msra.mxu0 %v4596_v11  ;;  %6141 = vmatpush3.msra.mxu1 %v5731_v19  ;;  %v5020_v11 = vld [vmem:[%s9027_s11 + $0x28] sm:$0xff]  ;;  %v5019_v19 = vld [vmem:[%s9027_s11 + $0x20] sm:$0xff] }
 0xb3d   :  { %6119 = vmatprep.subr.mxu0 %v6309_v6  ;;  %6142 = vmatprep.subr.mxu1 %v6309_v6 }
 0xb3e   :  { %6120 = vmatpush3.msra.mxu0 %v4595_v4  ;;  %6143 = vmatpush3.msra.mxu1 %v5730_v24  ;;  %v5018_v4 = vld [vmem:[%s9027_s11 + $0x18] sm:$0xff]  ;;  %v5017_v24 = vld [vmem:[%s9027_s11 + $0x10] sm:$0xff] }
 0xb3f   :  { %6121 = vmatprep.subr.mxu0 %v6309_v6  ;;  %6144 = vmatprep.subr.mxu1 %v6309_v6 }
 0xb40   :  { %6131 = vmatprep.mubr.msk.f32.mxu0 %vm6310_vm8, %v6309_v6  ;;  %6154 = vmatprep.mubr.msk.f32.mxu1 %vm6310_vm8, %v6309_v6 }
 0xb41   :  { %6122 = vmatpush3.msra.mxu0 %v4594_v12  ;;  %6145 = vmatpush3.msra.mxu1 %v5729_v3  ;;  %v5016_v12 = vld [vmem:[%s9027_s11 + $0x8] sm:$0xff]  ;;  %v5015_v3 = vld [vmem:[%s9027_s11] sm:$0xff] }
 0xb42   :  { %6123 = vmatprep.subr.mxu0 %v6309_v6  ;;  %6146 = vmatprep.subr.mxu1 %v6309_v6 }
 0xb43   :  { %6124 = vmatpush3.msra.mxu0 %v4593_v17  ;;  %6147 = vmatpush3.msra.mxu1 %v5728_v22  ;;  %v5115_v17 = vld [vmem:[%s9029_s13 + $0x50] sm:$0xf]  ;;  %v5114_v22 = vld [vmem:[%s9029_s13 + $0x48] sm:$0xff] }
 0xb44   :  { %6125 = vmatprep.subr.mxu0 %v6309_v6  ;;  %6148 = vmatprep.subr.mxu1 %v6309_v6 }
 0xb45   :  { %6126 = vmatpush3.msra.mxu0 %v4592_v40  ;;  %6149 = vmatpush3.msra.mxu1 %v5727_v27  ;;  %v5113_v40 = vld [vmem:[%s9029_s13 + $0x40] sm:$0xff]  ;;  %v5112_v27 = vld [vmem:[%s9029_s13 + $0x38] sm:$0xff] }
 0xb46   :  { %6127 = vmatprep.subr.mxu0 %v6309_v6  ;;  %6150 = vmatprep.subr.mxu1 %v6309_v6 }
 0xb47   :  { %6128 = vmatpush3.msra.mxu0 %v4591_v2  ;;  %6151 = vmatpush3.msra.mxu1 %v5726_v20  ;;  %v5111_v2 = vld [vmem:[%s9029_s13 + $0x30] sm:$0xff]  ;;  %v5110_v20 = vld [vmem:[%s9029_s13 + $0x28] sm:$0xff] }
 0xb48   :  { %6129 = vmatprep.subr.mxu0 %v6309_v6  ;;  %6152 = vmatprep.subr.mxu1 %v6309_v6 }
 0xb49   :  { %6130 = vmatpush3.msra.mxu0 %v4590_v43  ;;  %6153 = vmatpush3.msra.mxu1 %v5725_v37  ;;  %v5109_v43 = vld [vmem:[%s9029_s13 + $0x20] sm:$0xff]  ;;  %v5108_v37 = vld [vmem:[%s9029_s13 + $0x18] sm:$0xff] }
 0xb4a   :  { %6157 = vmatprep.subr.mxu0 %v6309_v6  ;;  %6180 = vmatprep.subr.mxu1 %v6309_v6 }
 0xbf5   :  { %v4492_v0 = vpop.f32.mrf.mxu0  ;;  %v4582_v1 = vpop.f32.mrf.mxu1 }
 0xbf6   :  { %v4586_v18 = vmax.f32 %v4492_v0, %v4582_v1 }
 0xbf7   :  { %v4494_v31 = vpop.f32.mrf.mxu0  ;;  %v4584_v26 = vpop.f32.mrf.mxu1 }
 0xbf8   :  { %4587 = vst.msk [vmem:[#allocation3] sm:$0x1f] %vm2021_vm9, %v4586_v18 }
 0xbff   :  { %v4589_v36 = vld [vmem:[#allocation3] sm:$0x1]  ;;  %v4674_v39 = vld [vmem:[#allocation3 + $0x1] sm:$0x1]  ;;  %v4759_v50 = vld [vmem:[#allocation3 + $0x2] sm:$0x1] }
 0xc00   :  { %6132 = vmatmul.mubr.msk.f32.vlgmr.msra.gmra.mxu0 %vm2035_vm10, %v4589_v36  ;;  %6155 = vmatmul.mubr.msk.f32.vlgmr.msra.gmra.mxu1 %vm2035_vm10, %v4674_v39  ;;  %v4844_v51 = vld [vmem:[#allocation3 + $0x3] sm:$0x1]  ;;  %v4929_v58 = vld [vmem:[#allocation3 + $0x4] sm:$0x1]  ;;  %v4588_v39 = vld [vmem:[%s9026_s10] sm:$0x1] }
 0xc01   :  { %6158 = vmatpush3.msra.mxu0 %v5745_v25  ;;  %6181 = vmatpush3.msra.mxu1 %v5756_v23 }
 0xc02   :  { %6159 = vmatprep.subr.mxu0 %v6309_v6  ;;  %6182 = vmatprep.subr.mxu1 %v6309_v6 }
 0xc03   :  { %6160 = vmatpush3.msra.mxu0 %v5744_v16  ;;  %6183 = vmatpush3.msra.mxu1 %v5755_v34 }
 0xc04   :  { %6161 = vmatprep.subr.mxu0 %v6309_v6  ;;  %6184 = vmatprep.subr.mxu1 %v6309_v6 }
 0xc05   :  { %6162 = vmatpush3.msra.mxu0 %v5743_v41  ;;  %6185 = vmatpush3.msra.mxu1 %v5754_v14 }
 0xc06   :  { %6163 = vmatprep.subr.mxu0 %v6309_v6  ;;  %6186 = vmatprep.subr.mxu1 %v6309_v6 }
 0xc07   :  { %6164 = vmatpush3.msra.mxu0 %v5742_v32  ;;  %6187 = vmatpush3.msra.mxu1 %v5753_v42 }
 0xc08   :  { %6165 = vmatprep.subr.mxu0 %v6309_v6  ;;  %6188 = vmatprep.subr.mxu1 %v6309_v6 }
 0xc09   :  { %6166 = vmatpush3.msra.mxu0 %v5741_v29  ;;  %6189 = vmatpush3.msra.mxu1 %v5752_v45 }
 0xc0a   :  { %6167 = vmatprep.subr.mxu0 %v6309_v6  ;;  %6190 = vmatprep.subr.mxu1 %v6309_v6 }
 0xc0b   :  { %6168 = vmatpush3.msra.mxu0 %v5740_v28  ;;  %6191 = vmatpush3.msra.mxu1 %v5751_v44  ;;  %v5107_v28 = vld [vmem:[%s9029_s13 + $0x10] sm:$0xff]  ;;  %v5106_v44 = vld [vmem:[%s9029_s13 + $0x8] sm:$0xff] }
 0xc0c   :  { %6169 = vmatprep.subr.mxu0 %v6309_v6  ;;  %6192 = vmatprep.subr.mxu1 %v6309_v6 }
 0xc0d   :  { %6170 = vmatpush3.msra.mxu0 %v5739_v38  ;;  %6193 = vmatpush3.msra.mxu1 %v5750_v35  ;;  %v5105_v38 = vld [vmem:[%s9029_s13] sm:$0xff]  ;;  %s6287_s13 = scalar_lea.vmem %s5201_s4, 32 }
 0xc0e   :  { %6171 = vmatprep.subr.mxu0 %v6309_v6  ;;  %6194 = vmatprep.subr.mxu1 %v6309_v6  ;;  %v5030_v35 = vld [vmem:[%s9028_s12] sm:$0x1]  ;;  %p6288_p0 = scmp.ne.s32.totalorder %s5201_s4, %s6287_s13  ;;  %p6293_p2 = scmp.lt.s32.totalorder %s6287_s13, %s6287_s13 }
 0xc0f   :  { %6172 = vmatpush3.msra.mxu0 %v5738_v46  ;;  %6195 = vmatpush3.msra.mxu1 %v5749_v33 }
 0xc10   :  { %6173 = vmatprep.subr.mxu0 %v6309_v6  ;;  %6196 = vmatprep.subr.mxu1 %v6309_v6  ;;  %p6294_p3 = por %p6293_p2, %p6292_p1 }
 0xc11   :  { %6174 = vmatpush3.msra.mxu0 %v5737_v30  ;;  %6197 = vmatpush3.msra.mxu1 %v5748_v47 }
 0xc12   :  { %6175 = vmatprep.subr.mxu0 %v6309_v6  ;;  %6198 = vmatprep.subr.mxu1 %v6309_v6  ;;  %p6295_p4 = pnand %p6294_p3, %p6288_p0 }
 0xc13   :  { %6176 = vmatpush3.msra.mxu0 %v5736_v48  ;;  %6177 = vmatprep.mubr.msk.f32.mxu0 %vm6310_vm8, %v6309_v6  ;;  %v5116_v48 = vld [vmem:[%s9030_s14] sm:$0x1] }
 0xc14   :  { %6199 = vmatpush3.msra.mxu1 %v5747_v49  ;;  %6200 = vmatprep.mubr.msk.f32.mxu1 %vm6310_vm8, %v6309_v6 }
 0xc15   :  { %6178 = vmatmul.mubr.msk.f32.vlgmr.msra.gmra.mxu0 %vm2035_vm10, %v4759_v50  ;;  %6201 = vmatmul.mubr.msk.f32.vlgmr.msra.gmra.mxu1 %vm2035_vm10, %v4844_v51 }
 0xc16   :  { %6203 = vmatprep.subr.mxu0 %v6309_v6  ;;  %6223 = vmatprep.mubr.msk.f32.mxu0 %vm6310_vm8, %v6309_v6 }
 0xc17   :  { %6204 = vmatpush3.msra.mxu0 %v5767_v52  ;;  %6226 = vmatprep.subr.mxu1 %v6309_v6 }
 0xc18   :  { %6205 = vmatprep.subr.mxu0 %v6309_v6  ;;  %6256 = vmatprep.mubr.msk.f32.mxu1 %vm6310_vm8, %v6309_v6 }
 0xc19   :  { %6206 = vmatpush3.msra.mxu0 %v5766_v53  ;;  %6227 = vmatpush3.msra.mxu1 %v5029_v7 }
 0xc1a   :  { %6207 = vmatprep.subr.mxu0 %v6309_v6  ;;  %6228 = vmatprep.subr.mxu1 %v6309_v6 }
 0xc1b   :  { %6208 = vmatpush3.msra.mxu0 %v5765_v54  ;;  %6229 = vmatpush3.msra.mxu1 %v5028_v9 }
 0xc1c   :  { %6209 = vmatprep.subr.mxu0 %v6309_v6  ;;  %6230 = vmatprep.subr.mxu1 %v6309_v6 }
 0xc1d   :  { %6210 = vmatpush3.msra.mxu0 %v5764_v55  ;;  %6231 = vmatpush3.msra.mxu1 %v5027_v10 }
 0xc1e   :  { %6211 = vmatprep.subr.mxu0 %v6309_v6  ;;  %6232 = vmatprep.subr.mxu1 %v6309_v6 }
 0xc1f   :  { %6212 = vmatpush3.msra.mxu0 %v5763_v60  ;;  %6233 = vmatpush3.msra.mxu1 %v5026_v57 }
 0xc20   :  { %6213 = vmatprep.subr.mxu0 %v6309_v6  ;;  %6234 = vmatprep.subr.mxu1 %v6309_v6 }
 0xc21   :  { %6214 = vmatpush3.msra.mxu0 %v5762_v61  ;;  %6235 = vmatpush3.msra.mxu1 %v5025_v13 }
 0xc22   :  { %6215 = vmatprep.subr.mxu0 %v6309_v6  ;;  %6236 = vmatprep.subr.mxu1 %v6309_v6 }
 0xc23   :  { %6216 = vmatpush3.msra.mxu0 %v5761_v59  ;;  %6237 = vmatpush3.msra.mxu1 %v5024_v56 }
 0xc24   :  { %6217 = vmatprep.subr.mxu0 %v6309_v6  ;;  %6238 = vmatprep.subr.mxu1 %v6309_v6 }
 0xc25   :  { %6218 = vmatpush3.msra.mxu0 %v5760_v62  ;;  %6239 = vmatpush3.msra.mxu1 %v5023_v21 }
 0xc26   :  { %6219 = vmatprep.subr.mxu0 %v6309_v6  ;;  %6240 = vmatprep.subr.mxu1 %v6309_v6 }
 0xc27   :  { %6220 = vmatpush3.msra.mxu0 %v5759_v63  ;;  %6241 = vmatpush3.msra.mxu1 %v5022_v15 }
 0xc28   :  { %6221 = vmatprep.subr.mxu0 %v6309_v6  ;;  %6242 = vmatprep.subr.mxu1 %v6309_v6 }
 0xc29   :  { %6222 = vmatpush3.msra.mxu0 %v5758_v5  ;;  %6243 = vmatpush3.msra.mxu1 %v5021_v8 }
 0xc2a   :  { %6224 = vmatmul.mubr.msk.f32.vlgmr.msra.gmra.mxu0 %vm2035_vm10, %v4929_v58  ;;  %6259 = vmatprep.subr.mxu0 %v6309_v6 }
 0xc2b   :  { %6281 = vmatprep.mubr.msk.f32.mxu0 %vm6310_vm8, %v6309_v6  ;;  %6244 = vmatprep.subr.mxu1 %v6309_v6 }
 0xc2c   :  { %6245 = vmatpush3.msra.mxu1 %v5020_v11  ;;  %6260 = vmatpush3.msk.msra.mxu0 %vm690_vm1, %v5115_v17 }
 0xc2d   :  { %6246 = vmatprep.subr.mxu1 %v6309_v6  ;;  %6261 = vmatprep.subr.mxu0 %v6309_v6 }
 0xc2e   :  { %6247 = vmatpush3.msra.mxu1 %v5019_v19  ;;  %6262 = vmatpush3.msra.mxu0 %v5114_v22 }
 0xc2f   :  { %6248 = vmatprep.subr.mxu1 %v6309_v6  ;;  %6263 = vmatprep.subr.mxu0 %v6309_v6 }
 0xc30   :  { %6249 = vmatpush3.msra.mxu1 %v5018_v4  ;;  %6264 = vmatpush3.msra.mxu0 %v5113_v40 }
 0xc31   :  { %6250 = vmatprep.subr.mxu1 %v6309_v6  ;;  %6265 = vmatprep.subr.mxu0 %v6309_v6 }
 0xc32   :  { %6251 = vmatpush3.msra.mxu1 %v5017_v24  ;;  %6266 = vmatpush3.msra.mxu0 %v5112_v27 }
 0xc33   :  { %6252 = vmatprep.subr.mxu1 %v6309_v6  ;;  %6267 = vmatprep.subr.mxu0 %v6309_v6 }
 0xc34   :  { %6253 = vmatpush3.msra.mxu1 %v5016_v12  ;;  %6268 = vmatpush3.msra.mxu0 %v5111_v2 }
 0xc35   :  { %6254 = vmatprep.subr.mxu1 %v6309_v6  ;;  %6269 = vmatprep.subr.mxu0 %v6309_v6 }
 0xc36   :  { %6255 = vmatpush3.msra.mxu1 %v5015_v3  ;;  %6270 = vmatpush3.msra.mxu0 %v5110_v20 }
 0xc37   :  { %6271 = vmatprep.subr.mxu0 %v6309_v6 }
 0xc38   :  { %6272 = vmatpush3.msra.mxu0 %v5109_v43 }
 0xc39   :  { %6273 = vmatprep.subr.mxu0 %v6309_v6 }
 0xc3a   :  { %6274 = vmatpush3.msra.mxu0 %v5108_v37 }
 0xc3b   :  { %6275 = vmatprep.subr.mxu0 %v6309_v6 }
 0xc3c   :  { %6276 = vmatpush3.msra.mxu0 %v5107_v28 }
 0xc3d   :  { %6277 = vmatprep.subr.mxu0 %v6309_v6 }
 0xc3e   :  { %6278 = vmatpush3.msra.mxu0 %v5106_v44 }
 0xc3f   :  { %6279 = vmatprep.subr.mxu0 %v6309_v6 }
 0xc40   :  { %6280 = vmatpush3.msra.mxu0 %v5105_v38 }
 0xcc0   :  { %v4669_v0 = vpop.f32.mrf.mxu0  ;;  %v4754_v1 = vpop.f32.mrf.mxu1 }
 0xcc1   :  { %v4673_v16 = vadd.f32 %v4669_v0, %v4588_v39 }
 0xcc2   :  { %v6133_v18 = vpop.f32.mrf.mxu0  ;;  %v6156_v31 = vpop.f32.mrf.mxu1 }
 0xcc3   :  { %v4758_v34 = vadd.f32 %v4754_v1, %v4673_v16 }
 0xcd5   :  { %v4839_v26 = vpop.f32.mrf.mxu0  ;;  %v4924_v25 = vpop.f32.mrf.mxu1 }
 0xcd6   :  { %v4843_v41 = vadd.f32 %v4839_v26, %v4758_v34 }
 0xcd7   :  { %v6179_v23 = vpop.f32.mrf.mxu0  ;;  %v6202_v36 = vpop.f32.mrf.mxu1 }
 0xcd8   :  { %v4928_v14 = vadd.f32 %v4924_v25, %v4843_v41 }
 0xcea   :  { %v5009_v32 = vpop.f32.mrf.mxu0 }
 0xceb   :  { %v5013_v42 = vadd.f32 %v5009_v32, %v4928_v14 }
 0xcec   :  { %v6225_v29 = vpop.f32.mrf.mxu0 }
 0xced   :  { %v5014_v45 = vmax.f32 %v5013_v42, 0.0 }
 0xcef   :  { %6257 = vmatmul.mubr.msk.f32.vlgmr.msra.gmra.mxu1 %vm2471_vm11, %v5014_v45 }
 0xdaf   :  { %v5100_v46 = vpop.f32.mrf.mxu1 }
 0xdb0   :  { %v5101_v33 = vadd.f32 %v5100_v46, %v5030_v35 }
 0xdb1   :  { %v6258_v30 = vpop.f32.mrf.mxu1 }
 0xdb2   :  { %v5104_v47 = vmax.f32 %v5101_v33, 0.0 }
 0xdb4   :  { %6282 = vmatmul.mubr.msk.f32.vlgmr.msra.gmra.mxu0 %vm1066_vm4, %v5104_v47 }
 0xe74   :  { %v5189_v6 = vpop.f32.mrf.mxu0 }
 0xe75   :  { %v5190_v49 = vadd.f32 %v5189_v6, %v5116_v48 }
 0xe76   :  { %v6283_v50 = vpop.f32.mrf.mxu0 }
 0xe77   :  { %5193 = vst.msk [vmem:[#allocation4 + $0x1] sm:$0x1] %vm2634_vm12, %v5190_v49 }
 0xe78   :  { %6298 = shalt.err (!%p6295_p4)
}
 0xe79   :  { %5203 = dma.vmem_to_hbm [thread:$0]  %s5201_s4, 32, %s9031_s15, [#allocation5]  }
 0xe7a   :  { %6307 = dma.done.wait [#allocation5], 32  }
 0xe7b   :  { %6308 = vsyncadd [#allocation5], 4294967264 }
 0xe7c   :  { %5207 = vsyncpa [#allocation5], 1 }

</bundles_post_ra>
